<compile_context>
chip_gen: v7x
topology: tpu7x:2x2x1
jax: 0.10.0
libtpu: 0.0.40
codegen_flags: <defaults>
</compile_context>

<pallas_src>
import math

import jax
import jax.numpy as jnp
import numpy as np
from jax.experimental import pallas as pl
from jax.experimental.pallas import tpu as pltpu

# ----------------------------- model config (small) -------------------------
BATCH = 2
SEQ_LEN = 16
PRED_LEN = 8
NUM_NODES = 4
PATCH_LEN = 4
STRIDE = 4
PATCH_NUM = (SEQ_LEN - PATCH_LEN) // STRIDE + 1   # 4
D_MODEL = 32
N_HEADS = 4
D_HEAD = D_MODEL // N_HEADS                       # 8
D_FF = 64
E_LAYERS = 1
NUM_LAYERS = 2 * E_LAYERS                         # temporal + spatial stacks

BN = BATCH * NUM_NODES                            # 8 (series)
ROWS = BN * PATCH_NUM                             # 32 flattened tokens

# ----------------------------- packed slab layouts ---------------------------
# W slab: matmul weights, (W_ROWS, 128) f32
W_QKVO = 0                                        # per layer: 32 rows x 128 (q|k|v|o)
W_FF1 = W_QKVO + NUM_LAYERS * D_MODEL             # per layer: 32 rows x 64
W_FF2 = W_FF1 + NUM_LAYERS * D_MODEL              # per layer: 64 rows x 32
W_DECT = W_FF2 + NUM_LAYERS * D_FF                # 8 rows x 128 (decoder weight, transposed)
W_PROJ = W_DECT + PRED_LEN                        # 4 rows x 32 (input projection)
W_ROWS = 272

# C slab: constants / vectors, (C_ROWS, 64) f32
C_ADD_T = 0          # (32,32) proj bias + patch embedding, row-expanded
C_ADD_N = 32         # (32,32) node embedding, row-expanded
C_BIAS_T = 64        # (32,32) temporal-attention additive mask
C_BIAS_N = 96        # (32,32) spatial-attention additive mask
C_VEC = 128          # per layer (16-row stride, 10 used): bq,bk,bv,bo,ln1g,ln1b,bf1,bf2,ln2g,ln2b
C_LNF = C_VEC + NUM_LAYERS * 16                   # (4,32): [g_t, b_t, g_n, b_n]
C_EYE = 168          # (8,8) identity (column->row conversion of RevIN stats)
C_HMASK = 176        # (4,32) per-head lane masks
C_DECB = 184         # (8,1) decoder bias as a column
C_ROWS = 192


# ------------------------------- kernel helpers ------------------------------
def _layernorm(x, gamma, beta, eps=1e-5):
    mu = jnp.mean(x, axis=-1, keepdims=True)
    var = jnp.mean((x - mu) ** 2, axis=-1, keepdims=True)
    return (x - mu) * jax.lax.rsqrt(var + eps) * gamma + beta


def _encoder_layer(x, layer, w_ref, c_ref, bias, hmask):
    """One Transformer encoder layer on the flat (ROWS, D) slab.
    Sequences are selected purely via the additive `bias` mask (per-sequence
    softmax), heads via `hmask` lane masks (no lane-narrow slices, no concat)."""
    f32 = jnp.float32
    d = D_MODEL
    scale = 1.0 / math.sqrt(D_HEAD)

    w_qkvo = w_ref[W_QKVO + layer * d:W_QKVO + (layer + 1) * d, :]              # (32,128)
    w_ff1 = w_ref[W_FF1 + layer * d:W_FF1 + (layer + 1) * d, 0:D_FF]            # (32,64)
    w_ff2 = w_ref[W_FF2 + layer * D_FF:W_FF2 + (layer + 1) * D_FF, 0:d]         # (64,32)
    vec = c_ref[C_VEC + layer * 16:C_VEC + layer * 16 + 10, :]                  # (10,64)

    # fused QKV projection: one (ROWS, d) @ (d, 3d) matmul
    qkv = jnp.dot(x, w_qkvo[:, 0:3 * d], preferred_element_type=f32)            # (32,96)
    q = qkv[:, 0:d] + vec[0:1, 0:d]
    k = qkv[:, d:2 * d] + vec[1:2, 0:d]
    v = qkv[:, 2 * d:3 * d] + vec[2:3, 0:d]

    # per-head accumulation (masked contractions; masked lanes contribute exact 0)
    attn = jnp.zeros_like(x)
    for h in range(N_HEADS):
        mh = hmask[h:h + 1, :]                                                   # (1,32)
        s = jax.lax.dot_general(q * mh, k, (((1,), (1,)), ((), ())),
                                preferred_element_type=f32) * scale + bias
        s = s - jnp.max(s, axis=-1, keepdims=True)
        p = jnp.exp(s)
        p = p / jnp.sum(p, axis=-1, keepdims=True)
        attn = attn + jnp.dot(p, v * mh, preferred_element_type=f32)             # (32,32)
    new_x = jnp.dot(attn, w_qkvo[:, 3 * d:4 * d], preferred_element_type=f32) + vec[3:4, 0:d]

    # residual + norm1 (dropout is identity in eval mode)
    x = _layernorm(x + new_x, vec[4:5, 0:d], vec[5:6, 0:d])

    # FFN: Conv1d(k=1) == per-position dense
    y = jnp.dot(x, w_ff1, preferred_element_type=f32) + vec[6:7, :]
    # TODO(synk): PyTorch F.gelu is erf-exact; tanh approximation used here.
    y = jax.nn.gelu(y, approximate=True)
    y = jnp.dot(y, w_ff2, preferred_element_type=f32) + vec[7:8, 0:d]
    return _layernorm(x + y, vec[8:9, 0:d], vec[9:10, 0:d])


def fused_forward_kernel(x_ref, w_ref, c_ref, out_ref):
    f32 = jnp.float32
    d = D_MODEL

    # ---- instance norm over time, per (b, n) series (one row per series) ----
    x_bn = x_ref[...]                                        # (BN, T) = (8, 16)
    mean_c = jnp.mean(x_bn, axis=-1, keepdims=True)          # (BN, 1)
    var_c = jnp.mean((x_bn - mean_c) ** 2, axis=-1, keepdims=True)
    std_c = jnp.sqrt(var_c + 1e-5)
    xn = (x_bn - mean_c) / std_c

    # ---- non-overlapping patches + input projection; token rows = (p, b, n) ----
    w_proj = w_ref[W_PROJ:W_PROJ + PATCH_LEN, 0:d]           # (4, 32)
    x = jnp.concatenate(
        [jnp.dot(xn[:, p * PATCH_LEN:(p + 1) * PATCH_LEN], w_proj,
                 preferred_element_type=f32) for p in range(PATCH_NUM)],
        axis=0)                                              # (ROWS, D) = (32, 32)

    # ---- constants ----
    bias_t = c_ref[C_BIAS_T:C_BIAS_T + ROWS, 0:ROWS]
    bias_n = c_ref[C_BIAS_N:C_BIAS_N + ROWS, 0:ROWS]
    hmask = c_ref[C_HMASK:C_HMASK + N_HEADS, 0:d]
    lnf = c_ref[C_LNF:C_LNF + 4, 0:d]

    # ---- temporal embedding (proj bias + patch embedding) + temporal encoder ----
    x = x + c_ref[C_ADD_T:C_ADD_T + ROWS, 0:d]
    for l in range(E_LAYERS):
        x = _encoder_layer(x, l, w_ref, c_ref, bias_t, hmask)
    x = _layernorm(x, lnf[0:1, :], lnf[1:2, :])

    # ---- spatial embedding + spatial encoder (attention over nodes) ----
    x = x + c_ref[C_ADD_N:C_ADD_N + ROWS, 0:d]
    for l in range(E_LAYERS):
        x = _encoder_layer(x, E_LAYERS + l, w_ref, c_ref, bias_n, hmask)
    x = _layernorm(x, lnf[2:3, :], lnf[3:4, :])

    # ---- decoder head, computed directly in (horizon, series) layout ----
    dec_wT = w_ref[W_DECT:W_DECT + PRED_LEN, :]              # (PRED, P*D) = (8, 128)
    dec = jnp.zeros((PRED_LEN, BN), f32)
    for p in range(PATCH_NUM):
        dec = dec + jax.lax.dot_general(
            dec_wT[:, p * d:(p + 1) * d], x[p * BN:(p + 1) * BN, :],
            (((1,), (1,)), ((), ())), preferred_element_type=f32)   # (PRED, BN)
    dec = dec + c_ref[C_DECB:C_DECB + PRED_LEN, 0:1]         # + decoder bias (column)

    # ---- de-normalisation (RevIN tail) folded in ----
    eye = c_ref[C_EYE:C_EYE + BN, 0:BN]                      # (8,8) identity
    std_r = jnp.sum(std_c * eye, axis=0, keepdims=True)      # (1, BN)
    mean_r = jnp.sum(mean_c * eye, axis=0, keepdims=True)    # (1, BN)
    dec = dec * std_r + mean_r                               # (PRED, BN)

    # emit final (b, horizon, node) layout: out[b*PRED + t, n]
    for b in range(BATCH):
        out_ref[b * PRED_LEN:(b + 1) * PRED_LEN, :] = dec[:, b * NUM_NODES:(b + 1) * NUM_NODES]


# ------------------------------- parameters ----------------------------------
def _init_linear(key, fan_in, fan_out):
    kw, kb = jax.random.split(key)
    bound = 1.0 / math.sqrt(fan_in)
    w = jax.random.uniform(kw, (fan_in, fan_out), jnp.float32, -bound, bound)
    b = jax.random.uniform(kb, (fan_out,), jnp.float32, -bound, bound)
    return w, b


def _init_encoder_layer(key, d_model, d_ff):
    ks = jax.random.split(key, 6)
    wq, bq = _init_linear(ks[0], d_model, d_model)
    wk, bk = _init_linear(ks[1], d_model, d_model)
    wv, bv = _init_linear(ks[2], d_model, d_model)
    wo, bo = _init_linear(ks[3], d_model, d_model)
    w1, bf1 = _init_linear(ks[4], d_model, d_ff)
    w2, bf2 = _init_linear(ks[5], d_ff, d_model)
    vec = jnp.zeros((10, d_ff), jnp.float32)
    vec = vec.at[0, :d_model].set(bq)
    vec = vec.at[1, :d_model].set(bk)
    vec = vec.at[2, :d_model].set(bv)
    vec = vec.at[3, :d_model].set(bo)
    vec = vec.at[4, :d_model].set(1.0)        # LN1 gamma
    vec = vec.at[6, :].set(bf1)
    vec = vec.at[7, :d_model].set(bf2)
    vec = vec.at[8, :d_model].set(1.0)        # LN2 gamma
    return dict(w_qkvo=jnp.concatenate([wq, wk, wv, wo], axis=1),   # (D, 4D)
                w_ff1=w1, w_ff2=w2, vec=vec)


def init_params(key):
    keys = jax.random.split(key, 6)
    proj_w, proj_b = _init_linear(keys[0], PATCH_LEN, D_MODEL)
    patch_emb = jax.random.uniform(keys[1], (PATCH_NUM, D_MODEL), jnp.float32, -0.02, 0.02)
    node_emb = jax.random.uniform(keys[2], (NUM_NODES, D_MODEL), jnp.float32, -0.02, 0.02)
    layers = ([_init_encoder_layer(k, D_MODEL, D_FF)
               for k in jax.random.split(keys[3], E_LAYERS)] +          # temporal
              [_init_encoder_layer(k, D_MODEL, D_FF)
               for k in jax.random.split(keys[4], E_LAYERS)])           # spatial
    dec_w, dec_b = _init_linear(keys[5], PATCH_NUM * D_MODEL, PRED_LEN)

    # ---- packed matmul-weight slab (W_ROWS, 128) ----
    w_slab = jnp.zeros((W_ROWS, 128), jnp.float32)
    for l, L in enumerate(layers):
        w_slab = w_slab.at[W_QKVO + l * D_MODEL:W_QKVO + (l + 1) * D_MODEL, :].set(L["w_qkvo"])
        w_slab = w_slab.at[W_FF1 + l * D_MODEL:W_FF1 + (l + 1) * D_MODEL, 0:D_FF].set(L["w_ff1"])
        w_slab = w_slab.at[W_FF2 + l * D_FF:W_FF2 + (l + 1) * D_FF, 0:D_MODEL].set(L["w_ff2"])
    w_slab = w_slab.at[W_DECT:W_DECT + PRED_LEN, :].set(dec_w.T)
    w_slab = w_slab.at[W_PROJ:W_PROJ + PATCH_LEN, 0:D_MODEL].set(proj_w)

    # ---- packed constants/vectors slab (C_ROWS, 64), all built once at init ----
    r = np.arange(ROWS)
    p_of_r = r // BN                                     # token row -> patch index
    n_of_r = r % NUM_NODES                               # token row -> node index
    add_t = proj_b[None, :] + patch_emb[p_of_r]          # (32,32)
    add_n = node_emb[n_of_r]                             # (32,32)
    bias_t = np.where((r[:, None] % BN) == (r[None, :] % BN), 0.0, -1e30).astype(np.float32)
    bias_n = np.where((r[:, None] // NUM_NODES) == (r[None, :] // NUM_NODES),
                      0.0, -1e30).astype(np.float32)
    hmask = np.zeros((N_HEADS, D_MODEL), np.float32)
    for h in range(N_HEADS):
        hmask[h, h * D_HEAD:(h + 1) * D_HEAD] = 1.0

    c_slab = jnp.zeros((C_ROWS, 64), jnp.float32)
    c_slab = c_slab.at[C_ADD_T:C_ADD_T + ROWS, 0:D_MODEL].set(add_t)
    c_slab = c_slab.at[C_ADD_N:C_ADD_N + ROWS, 0:D_MODEL].set(add_n)
    c_slab = c_slab.at[C_BIAS_T:C_BIAS_T + ROWS, 0:ROWS].set(bias_t)
    c_slab = c_slab.at[C_BIAS_N:C_BIAS_N + ROWS, 0:ROWS].set(bias_n)
    for l, L in enumerate(layers):
        c_slab = c_slab.at[C_VEC + l * 16:C_VEC + l * 16 + 10, :].set(L["vec"])
    c_slab = c_slab.at[C_LNF, 0:D_MODEL].set(1.0)        # encoder_t final LN gamma
    c_slab = c_slab.at[C_LNF + 2, 0:D_MODEL].set(1.0)    # encoder_n final LN gamma
    c_slab = c_slab.at[C_EYE:C_EYE + BN, 0:BN].set(jnp.eye(BN, dtype=jnp.float32))
    c_slab = c_slab.at[C_HMASK:C_HMASK + N_HEADS, 0:D_MODEL].set(hmask)
    c_slab = c_slab.at[C_DECB:C_DECB + PRED_LEN, 0].set(dec_b)

    return dict(w_slab=w_slab, c_slab=c_slab)


# -------------------------------- forward ------------------------------------
@jax.jit
def forward(params, x_batch, x_batch_mark, y_batch_zero, y_batch_mark):
    # x_batch: (B, seq_len, num_nodes); marks / zero inputs unused (as in PyTorch).
    del x_batch_mark, y_batch_zero, y_batch_mark
    b = x_batch.shape[0]
    # (B, T, N) -> (B*N, T): the only host-side data-movement op; everything else
    # (RevIN, patching, both encoders, decoder, de-norm) runs inside the kernel.
    x_bn = jnp.transpose(x_batch, (0, 2, 1)).reshape(b * NUM_NODES, SEQ_LEN)

    out = pl.pallas_call(
        fused_forward_kernel,
        out_shape=jax.ShapeDtypeStruct((b * PRED_LEN, NUM_NODES), jnp.float32),
        in_specs=[pl.BlockSpec(memory_space=pltpu.MemorySpace.VMEM)] * 3,
        out_specs=pl.BlockSpec(memory_space=pltpu.MemorySpace.VMEM),
    )(x_bn, params["w_slab"], params["c_slab"])                     # (B*pred, N)

    return out.reshape(b, PRED_LEN, NUM_NODES)                       # (B, pred, N)


# --------------------------------- main ---------------------------------------
if __name__ == "__main__":
    key = jax.random.PRNGKey(0)
    k_param, k_x, k_xm = jax.random.split(key, 3)
    params = init_params(k_param)

    x_batch = jax.random.normal(k_x, (BATCH, SEQ_LEN, NUM_NODES), jnp.float32)
    x_batch_mark = jax.random.normal(k_xm, (BATCH, SEQ_LEN, 4), jnp.float32)   # unused
    y_batch_zero = jnp.zeros((BATCH, PRED_LEN, NUM_NODES), jnp.float32)        # unused
    y_batch_mark = jnp.zeros((BATCH, PRED_LEN, 4), jnp.float32)                # unused

    out = forward(params, x_batch, x_batch_mark, y_batch_zero, y_batch_mark)
    out = jax.block_until_ready(out)
    assert out.shape == (BATCH, PRED_LEN, NUM_NODES), out.shape
    assert bool(jnp.all(jnp.isfinite(out)))
    print("KERNEL_OK")
</pallas_src>

<mosaic_0001>
module attributes {stable_mosaic.version = 11 : i64} {
  func.func @fused_forward_kernel(%arg0: memref<8x16xf32, #tpu.memory_space<vmem>>, %arg1: memref<272x128xf32, #tpu.memory_space<vmem>>, %arg2: memref<192x64xf32, #tpu.memory_space<vmem>>, %arg3: memref<16x4xf32, #tpu.memory_space<vmem>>) attributes {dimension_semantics = [], scalar_prefetch = 0 : i64, scratch_operands = 0 : i64, tpu.core_type = #tpu.core_type<tc>} {
    %c0 = arith.constant 0 : index
    %c0_0 = arith.constant 0 : index
    %0 = vector.load %arg0[%c0, %c0_0] : memref<8x16xf32, #tpu.memory_space<vmem>>, vector<8x16xf32>
    %cst = arith.constant dense<0.000000e+00> : vector<8xf32>
    %1 = vector.multi_reduction <add>, %0, %cst [1] : vector<8x16xf32> to vector<8xf32>
    %2 = vector.shape_cast %1 : vector<8xf32> to vector<8x1xf32>
    %cst_1 = arith.constant 1.600000e+01 : f32
    %3 = vector.broadcast %cst_1 : f32 to vector<8x1xf32>
    %4 = arith.divf %2, %3 : vector<8x1xf32>
    %5 = vector.broadcast %4 : vector<8x1xf32> to vector<8x16xf32>
    %6 = arith.subf %0, %5 : vector<8x16xf32>
    %7 = arith.mulf %6, %6 : vector<8x16xf32>
    %cst_2 = arith.constant dense<0.000000e+00> : vector<8xf32>
    %8 = vector.multi_reduction <add>, %7, %cst_2 [1] : vector<8x16xf32> to vector<8xf32>
    %9 = vector.shape_cast %8 : vector<8xf32> to vector<8x1xf32>
    %cst_3 = arith.constant 1.600000e+01 : f32
    %10 = vector.broadcast %cst_3 : f32 to vector<8x1xf32>
    %11 = arith.divf %9, %10 : vector<8x1xf32>
    %cst_4 = arith.constant 9.99999974E-6 : f32
    %12 = vector.broadcast %cst_4 : f32 to vector<8x1xf32>
    %13 = arith.addf %11, %12 : vector<8x1xf32>
    %14 = math.sqrt %13 : vector<8x1xf32>
    %15 = vector.broadcast %4 : vector<8x1xf32> to vector<8x16xf32>
    %16 = arith.subf %0, %15 : vector<8x16xf32>
    %17 = vector.broadcast %14 : vector<8x1xf32> to vector<8x16xf32>
    %18 = arith.divf %16, %17 : vector<8x16xf32>
    %c264 = arith.constant 264 : index
    %c0_5 = arith.constant 0 : index
    %19 = vector.load %arg1[%c264, %c0_5] : memref<272x128xf32, #tpu.memory_space<vmem>>, vector<4x32xf32>
    %20 = vector.extract_strided_slice %18 {offsets = [0, 0], sizes = [8, 4], strides = [1, 1]} : vector<8x16xf32> to vector<8x4xf32>
    %cst_6 = arith.constant dense<0.000000e+00> : vector<8x32xf32>
    %21 = tpu.matmul %20, %19, %cst_6 {dimension_numbers = #tpu.dot_dimension_numbers<[1], [0], [0], [1], [0, 0, 1, 1], [], []>} : vector<8x4xf32>, vector<4x32xf32>, vector<8x32xf32> -> vector<8x32xf32>
    %22 = vector.extract_strided_slice %18 {offsets = [0, 4], sizes = [8, 4], strides = [1, 1]} : vector<8x16xf32> to vector<8x4xf32>
    %cst_7 = arith.constant dense<0.000000e+00> : vector<8x32xf32>
    %23 = tpu.matmul %22, %19, %cst_7 {dimension_numbers = #tpu.dot_dimension_numbers<[1], [0], [0], [1], [0, 0, 1, 1], [], []>} : vector<8x4xf32>, vector<4x32xf32>, vector<8x32xf32> -> vector<8x32xf32>
    %24 = vector.extract_strided_slice %18 {offsets = [0, 8], sizes = [8, 4], strides = [1, 1]} : vector<8x16xf32> to vector<8x4xf32>
    %cst_8 = arith.constant dense<0.000000e+00> : vector<8x32xf32>
    %25 = tpu.matmul %24, %19, %cst_8 {dimension_numbers = #tpu.dot_dimension_numbers<[1], [0], [0], [1], [0, 0, 1, 1], [], []>} : vector<8x4xf32>, vector<4x32xf32>, vector<8x32xf32> -> vector<8x32xf32>
    %26 = vector.extract_strided_slice %18 {offsets = [0, 12], sizes = [8, 4], strides = [1, 1]} : vector<8x16xf32> to vector<8x4xf32>
    %cst_9 = arith.constant dense<0.000000e+00> : vector<8x32xf32>
    %27 = tpu.matmul %26, %19, %cst_9 {dimension_numbers = #tpu.dot_dimension_numbers<[1], [0], [0], [1], [0, 0, 1, 1], [], []>} : vector<8x4xf32>, vector<4x32xf32>, vector<8x32xf32> -> vector<8x32xf32>
    %28 = tpu.concatenate %21, %23, %25, %27 in 0 : vector<8x32xf32>, vector<8x32xf32>, vector<8x32xf32>, vector<8x32xf32> -> vector<32x32xf32>
    %c64 = arith.constant 64 : index
    %c0_10 = arith.constant 0 : index
    %29 = vector.load %arg2[%c64, %c0_10] : memref<192x64xf32, #tpu.memory_space<vmem>>, vector<32x32xf32>
    %c96 = arith.constant 96 : index
    %c0_11 = arith.constant 0 : index
    %30 = vector.load %arg2[%c96, %c0_11] : memref<192x64xf32, #tpu.memory_space<vmem>>, vector<32x32xf32>
    %c176 = arith.constant 176 : index
    %c0_12 = arith.constant 0 : index
    %31 = vector.load %arg2[%c176, %c0_12] : memref<192x64xf32, #tpu.memory_space<vmem>>, vector<4x32xf32>
    %c160 = arith.constant 160 : index
    %c0_13 = arith.constant 0 : index
    %32 = vector.load %arg2[%c160, %c0_13] : memref<192x64xf32, #tpu.memory_space<vmem>>, vector<4x32xf32>
    %c0_14 = arith.constant 0 : index
    %c0_15 = arith.constant 0 : index
    %33 = vector.load %arg2[%c0_14, %c0_15] : memref<192x64xf32, #tpu.memory_space<vmem>>, vector<32x32xf32>
    %34 = arith.addf %28, %33 : vector<32x32xf32>
    %c0_16 = arith.constant 0 : index
    %c0_17 = arith.constant 0 : index
    %35 = vector.load %arg1[%c0_16, %c0_17] : memref<272x128xf32, #tpu.memory_space<vmem>>, vector<32x128xf32>
    %c64_18 = arith.constant 64 : index
    %c0_19 = arith.constant 0 : index
    %36 = vector.load %arg1[%c64_18, %c0_19] : memref<272x128xf32, #tpu.memory_space<vmem>>, vector<32x64xf32>
    %c128 = arith.constant 128 : index
    %c0_20 = arith.constant 0 : index
    %37 = vector.load %arg1[%c128, %c0_20] : memref<272x128xf32, #tpu.memory_space<vmem>>, vector<64x32xf32>
    %c128_21 = arith.constant 128 : index
    %c0_22 = arith.constant 0 : index
    %38 = vector.load %arg2[%c128_21, %c0_22] : memref<192x64xf32, #tpu.memory_space<vmem>>, vector<10x64xf32>
    %39 = vector.extract_strided_slice %35 {offsets = [0, 0], sizes = [32, 96], strides = [1, 1]} : vector<32x128xf32> to vector<32x96xf32>
    %cst_23 = arith.constant dense<0.000000e+00> : vector<32x96xf32>
    %40 = tpu.matmul %34, %39, %cst_23 {dimension_numbers = #tpu.dot_dimension_numbers<[1], [0], [0], [1], [0, 0, 1, 1], [], []>} : vector<32x32xf32>, vector<32x96xf32>, vector<32x96xf32> -> vector<32x96xf32>
    %41 = vector.extract_strided_slice %40 {offsets = [0, 0], sizes = [32, 32], strides = [1, 1]} : vector<32x96xf32> to vector<32x32xf32>
    %42 = vector.extract_strided_slice %38 {offsets = [0, 0], sizes = [1, 32], strides = [1, 1]} : vector<10x64xf32> to vector<1x32xf32>
    %43 = vector.broadcast %42 : vector<1x32xf32> to vector<32x32xf32>
    %44 = arith.addf %41, %43 : vector<32x32xf32>
    %45 = vector.extract_strided_slice %40 {offsets = [0, 32], sizes = [32, 32], strides = [1, 1]} : vector<32x96xf32> to vector<32x32xf32>
    %46 = vector.extract_strided_slice %38 {offsets = [1, 0], sizes = [1, 32], strides = [1, 1]} : vector<10x64xf32> to vector<1x32xf32>
    %47 = vector.broadcast %46 : vector<1x32xf32> to vector<32x32xf32>
    %48 = arith.addf %45, %47 : vector<32x32xf32>
    %49 = vector.extract_strided_slice %40 {offsets = [0, 64], sizes = [32, 32], strides = [1, 1]} : vector<32x96xf32> to vector<32x32xf32>
    %50 = vector.extract_strided_slice %38 {offsets = [2, 0], sizes = [1, 32], strides = [1, 1]} : vector<10x64xf32> to vector<1x32xf32>
    %51 = vector.broadcast %50 : vector<1x32xf32> to vector<32x32xf32>
    %52 = arith.addf %49, %51 : vector<32x32xf32>
    %cst_24 = arith.constant 0.000000e+00 : f32
    %53 = vector.broadcast %cst_24 : f32 to vector<32x32xf32>
    %54 = vector.extract_strided_slice %31 {offsets = [0, 0], sizes = [1, 32], strides = [1, 1]} : vector<4x32xf32> to vector<1x32xf32>
    %55 = vector.broadcast %54 : vector<1x32xf32> to vector<32x32xf32>
    %56 = arith.mulf %44, %55 : vector<32x32xf32>
    %cst_25 = arith.constant dense<0.000000e+00> : vector<32x32xf32>
    %57 = tpu.matmul %56, %48, %cst_25 {dimension_numbers = #tpu.dot_dimension_numbers<[1], [1], [0], [0], [0, 0, 1, 0], [], []>} : vector<32x32xf32>, vector<32x32xf32>, vector<32x32xf32> -> vector<32x32xf32>
    %cst_26 = arith.constant 0.353553385 : f32
    %58 = vector.broadcast %cst_26 : f32 to vector<32x32xf32>
    %59 = arith.mulf %57, %58 : vector<32x32xf32>
    %60 = arith.addf %59, %29 : vector<32x32xf32>
    %cst_27 = arith.constant dense<0xFF800000> : vector<32xf32>
    %61 = vector.multi_reduction <maximumf>, %60, %cst_27 [1] : vector<32x32xf32> to vector<32xf32>
    %62 = vector.shape_cast %61 : vector<32xf32> to vector<32x1xf32>
    %63 = vector.broadcast %62 : vector<32x1xf32> to vector<32x32xf32>
    %64 = arith.subf %60, %63 : vector<32x32xf32>
    %65 = math.exp %64 : vector<32x32xf32>
    %cst_28 = arith.constant dense<0.000000e+00> : vector<32xf32>
    %66 = vector.multi_reduction <add>, %65, %cst_28 [1] : vector<32x32xf32> to vector<32xf32>
    %67 = vector.shape_cast %66 : vector<32xf32> to vector<32x1xf32>
    %68 = vector.broadcast %67 : vector<32x1xf32> to vector<32x32xf32>
    %69 = arith.divf %65, %68 : vector<32x32xf32>
    %70 = vector.broadcast %54 : vector<1x32xf32> to vector<32x32xf32>
    %71 = arith.mulf %52, %70 : vector<32x32xf32>
    %cst_29 = arith.constant dense<0.000000e+00> : vector<32x32xf32>
    %72 = tpu.matmul %69, %71, %cst_29 {dimension_numbers = #tpu.dot_dimension_numbers<[1], [0], [0], [1], [0, 0, 1, 1], [], []>} : vector<32x32xf32>, vector<32x32xf32>, vector<32x32xf32> -> vector<32x32xf32>
    %73 = arith.addf %53, %72 : vector<32x32xf32>
    %74 = vector.extract_strided_slice %31 {offsets = [1, 0], sizes = [1, 32], strides = [1, 1]} : vector<4x32xf32> to vector<1x32xf32>
    %75 = vector.broadcast %74 : vector<1x32xf32> to vector<32x32xf32>
    %76 = arith.mulf %44, %75 : vector<32x32xf32>
    %cst_30 = arith.constant dense<0.000000e+00> : vector<32x32xf32>
    %77 = tpu.matmul %76, %48, %cst_30 {dimension_numbers = #tpu.dot_dimension_numbers<[1], [1], [0], [0], [0, 0, 1, 0], [], []>} : vector<32x32xf32>, vector<32x32xf32>, vector<32x32xf32> -> vector<32x32xf32>
    %cst_31 = arith.constant 0.353553385 : f32
    %78 = vector.broadcast %cst_31 : f32 to vector<32x32xf32>
    %79 = arith.mulf %77, %78 : vector<32x32xf32>
    %80 = arith.addf %79, %29 : vector<32x32xf32>
    %cst_32 = arith.constant dense<0xFF800000> : vector<32xf32>
    %81 = vector.multi_reduction <maximumf>, %80, %cst_32 [1] : vector<32x32xf32> to vector<32xf32>
    %82 = vector.shape_cast %81 : vector<32xf32> to vector<32x1xf32>
    %83 = vector.broadcast %82 : vector<32x1xf32> to vector<32x32xf32>
    %84 = arith.subf %80, %83 : vector<32x32xf32>
    %85 = math.exp %84 : vector<32x32xf32>
    %cst_33 = arith.constant dense<0.000000e+00> : vector<32xf32>
    %86 = vector.multi_reduction <add>, %85, %cst_33 [1] : vector<32x32xf32> to vector<32xf32>
    %87 = vector.shape_cast %86 : vector<32xf32> to vector<32x1xf32>
    %88 = vector.broadcast %87 : vector<32x1xf32> to vector<32x32xf32>
    %89 = arith.divf %85, %88 : vector<32x32xf32>
    %90 = vector.broadcast %74 : vector<1x32xf32> to vector<32x32xf32>
    %91 = arith.mulf %52, %90 : vector<32x32xf32>
    %cst_34 = arith.constant dense<0.000000e+00> : vector<32x32xf32>
    %92 = tpu.matmul %89, %91, %cst_34 {dimension_numbers = #tpu.dot_dimension_numbers<[1], [0], [0], [1], [0, 0, 1, 1], [], []>} : vector<32x32xf32>, vector<32x32xf32>, vector<32x32xf32> -> vector<32x32xf32>
    %93 = arith.addf %73, %92 : vector<32x32xf32>
    %94 = vector.extract_strided_slice %31 {offsets = [2, 0], sizes = [1, 32], strides = [1, 1]} : vector<4x32xf32> to vector<1x32xf32>
    %95 = vector.broadcast %94 : vector<1x32xf32> to vector<32x32xf32>
    %96 = arith.mulf %44, %95 : vector<32x32xf32>
    %cst_35 = arith.constant dense<0.000000e+00> : vector<32x32xf32>
    %97 = tpu.matmul %96, %48, %cst_35 {dimension_numbers = #tpu.dot_dimension_numbers<[1], [1], [0], [0], [0, 0, 1, 0], [], []>} : vector<32x32xf32>, vector<32x32xf32>, vector<32x32xf32> -> vector<32x32xf32>
    %cst_36 = arith.constant 0.353553385 : f32
    %98 = vector.broadcast %cst_36 : f32 to vector<32x32xf32>
    %99 = arith.mulf %97, %98 : vector<32x32xf32>
    %100 = arith.addf %99, %29 : vector<32x32xf32>
    %cst_37 = arith.constant dense<0xFF800000> : vector<32xf32>
    %101 = vector.multi_reduction <maximumf>, %100, %cst_37 [1] : vector<32x32xf32> to vector<32xf32>
    %102 = vector.shape_cast %101 : vector<32xf32> to vector<32x1xf32>
    %103 = vector.broadcast %102 : vector<32x1xf32> to vector<32x32xf32>
    %104 = arith.subf %100, %103 : vector<32x32xf32>
    %105 = math.exp %104 : vector<32x32xf32>
    %cst_38 = arith.constant dense<0.000000e+00> : vector<32xf32>
    %106 = vector.multi_reduction <add>, %105, %cst_38 [1] : vector<32x32xf32> to vector<32xf32>
    %107 = vector.shape_cast %106 : vector<32xf32> to vector<32x1xf32>
    %108 = vector.broadcast %107 : vector<32x1xf32> to vector<32x32xf32>
    %109 = arith.divf %105, %108 : vector<32x32xf32>
    %110 = vector.broadcast %94 : vector<1x32xf32> to vector<32x32xf32>
    %111 = arith.mulf %52, %110 : vector<32x32xf32>
    %cst_39 = arith.constant dense<0.000000e+00> : vector<32x32xf32>
    %112 = tpu.matmul %109, %111, %cst_39 {dimension_numbers = #tpu.dot_dimension_numbers<[1], [0], [0], [1], [0, 0, 1, 1], [], []>} : vector<32x32xf32>, vector<32x32xf32>, vector<32x32xf32> -> vector<32x32xf32>
    %113 = arith.addf %93, %112 : vector<32x32xf32>
    %114 = vector.extract_strided_slice %31 {offsets = [3, 0], sizes = [1, 32], strides = [1, 1]} : vector<4x32xf32> to vector<1x32xf32>
    %115 = vector.broadcast %114 : vector<1x32xf32> to vector<32x32xf32>
    %116 = arith.mulf %44, %115 : vector<32x32xf32>
    %cst_40 = arith.constant dense<0.000000e+00> : vector<32x32xf32>
    %117 = tpu.matmul %116, %48, %cst_40 {dimension_numbers = #tpu.dot_dimension_numbers<[1], [1], [0], [0], [0, 0, 1, 0], [], []>} : vector<32x32xf32>, vector<32x32xf32>, vector<32x32xf32> -> vector<32x32xf32>
    %cst_41 = arith.constant 0.353553385 : f32
    %118 = vector.broadcast %cst_41 : f32 to vector<32x32xf32>
    %119 = arith.mulf %117, %118 : vector<32x32xf32>
    %120 = arith.addf %119, %29 : vector<32x32xf32>
    %cst_42 = arith.constant dense<0xFF800000> : vector<32xf32>
    %121 = vector.multi_reduction <maximumf>, %120, %cst_42 [1] : vector<32x32xf32> to vector<32xf32>
    %122 = vector.shape_cast %121 : vector<32xf32> to vector<32x1xf32>
    %123 = vector.broadcast %122 : vector<32x1xf32> to vector<32x32xf32>
    %124 = arith.subf %120, %123 : vector<32x32xf32>
    %125 = math.exp %124 : vector<32x32xf32>
    %cst_43 = arith.constant dense<0.000000e+00> : vector<32xf32>
    %126 = vector.multi_reduction <add>, %125, %cst_43 [1] : vector<32x32xf32> to vector<32xf32>
    %127 = vector.shape_cast %126 : vector<32xf32> to vector<32x1xf32>
    %128 = vector.broadcast %127 : vector<32x1xf32> to vector<32x32xf32>
    %129 = arith.divf %125, %128 : vector<32x32xf32>
    %130 = vector.broadcast %114 : vector<1x32xf32> to vector<32x32xf32>
    %131 = arith.mulf %52, %130 : vector<32x32xf32>
    %cst_44 = arith.constant dense<0.000000e+00> : vector<32x32xf32>
    %132 = tpu.matmul %129, %131, %cst_44 {dimension_numbers = #tpu.dot_dimension_numbers<[1], [0], [0], [1], [0, 0, 1, 1], [], []>} : vector<32x32xf32>, vector<32x32xf32>, vector<32x32xf32> -> vector<32x32xf32>
    %133 = arith.addf %113, %132 : vector<32x32xf32>
    %134 = vector.extract_strided_slice %35 {offsets = [0, 96], sizes = [32, 32], strides = [1, 1]} : vector<32x128xf32> to vector<32x32xf32>
    %cst_45 = arith.constant dense<0.000000e+00> : vector<32x32xf32>
    %135 = tpu.matmul %133, %134, %cst_45 {dimension_numbers = #tpu.dot_dimension_numbers<[1], [0], [0], [1], [0, 0, 1, 1], [], []>} : vector<32x32xf32>, vector<32x32xf32>, vector<32x32xf32> -> vector<32x32xf32>
    %136 = vector.extract_strided_slice %38 {offsets = [3, 0], sizes = [1, 32], strides = [1, 1]} : vector<10x64xf32> to vector<1x32xf32>
    %137 = vector.broadcast %136 : vector<1x32xf32> to vector<32x32xf32>
    %138 = arith.addf %135, %137 : vector<32x32xf32>
    %139 = arith.addf %34, %138 : vector<32x32xf32>
    %140 = vector.extract_strided_slice %38 {offsets = [4, 0], sizes = [1, 32], strides = [1, 1]} : vector<10x64xf32> to vector<1x32xf32>
    %141 = vector.extract_strided_slice %38 {offsets = [5, 0], sizes = [1, 32], strides = [1, 1]} : vector<10x64xf32> to vector<1x32xf32>
    %cst_46 = arith.constant dense<0.000000e+00> : vector<32xf32>
    %142 = vector.multi_reduction <add>, %139, %cst_46 [1] : vector<32x32xf32> to vector<32xf32>
    %143 = vector.shape_cast %142 : vector<32xf32> to vector<32x1xf32>
    %cst_47 = arith.constant 3.200000e+01 : f32
    %144 = vector.broadcast %cst_47 : f32 to vector<32x1xf32>
    %145 = arith.divf %143, %144 : vector<32x1xf32>
    %146 = vector.broadcast %145 : vector<32x1xf32> to vector<32x32xf32>
    %147 = arith.subf %139, %146 : vector<32x32xf32>
    %148 = arith.mulf %147, %147 : vector<32x32xf32>
    %cst_48 = arith.constant dense<0.000000e+00> : vector<32xf32>
    %149 = vector.multi_reduction <add>, %148, %cst_48 [1] : vector<32x32xf32> to vector<32xf32>
    %150 = vector.shape_cast %149 : vector<32xf32> to vector<32x1xf32>
    %cst_49 = arith.constant 3.200000e+01 : f32
    %151 = vector.broadcast %cst_49 : f32 to vector<32x1xf32>
    %152 = arith.divf %150, %151 : vector<32x1xf32>
    %153 = vector.broadcast %145 : vector<32x1xf32> to vector<32x32xf32>
    %154 = arith.subf %139, %153 : vector<32x32xf32>
    %cst_50 = arith.constant 9.99999974E-6 : f32
    %155 = vector.broadcast %cst_50 : f32 to vector<32x1xf32>
    %156 = arith.addf %152, %155 : vector<32x1xf32>
    %157 = math.rsqrt %156 : vector<32x1xf32>
    %158 = vector.broadcast %157 : vector<32x1xf32> to vector<32x32xf32>
    %159 = arith.mulf %154, %158 : vector<32x32xf32>
    %160 = vector.broadcast %140 : vector<1x32xf32> to vector<32x32xf32>
    %161 = arith.mulf %159, %160 : vector<32x32xf32>
    %162 = vector.broadcast %141 : vector<1x32xf32> to vector<32x32xf32>
    %163 = arith.addf %161, %162 : vector<32x32xf32>
    %cst_51 = arith.constant dense<0.000000e+00> : vector<32x64xf32>
    %164 = tpu.matmul %163, %36, %cst_51 {dimension_numbers = #tpu.dot_dimension_numbers<[1], [0], [0], [1], [0, 0, 1, 1], [], []>} : vector<32x32xf32>, vector<32x64xf32>, vector<32x64xf32> -> vector<32x64xf32>
    %165 = vector.extract_strided_slice %38 {offsets = [6, 0], sizes = [1, 64], strides = [1, 1]} : vector<10x64xf32> to vector<1x64xf32>
    %166 = vector.broadcast %165 : vector<1x64xf32> to vector<32x64xf32>
    %167 = arith.addf %164, %166 : vector<32x64xf32>
    %168 = arith.mulf %167, %167 : vector<32x64xf32>
    %169 = arith.mulf %167, %168 : vector<32x64xf32>
    %cst_52 = arith.constant 4.471500e-02 : f32
    %170 = vector.broadcast %cst_52 : f32 to vector<32x64xf32>
    %171 = arith.mulf %170, %169 : vector<32x64xf32>
    %172 = arith.addf %167, %171 : vector<32x64xf32>
    %cst_53 = arith.constant 0.797884583 : f32
    %173 = vector.broadcast %cst_53 : f32 to vector<32x64xf32>
    %174 = arith.mulf %173, %172 : vector<32x64xf32>
    %175 = math.tanh %174 : vector<32x64xf32>
    %cst_54 = arith.constant 1.000000e+00 : f32
    %176 = vector.broadcast %cst_54 : f32 to vector<32x64xf32>
    %177 = arith.addf %176, %175 : vector<32x64xf32>
    %cst_55 = arith.constant 5.000000e-01 : f32
    %178 = vector.broadcast %cst_55 : f32 to vector<32x64xf32>
    %179 = arith.mulf %178, %177 : vector<32x64xf32>
    %180 = arith.mulf %167, %179 : vector<32x64xf32>
    %cst_56 = arith.constant dense<0.000000e+00> : vector<32x32xf32>
    %181 = tpu.matmul %180, %37, %cst_56 {dimension_numbers = #tpu.dot_dimension_numbers<[1], [0], [0], [1], [0, 0, 1, 1], [], []>} : vector<32x64xf32>, vector<64x32xf32>, vector<32x32xf32> -> vector<32x32xf32>
    %182 = vector.extract_strided_slice %38 {offsets = [7, 0], sizes = [1, 32], strides = [1, 1]} : vector<10x64xf32> to vector<1x32xf32>
    %183 = vector.broadcast %182 : vector<1x32xf32> to vector<32x32xf32>
    %184 = arith.addf %181, %183 : vector<32x32xf32>
    %185 = arith.addf %163, %184 : vector<32x32xf32>
    %186 = vector.extract_strided_slice %38 {offsets = [8, 0], sizes = [1, 32], strides = [1, 1]} : vector<10x64xf32> to vector<1x32xf32>
    %187 = vector.extract_strided_slice %38 {offsets = [9, 0], sizes = [1, 32], strides = [1, 1]} : vector<10x64xf32> to vector<1x32xf32>
    %cst_57 = arith.constant dense<0.000000e+00> : vector<32xf32>
    %188 = vector.multi_reduction <add>, %185, %cst_57 [1] : vector<32x32xf32> to vector<32xf32>
    %189 = vector.shape_cast %188 : vector<32xf32> to vector<32x1xf32>
    %cst_58 = arith.constant 3.200000e+01 : f32
    %190 = vector.broadcast %cst_58 : f32 to vector<32x1xf32>
    %191 = arith.divf %189, %190 : vector<32x1xf32>
    %192 = vector.broadcast %191 : vector<32x1xf32> to vector<32x32xf32>
    %193 = arith.subf %185, %192 : vector<32x32xf32>
    %194 = arith.mulf %193, %193 : vector<32x32xf32>
    %cst_59 = arith.constant dense<0.000000e+00> : vector<32xf32>
    %195 = vector.multi_reduction <add>, %194, %cst_59 [1] : vector<32x32xf32> to vector<32xf32>
    %196 = vector.shape_cast %195 : vector<32xf32> to vector<32x1xf32>
    %cst_60 = arith.constant 3.200000e+01 : f32
    %197 = vector.broadcast %cst_60 : f32 to vector<32x1xf32>
    %198 = arith.divf %196, %197 : vector<32x1xf32>
    %199 = vector.broadcast %191 : vector<32x1xf32> to vector<32x32xf32>
    %200 = arith.subf %185, %199 : vector<32x32xf32>
    %cst_61 = arith.constant 9.99999974E-6 : f32
    %201 = vector.broadcast %cst_61 : f32 to vector<32x1xf32>
    %202 = arith.addf %198, %201 : vector<32x1xf32>
    %203 = math.rsqrt %202 : vector<32x1xf32>
    %204 = vector.broadcast %203 : vector<32x1xf32> to vector<32x32xf32>
    %205 = arith.mulf %200, %204 : vector<32x32xf32>
    %206 = vector.broadcast %186 : vector<1x32xf32> to vector<32x32xf32>
    %207 = arith.mulf %205, %206 : vector<32x32xf32>
    %208 = vector.broadcast %187 : vector<1x32xf32> to vector<32x32xf32>
    %209 = arith.addf %207, %208 : vector<32x32xf32>
    %210 = vector.extract_strided_slice %32 {offsets = [0, 0], sizes = [1, 32], strides = [1, 1]} : vector<4x32xf32> to vector<1x32xf32>
    %211 = vector.extract_strided_slice %32 {offsets = [1, 0], sizes = [1, 32], strides = [1, 1]} : vector<4x32xf32> to vector<1x32xf32>
    %cst_62 = arith.constant dense<0.000000e+00> : vector<32xf32>
    %212 = vector.multi_reduction <add>, %209, %cst_62 [1] : vector<32x32xf32> to vector<32xf32>
    %213 = vector.shape_cast %212 : vector<32xf32> to vector<32x1xf32>
    %cst_63 = arith.constant 3.200000e+01 : f32
    %214 = vector.broadcast %cst_63 : f32 to vector<32x1xf32>
    %215 = arith.divf %213, %214 : vector<32x1xf32>
    %216 = vector.broadcast %215 : vector<32x1xf32> to vector<32x32xf32>
    %217 = arith.subf %209, %216 : vector<32x32xf32>
    %218 = arith.mulf %217, %217 : vector<32x32xf32>
    %cst_64 = arith.constant dense<0.000000e+00> : vector<32xf32>
    %219 = vector.multi_reduction <add>, %218, %cst_64 [1] : vector<32x32xf32> to vector<32xf32>
    %220 = vector.shape_cast %219 : vector<32xf32> to vector<32x1xf32>
    %cst_65 = arith.constant 3.200000e+01 : f32
    %221 = vector.broadcast %cst_65 : f32 to vector<32x1xf32>
    %222 = arith.divf %220, %221 : vector<32x1xf32>
    %223 = vector.broadcast %215 : vector<32x1xf32> to vector<32x32xf32>
    %224 = arith.subf %209, %223 : vector<32x32xf32>
    %cst_66 = arith.constant 9.99999974E-6 : f32
    %225 = vector.broadcast %cst_66 : f32 to vector<32x1xf32>
    %226 = arith.addf %222, %225 : vector<32x1xf32>
    %227 = math.rsqrt %226 : vector<32x1xf32>
    %228 = vector.broadcast %227 : vector<32x1xf32> to vector<32x32xf32>
    %229 = arith.mulf %224, %228 : vector<32x32xf32>
    %230 = vector.broadcast %210 : vector<1x32xf32> to vector<32x32xf32>
    %231 = arith.mulf %229, %230 : vector<32x32xf32>
    %232 = vector.broadcast %211 : vector<1x32xf32> to vector<32x32xf32>
    %233 = arith.addf %231, %232 : vector<32x32xf32>
    %c32 = arith.constant 32 : index
    %c0_67 = arith.constant 0 : index
    %234 = vector.load %arg2[%c32, %c0_67] : memref<192x64xf32, #tpu.memory_space<vmem>>, vector<32x32xf32>
    %235 = arith.addf %233, %234 : vector<32x32xf32>
    %c32_68 = arith.constant 32 : index
    %c0_69 = arith.constant 0 : index
    %236 = vector.load %arg1[%c32_68, %c0_69] : memref<272x128xf32, #tpu.memory_space<vmem>>, vector<32x128xf32>
    %c96_70 = arith.constant 96 : index
    %c0_71 = arith.constant 0 : index
    %237 = vector.load %arg1[%c96_70, %c0_71] : memref<272x128xf32, #tpu.memory_space<vmem>>, vector<32x64xf32>
    %c192 = arith.constant 192 : index
    %c0_72 = arith.constant 0 : index
    %238 = vector.load %arg1[%c192, %c0_72] : memref<272x128xf32, #tpu.memory_space<vmem>>, vector<64x32xf32>
    %c144 = arith.constant 144 : index
    %c0_73 = arith.constant 0 : index
    %239 = vector.load %arg2[%c144, %c0_73] : memref<192x64xf32, #tpu.memory_space<vmem>>, vector<10x64xf32>
    %240 = vector.extract_strided_slice %236 {offsets = [0, 0], sizes = [32, 96], strides = [1, 1]} : vector<32x128xf32> to vector<32x96xf32>
    %cst_74 = arith.constant dense<0.000000e+00> : vector<32x96xf32>
    %241 = tpu.matmul %235, %240, %cst_74 {dimension_numbers = #tpu.dot_dimension_numbers<[1], [0], [0], [1], [0, 0, 1, 1], [], []>} : vector<32x32xf32>, vector<32x96xf32>, vector<32x96xf32> -> vector<32x96xf32>
    %242 = vector.extract_strided_slice %241 {offsets = [0, 0], sizes = [32, 32], strides = [1, 1]} : vector<32x96xf32> to vector<32x32xf32>
    %243 = vector.extract_strided_slice %239 {offsets = [0, 0], sizes = [1, 32], strides = [1, 1]} : vector<10x64xf32> to vector<1x32xf32>
    %244 = vector.broadcast %243 : vector<1x32xf32> to vector<32x32xf32>
    %245 = arith.addf %242, %244 : vector<32x32xf32>
    %246 = vector.extract_strided_slice %241 {offsets = [0, 32], sizes = [32, 32], strides = [1, 1]} : vector<32x96xf32> to vector<32x32xf32>
    %247 = vector.extract_strided_slice %239 {offsets = [1, 0], sizes = [1, 32], strides = [1, 1]} : vector<10x64xf32> to vector<1x32xf32>
    %248 = vector.broadcast %247 : vector<1x32xf32> to vector<32x32xf32>
    %249 = arith.addf %246, %248 : vector<32x32xf32>
    %250 = vector.extract_strided_slice %241 {offsets = [0, 64], sizes = [32, 32], strides = [1, 1]} : vector<32x96xf32> to vector<32x32xf32>
    %251 = vector.extract_strided_slice %239 {offsets = [2, 0], sizes = [1, 32], strides = [1, 1]} : vector<10x64xf32> to vector<1x32xf32>
    %252 = vector.broadcast %251 : vector<1x32xf32> to vector<32x32xf32>
    %253 = arith.addf %250, %252 : vector<32x32xf32>
    %cst_75 = arith.constant 0.000000e+00 : f32
    %254 = vector.broadcast %cst_75 : f32 to vector<32x32xf32>
    %255 = vector.extract_strided_slice %31 {offsets = [0, 0], sizes = [1, 32], strides = [1, 1]} : vector<4x32xf32> to vector<1x32xf32>
    %256 = vector.broadcast %255 : vector<1x32xf32> to vector<32x32xf32>
    %257 = arith.mulf %245, %256 : vector<32x32xf32>
    %cst_76 = arith.constant dense<0.000000e+00> : vector<32x32xf32>
    %258 = tpu.matmul %257, %249, %cst_76 {dimension_numbers = #tpu.dot_dimension_numbers<[1], [1], [0], [0], [0, 0, 1, 0], [], []>} : vector<32x32xf32>, vector<32x32xf32>, vector<32x32xf32> -> vector<32x32xf32>
    %cst_77 = arith.constant 0.353553385 : f32
    %259 = vector.broadcast %cst_77 : f32 to vector<32x32xf32>
    %260 = arith.mulf %258, %259 : vector<32x32xf32>
    %261 = arith.addf %260, %30 : vector<32x32xf32>
    %cst_78 = arith.constant dense<0xFF800000> : vector<32xf32>
    %262 = vector.multi_reduction <maximumf>, %261, %cst_78 [1] : vector<32x32xf32> to vector<32xf32>
    %263 = vector.shape_cast %262 : vector<32xf32> to vector<32x1xf32>
    %264 = vector.broadcast %263 : vector<32x1xf32> to vector<32x32xf32>
    %265 = arith.subf %261, %264 : vector<32x32xf32>
    %266 = math.exp %265 : vector<32x32xf32>
    %cst_79 = arith.constant dense<0.000000e+00> : vector<32xf32>
    %267 = vector.multi_reduction <add>, %266, %cst_79 [1] : vector<32x32xf32> to vector<32xf32>
    %268 = vector.shape_cast %267 : vector<32xf32> to vector<32x1xf32>
    %269 = vector.broadcast %268 : vector<32x1xf32> to vector<32x32xf32>
    %270 = arith.divf %266, %269 : vector<32x32xf32>
    %271 = vector.broadcast %255 : vector<1x32xf32> to vector<32x32xf32>
    %272 = arith.mulf %253, %271 : vector<32x32xf32>
    %cst_80 = arith.constant dense<0.000000e+00> : vector<32x32xf32>
    %273 = tpu.matmul %270, %272, %cst_80 {dimension_numbers = #tpu.dot_dimension_numbers<[1], [0], [0], [1], [0, 0, 1, 1], [], []>} : vector<32x32xf32>, vector<32x32xf32>, vector<32x32xf32> -> vector<32x32xf32>
    %274 = arith.addf %254, %273 : vector<32x32xf32>
    %275 = vector.extract_strided_slice %31 {offsets = [1, 0], sizes = [1, 32], strides = [1, 1]} : vector<4x32xf32> to vector<1x32xf32>
    %276 = vector.broadcast %275 : vector<1x32xf32> to vector<32x32xf32>
    %277 = arith.mulf %245, %276 : vector<32x32xf32>
    %cst_81 = arith.constant dense<0.000000e+00> : vector<32x32xf32>
    %278 = tpu.matmul %277, %249, %cst_81 {dimension_numbers = #tpu.dot_dimension_numbers<[1], [1], [0], [0], [0, 0, 1, 0], [], []>} : vector<32x32xf32>, vector<32x32xf32>, vector<32x32xf32> -> vector<32x32xf32>
    %cst_82 = arith.constant 0.353553385 : f32
    %279 = vector.broadcast %cst_82 : f32 to vector<32x32xf32>
    %280 = arith.mulf %278, %279 : vector<32x32xf32>
    %281 = arith.addf %280, %30 : vector<32x32xf32>
    %cst_83 = arith.constant dense<0xFF800000> : vector<32xf32>
    %282 = vector.multi_reduction <maximumf>, %281, %cst_83 [1] : vector<32x32xf32> to vector<32xf32>
    %283 = vector.shape_cast %282 : vector<32xf32> to vector<32x1xf32>
    %284 = vector.broadcast %283 : vector<32x1xf32> to vector<32x32xf32>
    %285 = arith.subf %281, %284 : vector<32x32xf32>
    %286 = math.exp %285 : vector<32x32xf32>
    %cst_84 = arith.constant dense<0.000000e+00> : vector<32xf32>
    %287 = vector.multi_reduction <add>, %286, %cst_84 [1] : vector<32x32xf32> to vector<32xf32>
    %288 = vector.shape_cast %287 : vector<32xf32> to vector<32x1xf32>
    %289 = vector.broadcast %288 : vector<32x1xf32> to vector<32x32xf32>
    %290 = arith.divf %286, %289 : vector<32x32xf32>
    %291 = vector.broadcast %275 : vector<1x32xf32> to vector<32x32xf32>
    %292 = arith.mulf %253, %291 : vector<32x32xf32>
    %cst_85 = arith.constant dense<0.000000e+00> : vector<32x32xf32>
    %293 = tpu.matmul %290, %292, %cst_85 {dimension_numbers = #tpu.dot_dimension_numbers<[1], [0], [0], [1], [0, 0, 1, 1], [], []>} : vector<32x32xf32>, vector<32x32xf32>, vector<32x32xf32> -> vector<32x32xf32>
    %294 = arith.addf %274, %293 : vector<32x32xf32>
    %295 = vector.extract_strided_slice %31 {offsets = [2, 0], sizes = [1, 32], strides = [1, 1]} : vector<4x32xf32> to vector<1x32xf32>
    %296 = vector.broadcast %295 : vector<1x32xf32> to vector<32x32xf32>
    %297 = arith.mulf %245, %296 : vector<32x32xf32>
    %cst_86 = arith.constant dense<0.000000e+00> : vector<32x32xf32>
    %298 = tpu.matmul %297, %249, %cst_86 {dimension_numbers = #tpu.dot_dimension_numbers<[1], [1], [0], [0], [0, 0, 1, 0], [], []>} : vector<32x32xf32>, vector<32x32xf32>, vector<32x32xf32> -> vector<32x32xf32>
    %cst_87 = arith.constant 0.353553385 : f32
    %299 = vector.broadcast %cst_87 : f32 to vector<32x32xf32>
    %300 = arith.mulf %298, %299 : vector<32x32xf32>
    %301 = arith.addf %300, %30 : vector<32x32xf32>
    %cst_88 = arith.constant dense<0xFF800000> : vector<32xf32>
    %302 = vector.multi_reduction <maximumf>, %301, %cst_88 [1] : vector<32x32xf32> to vector<32xf32>
    %303 = vector.shape_cast %302 : vector<32xf32> to vector<32x1xf32>
    %304 = vector.broadcast %303 : vector<32x1xf32> to vector<32x32xf32>
    %305 = arith.subf %301, %304 : vector<32x32xf32>
    %306 = math.exp %305 : vector<32x32xf32>
    %cst_89 = arith.constant dense<0.000000e+00> : vector<32xf32>
    %307 = vector.multi_reduction <add>, %306, %cst_89 [1] : vector<32x32xf32> to vector<32xf32>
    %308 = vector.shape_cast %307 : vector<32xf32> to vector<32x1xf32>
    %309 = vector.broadcast %308 : vector<32x1xf32> to vector<32x32xf32>
    %310 = arith.divf %306, %309 : vector<32x32xf32>
    %311 = vector.broadcast %295 : vector<1x32xf32> to vector<32x32xf32>
    %312 = arith.mulf %253, %311 : vector<32x32xf32>
    %cst_90 = arith.constant dense<0.000000e+00> : vector<32x32xf32>
    %313 = tpu.matmul %310, %312, %cst_90 {dimension_numbers = #tpu.dot_dimension_numbers<[1], [0], [0], [1], [0, 0, 1, 1], [], []>} : vector<32x32xf32>, vector<32x32xf32>, vector<32x32xf32> -> vector<32x32xf32>
    %314 = arith.addf %294, %313 : vector<32x32xf32>
    %315 = vector.extract_strided_slice %31 {offsets = [3, 0], sizes = [1, 32], strides = [1, 1]} : vector<4x32xf32> to vector<1x32xf32>
    %316 = vector.broadcast %315 : vector<1x32xf32> to vector<32x32xf32>
    %317 = arith.mulf %245, %316 : vector<32x32xf32>
    %cst_91 = arith.constant dense<0.000000e+00> : vector<32x32xf32>
    %318 = tpu.matmul %317, %249, %cst_91 {dimension_numbers = #tpu.dot_dimension_numbers<[1], [1], [0], [0], [0, 0, 1, 0], [], []>} : vector<32x32xf32>, vector<32x32xf32>, vector<32x32xf32> -> vector<32x32xf32>
    %cst_92 = arith.constant 0.353553385 : f32
    %319 = vector.broadcast %cst_92 : f32 to vector<32x32xf32>
    %320 = arith.mulf %318, %319 : vector<32x32xf32>
    %321 = arith.addf %320, %30 : vector<32x32xf32>
    %cst_93 = arith.constant dense<0xFF800000> : vector<32xf32>
    %322 = vector.multi_reduction <maximumf>, %321, %cst_93 [1] : vector<32x32xf32> to vector<32xf32>
    %323 = vector.shape_cast %322 : vector<32xf32> to vector<32x1xf32>
    %324 = vector.broadcast %323 : vector<32x1xf32> to vector<32x32xf32>
    %325 = arith.subf %321, %324 : vector<32x32xf32>
    %326 = math.exp %325 : vector<32x32xf32>
    %cst_94 = arith.constant dense<0.000000e+00> : vector<32xf32>
    %327 = vector.multi_reduction <add>, %326, %cst_94 [1] : vector<32x32xf32> to vector<32xf32>
    %328 = vector.shape_cast %327 : vector<32xf32> to vector<32x1xf32>
    %329 = vector.broadcast %328 : vector<32x1xf32> to vector<32x32xf32>
    %330 = arith.divf %326, %329 : vector<32x32xf32>
    %331 = vector.broadcast %315 : vector<1x32xf32> to vector<32x32xf32>
    %332 = arith.mulf %253, %331 : vector<32x32xf32>
    %cst_95 = arith.constant dense<0.000000e+00> : vector<32x32xf32>
    %333 = tpu.matmul %330, %332, %cst_95 {dimension_numbers = #tpu.dot_dimension_numbers<[1], [0], [0], [1], [0, 0, 1, 1], [], []>} : vector<32x32xf32>, vector<32x32xf32>, vector<32x32xf32> -> vector<32x32xf32>
    %334 = arith.addf %314, %333 : vector<32x32xf32>
    %335 = vector.extract_strided_slice %236 {offsets = [0, 96], sizes = [32, 32], strides = [1, 1]} : vector<32x128xf32> to vector<32x32xf32>
    %cst_96 = arith.constant dense<0.000000e+00> : vector<32x32xf32>
    %336 = tpu.matmul %334, %335, %cst_96 {dimension_numbers = #tpu.dot_dimension_numbers<[1], [0], [0], [1], [0, 0, 1, 1], [], []>} : vector<32x32xf32>, vector<32x32xf32>, vector<32x32xf32> -> vector<32x32xf32>
    %337 = vector.extract_strided_slice %239 {offsets = [3, 0], sizes = [1, 32], strides = [1, 1]} : vector<10x64xf32> to vector<1x32xf32>
    %338 = vector.broadcast %337 : vector<1x32xf32> to vector<32x32xf32>
    %339 = arith.addf %336, %338 : vector<32x32xf32>
    %340 = arith.addf %235, %339 : vector<32x32xf32>
    %341 = vector.extract_strided_slice %239 {offsets = [4, 0], sizes = [1, 32], strides = [1, 1]} : vector<10x64xf32> to vector<1x32xf32>
    %342 = vector.extract_strided_slice %239 {offsets = [5, 0], sizes = [1, 32], strides = [1, 1]} : vector<10x64xf32> to vector<1x32xf32>
    %cst_97 = arith.constant dense<0.000000e+00> : vector<32xf32>
    %343 = vector.multi_reduction <add>, %340, %cst_97 [1] : vector<32x32xf32> to vector<32xf32>
    %344 = vector.shape_cast %343 : vector<32xf32> to vector<32x1xf32>
    %cst_98 = arith.constant 3.200000e+01 : f32
    %345 = vector.broadcast %cst_98 : f32 to vector<32x1xf32>
    %346 = arith.divf %344, %345 : vector<32x1xf32>
    %347 = vector.broadcast %346 : vector<32x1xf32> to vector<32x32xf32>
    %348 = arith.subf %340, %347 : vector<32x32xf32>
    %349 = arith.mulf %348, %348 : vector<32x32xf32>
    %cst_99 = arith.constant dense<0.000000e+00> : vector<32xf32>
    %350 = vector.multi_reduction <add>, %349, %cst_99 [1] : vector<32x32xf32> to vector<32xf32>
    %351 = vector.shape_cast %350 : vector<32xf32> to vector<32x1xf32>
    %cst_100 = arith.constant 3.200000e+01 : f32
    %352 = vector.broadcast %cst_100 : f32 to vector<32x1xf32>
    %353 = arith.divf %351, %352 : vector<32x1xf32>
    %354 = vector.broadcast %346 : vector<32x1xf32> to vector<32x32xf32>
    %355 = arith.subf %340, %354 : vector<32x32xf32>
    %cst_101 = arith.constant 9.99999974E-6 : f32
    %356 = vector.broadcast %cst_101 : f32 to vector<32x1xf32>
    %357 = arith.addf %353, %356 : vector<32x1xf32>
    %358 = math.rsqrt %357 : vector<32x1xf32>
    %359 = vector.broadcast %358 : vector<32x1xf32> to vector<32x32xf32>
    %360 = arith.mulf %355, %359 : vector<32x32xf32>
    %361 = vector.broadcast %341 : vector<1x32xf32> to vector<32x32xf32>
    %362 = arith.mulf %360, %361 : vector<32x32xf32>
    %363 = vector.broadcast %342 : vector<1x32xf32> to vector<32x32xf32>
    %364 = arith.addf %362, %363 : vector<32x32xf32>
    %cst_102 = arith.constant dense<0.000000e+00> : vector<32x64xf32>
    %365 = tpu.matmul %364, %237, %cst_102 {dimension_numbers = #tpu.dot_dimension_numbers<[1], [0], [0], [1], [0, 0, 1, 1], [], []>} : vector<32x32xf32>, vector<32x64xf32>, vector<32x64xf32> -> vector<32x64xf32>
    %366 = vector.extract_strided_slice %239 {offsets = [6, 0], sizes = [1, 64], strides = [1, 1]} : vector<10x64xf32> to vector<1x64xf32>
    %367 = vector.broadcast %366 : vector<1x64xf32> to vector<32x64xf32>
    %368 = arith.addf %365, %367 : vector<32x64xf32>
    %369 = arith.mulf %368, %368 : vector<32x64xf32>
    %370 = arith.mulf %368, %369 : vector<32x64xf32>
    %cst_103 = arith.constant 4.471500e-02 : f32
    %371 = vector.broadcast %cst_103 : f32 to vector<32x64xf32>
    %372 = arith.mulf %371, %370 : vector<32x64xf32>
    %373 = arith.addf %368, %372 : vector<32x64xf32>
    %cst_104 = arith.constant 0.797884583 : f32
    %374 = vector.broadcast %cst_104 : f32 to vector<32x64xf32>
    %375 = arith.mulf %374, %373 : vector<32x64xf32>
    %376 = math.tanh %375 : vector<32x64xf32>
    %cst_105 = arith.constant 1.000000e+00 : f32
    %377 = vector.broadcast %cst_105 : f32 to vector<32x64xf32>
    %378 = arith.addf %377, %376 : vector<32x64xf32>
    %cst_106 = arith.constant 5.000000e-01 : f32
    %379 = vector.broadcast %cst_106 : f32 to vector<32x64xf32>
    %380 = arith.mulf %379, %378 : vector<32x64xf32>
    %381 = arith.mulf %368, %380 : vector<32x64xf32>
    %cst_107 = arith.constant dense<0.000000e+00> : vector<32x32xf32>
    %382 = tpu.matmul %381, %238, %cst_107 {dimension_numbers = #tpu.dot_dimension_numbers<[1], [0], [0], [1], [0, 0, 1, 1], [], []>} : vector<32x64xf32>, vector<64x32xf32>, vector<32x32xf32> -> vector<32x32xf32>
    %383 = vector.extract_strided_slice %239 {offsets = [7, 0], sizes = [1, 32], strides = [1, 1]} : vector<10x64xf32> to vector<1x32xf32>
    %384 = vector.broadcast %383 : vector<1x32xf32> to vector<32x32xf32>
    %385 = arith.addf %382, %384 : vector<32x32xf32>
    %386 = arith.addf %364, %385 : vector<32x32xf32>
    %387 = vector.extract_strided_slice %239 {offsets = [8, 0], sizes = [1, 32], strides = [1, 1]} : vector<10x64xf32> to vector<1x32xf32>
    %388 = vector.extract_strided_slice %239 {offsets = [9, 0], sizes = [1, 32], strides = [1, 1]} : vector<10x64xf32> to vector<1x32xf32>
    %cst_108 = arith.constant dense<0.000000e+00> : vector<32xf32>
    %389 = vector.multi_reduction <add>, %386, %cst_108 [1] : vector<32x32xf32> to vector<32xf32>
    %390 = vector.shape_cast %389 : vector<32xf32> to vector<32x1xf32>
    %cst_109 = arith.constant 3.200000e+01 : f32
    %391 = vector.broadcast %cst_109 : f32 to vector<32x1xf32>
    %392 = arith.divf %390, %391 : vector<32x1xf32>
    %393 = vector.broadcast %392 : vector<32x1xf32> to vector<32x32xf32>
    %394 = arith.subf %386, %393 : vector<32x32xf32>
    %395 = arith.mulf %394, %394 : vector<32x32xf32>
    %cst_110 = arith.constant dense<0.000000e+00> : vector<32xf32>
    %396 = vector.multi_reduction <add>, %395, %cst_110 [1] : vector<32x32xf32> to vector<32xf32>
    %397 = vector.shape_cast %396 : vector<32xf32> to vector<32x1xf32>
    %cst_111 = arith.constant 3.200000e+01 : f32
    %398 = vector.broadcast %cst_111 : f32 to vector<32x1xf32>
    %399 = arith.divf %397, %398 : vector<32x1xf32>
    %400 = vector.broadcast %392 : vector<32x1xf32> to vector<32x32xf32>
    %401 = arith.subf %386, %400 : vector<32x32xf32>
    %cst_112 = arith.constant 9.99999974E-6 : f32
    %402 = vector.broadcast %cst_112 : f32 to vector<32x1xf32>
    %403 = arith.addf %399, %402 : vector<32x1xf32>
    %404 = math.rsqrt %403 : vector<32x1xf32>
    %405 = vector.broadcast %404 : vector<32x1xf32> to vector<32x32xf32>
    %406 = arith.mulf %401, %405 : vector<32x32xf32>
    %407 = vector.broadcast %387 : vector<1x32xf32> to vector<32x32xf32>
    %408 = arith.mulf %406, %407 : vector<32x32xf32>
    %409 = vector.broadcast %388 : vector<1x32xf32> to vector<32x32xf32>
    %410 = arith.addf %408, %409 : vector<32x32xf32>
    %411 = vector.extract_strided_slice %32 {offsets = [2, 0], sizes = [1, 32], strides = [1, 1]} : vector<4x32xf32> to vector<1x32xf32>
    %412 = vector.extract_strided_slice %32 {offsets = [3, 0], sizes = [1, 32], strides = [1, 1]} : vector<4x32xf32> to vector<1x32xf32>
    %cst_113 = arith.constant dense<0.000000e+00> : vector<32xf32>
    %413 = vector.multi_reduction <add>, %410, %cst_113 [1] : vector<32x32xf32> to vector<32xf32>
    %414 = vector.shape_cast %413 : vector<32xf32> to vector<32x1xf32>
    %cst_114 = arith.constant 3.200000e+01 : f32
    %415 = vector.broadcast %cst_114 : f32 to vector<32x1xf32>
    %416 = arith.divf %414, %415 : vector<32x1xf32>
    %417 = vector.broadcast %416 : vector<32x1xf32> to vector<32x32xf32>
    %418 = arith.subf %410, %417 : vector<32x32xf32>
    %419 = arith.mulf %418, %418 : vector<32x32xf32>
    %cst_115 = arith.constant dense<0.000000e+00> : vector<32xf32>
    %420 = vector.multi_reduction <add>, %419, %cst_115 [1] : vector<32x32xf32> to vector<32xf32>
    %421 = vector.shape_cast %420 : vector<32xf32> to vector<32x1xf32>
    %cst_116 = arith.constant 3.200000e+01 : f32
    %422 = vector.broadcast %cst_116 : f32 to vector<32x1xf32>
    %423 = arith.divf %421, %422 : vector<32x1xf32>
    %424 = vector.broadcast %416 : vector<32x1xf32> to vector<32x32xf32>
    %425 = arith.subf %410, %424 : vector<32x32xf32>
    %cst_117 = arith.constant 9.99999974E-6 : f32
    %426 = vector.broadcast %cst_117 : f32 to vector<32x1xf32>
    %427 = arith.addf %423, %426 : vector<32x1xf32>
    %428 = math.rsqrt %427 : vector<32x1xf32>
    %429 = vector.broadcast %428 : vector<32x1xf32> to vector<32x32xf32>
    %430 = arith.mulf %425, %429 : vector<32x32xf32>
    %431 = vector.broadcast %411 : vector<1x32xf32> to vector<32x32xf32>
    %432 = arith.mulf %430, %431 : vector<32x32xf32>
    %433 = vector.broadcast %412 : vector<1x32xf32> to vector<32x32xf32>
    %434 = arith.addf %432, %433 : vector<32x32xf32>
    %c256 = arith.constant 256 : index
    %c0_118 = arith.constant 0 : index
    %435 = vector.load %arg1[%c256, %c0_118] : memref<272x128xf32, #tpu.memory_space<vmem>>, vector<8x128xf32>
    %cst_119 = arith.constant 0.000000e+00 : f32
    %436 = vector.broadcast %cst_119 : f32 to vector<8x8xf32>
    %437 = vector.extract_strided_slice %435 {offsets = [0, 0], sizes = [8, 32], strides = [1, 1]} : vector<8x128xf32> to vector<8x32xf32>
    %438 = vector.extract_strided_slice %434 {offsets = [0, 0], sizes = [8, 32], strides = [1, 1]} : vector<32x32xf32> to vector<8x32xf32>
    %cst_120 = arith.constant dense<0.000000e+00> : vector<8x8xf32>
    %439 = tpu.matmul %437, %438, %cst_120 {dimension_numbers = #tpu.dot_dimension_numbers<[1], [1], [0], [0], [0, 0, 1, 0], [], []>} : vector<8x32xf32>, vector<8x32xf32>, vector<8x8xf32> -> vector<8x8xf32>
    %440 = arith.addf %436, %439 : vector<8x8xf32>
    %441 = vector.extract_strided_slice %435 {offsets = [0, 32], sizes = [8, 32], strides = [1, 1]} : vector<8x128xf32> to vector<8x32xf32>
    %442 = vector.extract_strided_slice %434 {offsets = [8, 0], sizes = [8, 32], strides = [1, 1]} : vector<32x32xf32> to vector<8x32xf32>
    %cst_121 = arith.constant dense<0.000000e+00> : vector<8x8xf32>
    %443 = tpu.matmul %441, %442, %cst_121 {dimension_numbers = #tpu.dot_dimension_numbers<[1], [1], [0], [0], [0, 0, 1, 0], [], []>} : vector<8x32xf32>, vector<8x32xf32>, vector<8x8xf32> -> vector<8x8xf32>
    %444 = arith.addf %440, %443 : vector<8x8xf32>
    %445 = vector.extract_strided_slice %435 {offsets = [0, 64], sizes = [8, 32], strides = [1, 1]} : vector<8x128xf32> to vector<8x32xf32>
    %446 = vector.extract_strided_slice %434 {offsets = [16, 0], sizes = [8, 32], strides = [1, 1]} : vector<32x32xf32> to vector<8x32xf32>
    %cst_122 = arith.constant dense<0.000000e+00> : vector<8x8xf32>
    %447 = tpu.matmul %445, %446, %cst_122 {dimension_numbers = #tpu.dot_dimension_numbers<[1], [1], [0], [0], [0, 0, 1, 0], [], []>} : vector<8x32xf32>, vector<8x32xf32>, vector<8x8xf32> -> vector<8x8xf32>
    %448 = arith.addf %444, %447 : vector<8x8xf32>
    %449 = vector.extract_strided_slice %435 {offsets = [0, 96], sizes = [8, 32], strides = [1, 1]} : vector<8x128xf32> to vector<8x32xf32>
    %450 = vector.extract_strided_slice %434 {offsets = [24, 0], sizes = [8, 32], strides = [1, 1]} : vector<32x32xf32> to vector<8x32xf32>
    %cst_123 = arith.constant dense<0.000000e+00> : vector<8x8xf32>
    %451 = tpu.matmul %449, %450, %cst_123 {dimension_numbers = #tpu.dot_dimension_numbers<[1], [1], [0], [0], [0, 0, 1, 0], [], []>} : vector<8x32xf32>, vector<8x32xf32>, vector<8x8xf32> -> vector<8x8xf32>
    %452 = arith.addf %448, %451 : vector<8x8xf32>
    %c184 = arith.constant 184 : index
    %c0_124 = arith.constant 0 : index
    %453 = vector.load %arg2[%c184, %c0_124] : memref<192x64xf32, #tpu.memory_space<vmem>>, vector<8x1xf32>
    %454 = vector.broadcast %453 : vector<8x1xf32> to vector<8x8xf32>
    %455 = arith.addf %452, %454 : vector<8x8xf32>
    %c168 = arith.constant 168 : index
    %c0_125 = arith.constant 0 : index
    %456 = vector.load %arg2[%c168, %c0_125] : memref<192x64xf32, #tpu.memory_space<vmem>>, vector<8x8xf32>
    %457 = vector.broadcast %14 : vector<8x1xf32> to vector<8x8xf32>
    %458 = arith.mulf %457, %456 : vector<8x8xf32>
    %cst_126 = arith.constant dense<0.000000e+00> : vector<8xf32>
    %459 = vector.multi_reduction <add>, %458, %cst_126 [0] : vector<8x8xf32> to vector<8xf32>
    %460 = vector.shape_cast %459 : vector<8xf32> to vector<1x8xf32>
    %461 = vector.broadcast %4 : vector<8x1xf32> to vector<8x8xf32>
    %462 = arith.mulf %461, %456 : vector<8x8xf32>
    %cst_127 = arith.constant dense<0.000000e+00> : vector<8xf32>
    %463 = vector.multi_reduction <add>, %462, %cst_127 [0] : vector<8x8xf32> to vector<8xf32>
    %464 = vector.shape_cast %463 : vector<8xf32> to vector<1x8xf32>
    %465 = vector.broadcast %460 : vector<1x8xf32> to vector<8x8xf32>
    %466 = arith.mulf %455, %465 : vector<8x8xf32>
    %467 = vector.broadcast %464 : vector<1x8xf32> to vector<8x8xf32>
    %468 = arith.addf %466, %467 : vector<8x8xf32>
    %469 = vector.extract_strided_slice %468 {offsets = [0, 0], sizes = [8, 4], strides = [1, 1]} : vector<8x8xf32> to vector<8x4xf32>
    %c0_128 = arith.constant 0 : index
    %c0_129 = arith.constant 0 : index
    %470 = vector.load %arg3[%c0_128, %c0_129] : memref<16x4xf32, #tpu.memory_space<vmem>>, vector<8x4xf32>
    tpu.vector_store %arg3[%c0_128, %c0_129], %469 {strides = array<i32>} : memref<16x4xf32, #tpu.memory_space<vmem>>, vector<8x4xf32>,
    %471 = vector.extract_strided_slice %468 {offsets = [0, 4], sizes = [8, 4], strides = [1, 1]} : vector<8x8xf32> to vector<8x4xf32>
    %c8 = arith.constant 8 : index
    %c0_130 = arith.constant 0 : index
    %472 = vector.load %arg3[%c8, %c0_130] : memref<16x4xf32, #tpu.memory_space<vmem>>, vector<8x4xf32>
    tpu.vector_store %arg3[%c8, %c0_130], %471 {strides = array<i32>} : memref<16x4xf32, #tpu.memory_space<vmem>>, vector<8x4xf32>,
    return
  }
}

</mosaic_0001>

<bundles_post_ra>
// kernel: forward.1
= control target key start
LH: loop header
LB: loop body
LE: loop exit
PB: predicated region body
PF: predicated region fallthrough
CT: control target
= control target key end

     0   :  { %vm15_vm0 = vcmask 130048   ;;  %vm42_vm1 = vcmask 1043456   ;;  %v7010_v7 = vmov 0.0   ;;  %vm5736_vm2 = vmmov 0   ;;  %s5738_s16 = smov 124   ;;  %s5739_s17 = smov 120   ;;  %s7002_s0 = inlined_call_operand.vmem [shape: f32[8,16], index: 0, kind: input, shape index: {}]   ;;  %s7003_s1 = inlined_call_operand.vmem [shape: f32[272,128], index: 1, kind: input, shape index: {}]   ;;  %s7004_s2 = inlined_call_operand.vmem [shape: f32[192,64], index: 2, kind: input, shape index: {}]   ;;  %s7005_s3 = inlined_call_operand.vmem [shape: f32[16,4], index: 3, kind: output, shape index: {}]  }
   0x1   :  { %v14_v0 = vld [vmem:[%s7002_s0] sm:$0xff]  ;;  %4750 = vmatprep.subr.mxu0 %v7010_v7  ;;  %v37_v8 = vld [vmem:[%s7003_s1 + $0x108] sm:$0xf]  ;;  %4752 = vmatprep.mubr.msk.f32.mxu0 %vm5736_vm2, %v7010_v7  ;;  %vm38_vm5 = vcmask 31744   ;;  %s5737_s0 = smov 116   ;;  %v5806_v23 = vld [vmem:[%s7003_s1 + $0x10] sm:$0xff]  ;;  %v472_v28 = vlaneseq }
   0x2   :  { %v16_v1 = vsel %vm15_vm0, %v14_v0, 0.0  ;;  %4751 = vmatpush3.msk.msra.mxu0 %vm42_vm1, %v37_v8  ;;  %4755 = vmatprep.subr.mxu1 %v7010_v7  ;;  %v5794_v19 = vld [vmem:[%s7003_s1] sm:$0xff]  ;;  %v5799_v20 = vld [vmem:[%s7003_s1 + $0x8] sm:$0xff]  ;;  %v5811_v24 = vld [vmem:[%s7003_s1 + $0x18] sm:$0xff]  ;;  %vm374_vm6 = vcmask 261120   ;;  %s5740_s5 = smov 64  }
   0x3   :  { %17 = vadd.xlane.f32.xlu0 %v16_v1  ;;  %4756 = vmatpush3.msk.msra.mxu1 %vm42_vm1, %v37_v8  ;;  %v5142_v21 = vpack.c.bf16 %v5799_v20, %v5794_v19  ;;  %v5146_v25 = vpack.c.bf16 %v5811_v24, %v5806_v23  ;;  %v5821_v29 = vshrl.u32 %v472_v28, 7  ;;  %v5826_v30 = vld [vmem:[%s7004_s2 + $0x80] sm:$0xff]  ;;  %v346_v34 = vld [vmem:[%s7004_s2 + $0xb0] sm:$0xf]  ;;  %s5741_s6 = smov 32   ;;  %v349_v41 = vld [vmem:[%s7004_s2 + $0x8] sm:$0xff] }
   0x4   :  { %4757 = vmatprep.mubr.msk.f32.mxu1 %vm5736_vm2, %v7010_v7  ;;  %4760 = vmatprep.subr.mxu0 %v7010_v7  ;;  %v348_v31 = vld [vmem:[%s7004_s2] sm:$0xff]  ;;  %v350_v45 = vld [vmem:[%s7004_s2 + $0x10] sm:$0xff]  ;;  %v351_v46 = vld [vmem:[%s7004_s2 + $0x18] sm:$0xff]  ;;  %s5742_s13 = smov 96   ;;  %vm1975_vm8 = vcmask 523264   ;;  %vm4362_vm9 = vcmask 64512  }
   0x5   :  { %4765 = vmatprep.subr.mxu1 %v7010_v7  ;;  %v5832_v32 = vsub.s32 2, %v5821_v29  ;;  %v5835_v33 = vsub.s32 1, %v5821_v29  ;;  %v5877_v53 = vsub.s32 0, %v5821_v29  ;;  %vm5917_vm7 = vmpackc.low %vm374_vm6, %vm374_vm6 }
   0x7   :  { %v495_v36 = vrot.slane %v5826_v30, %v5832_v32  ;;  %v483_v39 = vrot.slane %v5826_v30, %v5835_v33  ;;  %v5847_v40 = vrot.slane %v346_v34, %v5832_v32  ;;  %v475_v54 = vrot.slane %v5826_v30, %v5877_v53 }
   0x8   :  { %v5882_v56 = vrot.slane %v346_v34, %v5877_v53  ;;  %v5885_v57 = vrot.slane %v346_v34, %v5835_v33 }
  0x90   :  { %v18_v2 = vpop.xlane.xlu0 %17 }
  0x91   :  { %v5767_v3 = vmul.f32 0.0625, %v18_v2 }
  0x93   :  { %v21_v4 = vsub.f32 %v14_v0, %v5767_v3 }
  0x95   :  { %v22_v5 = vmul.f32 %v21_v4, %v21_v4 }
  0x97   :  { %v23_v6 = vsel %vm15_vm0, %v22_v5, 0.0 }
  0x98   :  { %24 = vadd.xlane.f32.xlu0 %v23_v6 }
 0x125   :  { %v25_v9 = vpop.xlane.xlu0 %24 }
 0x126   :  { %v26_v10 = vmul.f32 0.0625, %v25_v9 }
 0x128   :  { %v27_v11 = vadd.f32 1e-05, %v26_v10 }
 0x12a   :  { %5536 = vrsqrt.f32 %v27_v11  ;;  %vm30_vm3 = vcmp.eq.f32.partialorder %v27_v11, inf  ;;  %v33_v14 = vand.u32 2147483648, %v27_v11  ;;  %vm32_vm4 = vcmp.eq.f32.partialorder %v27_v11, 0.0 }
 0x134   :  { %v5537_v12 = vpop.eup %5536 }
 0x135   :  { %v29_v13 = vmul.f32 %v5537_v12, %v27_v11  ;;  %v5906_v12 = vsub.s32 3, %v5821_v29 }
 0x137   :  { %v31_v15 = vsel %vm30_vm3, %v27_v11, %v29_v13  ;;  %v5911_v13 = vrot.slane %v346_v34, %v5906_v12 }
 0x138   :  { %v5783_v16 = vsel %vm32_vm4, %v33_v14, %v31_v15 }
 0x139   :  { %5538 = vrcp.f32 %v5783_v16 }
 0x143   :  { %v5539_v17 = vpop.eup %5538 }
 0x144   :  { %v36_v18 = vmul.f32 %v5539_v17, %v21_v4 }
 0x146   :  { %264 = vrot.lane.b32.xlu0 %v36_v18, %s5737_s0  ;;  %116 = vrot.lane.b32.xlu1 %v36_v18, %s5738_s16 }
 0x147   :  { %4753 = vmatmul.mubr.msk.f32.vlgmr.msra.gmra.mrb[0].mxu0 %vm38_vm5, %v36_v18 }
 0x148   :  { %4761 = vmatpush3.msk.msra.mxu0 %vm42_vm1, %v37_v8  ;;  %4762 = vmatprep.mubr.msk.f32.mxu0 %vm5736_vm2, %v7010_v7 }
 0x149   :  { %5143 = vmatprep.subr.bf16.mxu0 %v5142_v21 }
 0x14a   :  { %190 = vrot.lane.b32.xlu1 %v36_v18, %s5739_s17  ;;  %497 = vrot.lane.b32.xlu0 %v495_v36, %s5740_s5 }
 0x14e   :  { %485 = vrot.lane.b32.xlu1 %v483_v39, %s5741_s6  ;;  %1238 = vrot.lane.b32.xlu0 %v5847_v40, %s5740_s5 }
 0x1b8   :  { %v117_v22 = vpop.permute.xlu1 %116  ;;  %v265_v26 = vpop.permute.xlu0 %264 }
 0x1b9   :  { %4758 = vmatmul.mubr.msk.f32.vlgmr.msra.gmra.mrb[0].mxu1 %vm38_vm5, %v117_v22 }
 0x1ba   :  { %4766 = vmatpush3.msk.msra.mxu1 %vm42_vm1, %v37_v8  ;;  %4767 = vmatprep.mubr.msk.f32.mxu1 %vm5736_vm2, %v7010_v7 }
 0x1bc   :  { %v191_v27 = vpop.permute.xlu1 %190 }
 0x1bd   :  { %4763 = vmatmul.mubr.msk.f32.vlgmr.msra.gmra.mrb[2].mxu0 %vm38_vm5, %v191_v27  ;;  %4768 = vmatmul.mubr.msk.f32.vlgmr.msra.gmra.mrb[2].mxu1 %vm38_vm5, %v265_v26  ;;  %v498_v27 = vpop.permute.xlu0 %497 }
 0x1be   :  { %5145 = vmatpush3.bf16.msra.mxu0 %v5142_v21 }
 0x1bf   :  { %5147 = vmatprep.subr.bf16.mxu0 %v5146_v25 }
 0x1c0   :  { %v486_v55 = vpop.permute.xlu1 %485 }
 0x1c2   :  { %5149 = vmatpush3.bf16.msra.mxu0 %v5146_v25 }
 0x21a   :  { %v112_v35 = vpop.f32.mrb[0].mxu0 }
 0x21b   :  { %v5842_v37 = vadd.f32 %v348_v31, %v112_v35  ;;  %v4754_v38 = vpop.f32.mrb[1].mxu0 }
 0x21d   :  { %4778 = vmatprep.mubr.msk.f32.mxu0 %vm374_vm6, %v5842_v37 }
 0x28c   :  { %v186_v42 = vpop.f32.mrb[0].mxu1 }
 0x28d   :  { %v5858_v43 = vadd.f32 %v349_v41, %v186_v42  ;;  %v4759_v44 = vpop.f32.mrb[1].mxu1 }
 0x28f   :  { %4779 = vmatmul.mubr.msk.f32.vlgmr.msra.gmra.mrb[4].mxu0 %vm374_vm6, %v5858_v43 }
 0x290   :  { %v260_v47 = vpop.f32.mrb[2].mxu0  ;;  %v334_v48 = vpop.f32.mrb[2].mxu1 }
 0x291   :  { %v5868_v49 = vadd.f32 %v350_v45, %v260_v47  ;;  %v5870_v50 = vadd.f32 %v351_v46, %v334_v48  ;;  %v4764_v51 = vpop.f32.mrb[3].mxu0  ;;  %v4769_v52 = vpop.f32.mrb[3].mxu1 }
 0x293   :  { %4781 = vmatprep.mubr.msk.f32.mxu0 %vm374_vm6, %v5868_v49 }
 0x294   :  { %4782 = vmatmul.mubr.msk.f32.gmra.mrb[6].mxu0 %vm374_vm6, %v5870_v50 }
 0x362   :  { %v4780_v58 = vpop.f32.mrb[4].mxu0 }
 0x363   :  { %v5887_v59 = vadd.f32 %v4780_v58, %v475_v54  ;;  %v489_v60 = vadd.f32 %v4780_v58, %v486_v55  ;;  %v453_v61 = vpop.f32.mrb[5].mxu0  ;;  %v5935_v36 = vadd.f32 %v4780_v58, %v498_v27 }
 0x364   :  { %v5889_v62 = vadd.f32 %v475_v54, %v453_v61  ;;  %v488_v63 = vadd.f32 %v486_v55, %v453_v61  ;;  %v5929_v28 = vadd.f32 %v498_v27, %v453_v61 }
 0x366   :  { %v5415_v0 = vpack.i.bf16 %v489_v60, %v488_v63  ;;  %v508_v1 = vmul.f32 %v5882_v56, %v5889_v62  ;;  %v693_v2 = vmul.f32 %v5885_v57, %v5889_v62 }
 0x367   :  { %v4783_v4 = vpop.f32.mrb[6].mxu0 }
 0x368   :  { %v5895_v5 = vadd.f32 %v4783_v4, %v475_v54  ;;  %v491_v6 = vadd.f32 %v4783_v4, %v486_v55  ;;  %5416 = vrot.lane.b32.xlu1 %v5415_v0, %s5742_s13  ;;  %v463_v8 = vpop.f32.mrb[7].mxu0  ;;  %4792 = vmatprep.mubr.msk.f32.mxu1 %vm374_vm6, %v508_v1  ;;  %v5931_v31 = vadd.f32 %v4783_v4, %v498_v27 }
 0x369   :  { %v5899_v9 = vadd.f32 %v475_v54, %v463_v8  ;;  %v490_v10 = vadd.f32 %v486_v55, %v463_v8  ;;  %4806 = vmatprep.mubr.msk.f32.mxu0 %vm374_vm6, %v693_v2  ;;  %v5933_v34 = vadd.f32 %v498_v27, %v463_v8  ;;  %v509_v54 = vmul.f32 %v5882_v56, %v5887_v59 }
 0x36a   :  { %v694_v55 = vmul.f32 %v5885_v57, %v5887_v59  ;;  %v511_v61 = vmul.f32 %v5882_v56, %v5895_v5  ;;  %v696_v63 = vmul.f32 %v5885_v57, %v5895_v5  ;;  %v1084_v0 = vmul.f32 %v5847_v40, %v5889_v62 }
 0x36b   :  { %v5420_v11 = vpack.i.bf16 %v491_v6, %v490_v10  ;;  %v510_v58 = vmul.f32 %v5882_v56, %v5899_v9  ;;  %v695_v60 = vmul.f32 %v5885_v57, %v5899_v9  ;;  %v1085_v1 = vmul.f32 %v5847_v40, %v5887_v59 }
 0x36c   :  { %v1086_v2 = vmul.f32 %v5847_v40, %v5899_v9  ;;  %v1087_v4 = vmul.f32 %v5847_v40, %v5895_v5  ;;  %v1366_v6 = vmul.f32 %v5911_v13, %v5889_v62  ;;  %v1367_v8 = vmul.f32 %v5911_v13, %v5887_v59 }
 0x36d   :  { %5421 = vrot.lane.b32.xlu1 %v5420_v11, %s5742_s13  ;;  %v1368_v10 = vmul.f32 %v5911_v13, %v5899_v9  ;;  %v1369_v62 = vmul.f32 %v5911_v13, %v5895_v5  ;;  %v6022_v11 = vpop.permute.xlu0 %1238 }
 0x371   :  { %847 = vrot.lane.b32.xlu1 %v5885_v57, %s5740_s5 }
 0x375   :  { %682 = vrot.lane.b32.xlu1 %v5882_v56, %s5740_s5 }
 0x379   :  { %1520 = vrot.lane.b32.xlu1 %v5911_v13, %s5740_s5 }
 0x3da   :  { %v5417_v14 = vpop.permute.xlu1 %5416 }
 0x3db   :  { %v5419_v15 = vunpack.i.h.bf16 %v5417_v14  ;;  %v5418_v17 = vunpack.i.l.bf16 %v5417_v14 }
 0x3dd   :  { %v5150_v21 = vpack.c.bf16 %v5419_v15, %v5418_v17 }
 0x3df   :  { %5152 = vmatprep.subr.msk.bf16.mxu1 %vm5917_vm7, %v5150_v21  ;;  %5164 = vmatprep.subr.msk.bf16.mxu0 %vm5917_vm7, %v5150_v21  ;;  %v5422_v22 = vpop.permute.xlu1 %5421 }
 0x3e0   :  { %v5424_v25 = vunpack.i.h.bf16 %v5422_v22  ;;  %v5423_v26 = vunpack.i.l.bf16 %v5422_v22  ;;  %5155 = vmatpush3.bf16.xpose.msk.msra.mxu1 %vm5917_vm7, %v5150_v21  ;;  %5167 = vmatpush3.bf16.xpose.msk.msra.mxu0 %vm5917_vm7, %v5150_v21 }
 0x3e2   :  { %v5156_v35 = vpack.c.bf16 %v5424_v25, %v5423_v26 }
 0x3e3   :  { %v5937_v38 = vpop.permute.xlu1 %847 }
 0x3e4   :  { %5158 = vmatprep.subr.msk.bf16.mxu1 %vm5917_vm7, %v5156_v35  ;;  %5170 = vmatprep.subr.msk.bf16.mxu0 %vm5917_vm7, %v5156_v35  ;;  %v852_v39 = vmul.f32 %v5937_v38, %v5933_v34  ;;  %v853_v41 = vmul.f32 %v5937_v38, %v5931_v31  ;;  %v850_v42 = vmul.f32 %v5937_v38, %v5929_v28 }
 0x3e5   :  { %v851_v44 = vmul.f32 %v5937_v38, %v5935_v36 }
 0x3e6   :  { %v5435_v45 = vpack.i.bf16 %v853_v41, %v852_v39 }
 0x3e7   :  { %v5951_v46 = vpop.permute.xlu1 %682  ;;  %v5425_v47 = vpack.i.bf16 %v851_v44, %v850_v42  ;;  %v6032_v42 = vld [vmem:[%s7004_s2 + $0x48] sm:$0xff] }
 0x3e8   :  { %5436 = vrot.lane.b32.xlu0 %v5435_v45, %s5740_s5  ;;  %5161 = vmatpush3.bf16.xpose.msk.msra.mxu1 %vm5917_vm7, %v5156_v35  ;;  %v685_v48 = vmul.f32 %v5951_v46, %v5929_v28  ;;  %v686_v51 = vmul.f32 %v5951_v46, %v5935_v36 }
 0x3e9   :  { %5426 = vrot.lane.b32.xlu1 %v5425_v47, %s5740_s5  ;;  %5173 = vmatpush3.bf16.xpose.msk.msra.mxu0 %vm5917_vm7, %v5156_v35 }
 0x3ea   :  { %5192 = vmatprep.subr.msk.bf16.mxu0 %vm5917_vm7, %v5150_v21  ;;  %v5430_v52 = vpack.i.bf16 %v686_v51, %v685_v48 }
 0x3eb   :  { %v6024_v14 = vpop.permute.xlu1 %1520 }
 0x3ed   :  { %5431 = vrot.lane.b32.xlu1 %v5430_v52, %s5740_s5 }
 0x3ef   :  { %4793 = vmatmul.mubr.msk.f32.vlgmr.msra.gmra.mrb[4].mxu1 %vm374_vm6, %v509_v54  ;;  %v338_v54 = vld [vmem:[%s7004_s2 + $0x40] sm:$0xff] }
 0x3f0   :  { %4807 = vmatmul.mubr.msk.f32.vlgmr.msra.gmra.mrb[8].mxu0 %vm374_vm6, %v694_v55  ;;  %4795 = vmatprep.mubr.msk.f32.mxu1 %vm374_vm6, %v510_v58 }
 0x3f1   :  { %4809 = vmatprep.mubr.msk.f32.mxu0 %vm374_vm6, %v695_v60  ;;  %5195 = vmatpush3.bf16.xpose.msk.msra.mxu0 %vm5917_vm7, %v5150_v21 }
 0x3f2   :  { %5198 = vmatprep.subr.msk.bf16.mxu0 %vm5917_vm7, %v5156_v35 }
 0x3f3   :  { %4796 = vmatmul.mubr.msk.f32.gmra.mrb[6].mxu1 %vm374_vm6, %v511_v61 }
 0x3f4   :  { %4810 = vmatmul.mubr.msk.f32.gmra.mrb[10].mxu0 %vm374_vm6, %v696_v63 }
 0x3f5   :  { %4848 = vmatprep.mubr.msk.f32.mxu0 %vm374_vm6, %v1084_v0 }
 0x3f9   :  { %5201 = vmatpush3.bf16.xpose.msk.msra.mxu0 %vm5917_vm7, %v5156_v35 }
 0x3fa   :  { %5212 = vmatprep.subr.msk.bf16.mxu0 %vm5917_vm7, %v5150_v21 }
 0x400   :  { %4849 = vmatmul.mubr.msk.f32.vlgmr.msra.gmra.mrb[12].mxu0 %vm374_vm6, %v1085_v1 }
 0x401   :  { %4851 = vmatprep.mubr.msk.f32.mxu0 %vm374_vm6, %v1086_v2  ;;  %5215 = vmatpush3.bf16.xpose.msk.msra.mxu0 %vm5917_vm7, %v5150_v21 }
 0x402   :  { %5218 = vmatprep.subr.msk.bf16.mxu0 %vm5917_vm7, %v5156_v35 }
 0x404   :  { %4852 = vmatmul.mubr.msk.f32.gmra.mrb[14].mxu0 %vm374_vm6, %v1087_v4  ;;  %v341_v4 = vld [vmem:[%s7004_s2 + $0x58] sm:$0xff] }
 0x405   :  { %4876 = vmatprep.mubr.msk.f32.mxu0 %vm374_vm6, %v1366_v6 }
 0x409   :  { %5221 = vmatpush3.bf16.xpose.msk.msra.mxu0 %vm5917_vm7, %v5156_v35 }
 0x410   :  { %4877 = vmatmul.mubr.msk.f32.vlgmr.msra.gmra.mrb[16].mxu0 %vm374_vm6, %v1367_v8 }
 0x411   :  { %4879 = vmatprep.mubr.msk.f32.mxu0 %vm374_vm6, %v1368_v10 }
 0x414   :  { %4880 = vmatmul.mubr.msk.f32.gmra.mrb[18].mxu0 %vm374_vm6, %v1369_v62 }
 0x45a   :  { %v5437_v15 = vpop.permute.xlu0 %5436 }
 0x45b   :  { %v5427_v17 = vpop.permute.xlu1 %5426  ;;  %v5439_v21 = vunpack.i.h.bf16 %v5437_v15  ;;  %v5438_v59 = vunpack.i.l.bf16 %v5437_v15 }
 0x45c   :  { %v5429_v22 = vunpack.i.h.bf16 %v5427_v17  ;;  %v5428_v25 = vunpack.i.l.bf16 %v5427_v17  ;;  %v340_v17 = vld [vmem:[%s7004_s2 + $0x50] sm:$0xff] }
 0x45d   :  { %v5178_v39 = vpack.c.bf16 %v5439_v21, %v5438_v59 }
 0x45e   :  { %v5174_v9 = vpack.c.bf16 %v5429_v22, %v5428_v25 }
 0x45f   :  { %v5432_v26 = vpop.permute.xlu1 %5431 }
 0x460   :  { %v5434_v27 = vunpack.i.h.bf16 %v5432_v26  ;;  %v5433_v35 = vunpack.i.l.bf16 %v5432_v26  ;;  %5175 = vmatprep.subr.bf16.mxu1 %v5174_v9 }
 0x461   :  { %5177 = vmatpush3.bf16.msra.mxu1 %v5174_v9 }
 0x462   :  { %5179 = vmatprep.subr.bf16.mxu1 %v5178_v39  ;;  %v6026_v5 = vpack.c.bf16 %v5434_v27, %v5433_v35 }
 0x465   :  { %5181 = vmatpush3.bf16.msra.mxu1 %v5178_v39 }
 0x466   :  { %5183 = vmatprep.subr.bf16.mxu1 %v6026_v5 }
 0x4c2   :  { %v4794_v41 = vpop.f32.mrb[4].mxu1 }
 0x4c3   :  { %v630_v44 = vmul.f32 0.35355338, %v4794_v41  ;;  %v4808_v45 = vpop.f32.mrb[8].mxu0  ;;  %v610_v47 = vpop.f32.mrb[5].mxu1 }
 0x4c4   :  { %v795_v48 = vmul.f32 0.35355338, %v4808_v45  ;;  %v629_v51 = vmul.f32 0.35355338, %v610_v47  ;;  %v775_v52 = vpop.f32.mrb[9].mxu0 }
 0x4c5   :  { %v794_v55 = vmul.f32 0.35355338, %v775_v52  ;;  %v6038_v58 = vadd.f32 %v630_v44, %v6032_v42 }
 0x4c6   :  { %v4797_v60 = vpop.f32.mrb[6].mxu1  ;;  %v6041_v61 = vadd.f32 %v795_v48, %v6032_v42  ;;  %v6052_v15 = vadd.f32 %v629_v51, %v338_v54 }
 0x4c7   :  { %v4811_v63 = vpop.f32.mrb[10].mxu0  ;;  %v620_v0 = vpop.f32.mrb[7].mxu1  ;;  %v640_v1 = vsel %vm374_vm6, %v6038_v58, -inf  ;;  %v6045_v2 = vadd.f32 %v794_v55, %v338_v54  ;;  %v632_v21 = vmul.f32 0.35355338, %v4797_v60 }
 0x4c8   :  { %v797_v6 = vmul.f32 0.35355338, %v4811_v63  ;;  %v631_v8 = vmul.f32 0.35355338, %v620_v0  ;;  %v785_v10 = vpop.f32.mrb[11].mxu0  ;;  %v805_v62 = vsel %vm374_vm6, %v6041_v61, -inf  ;;  %641 = vmax.xlane.f32.xlu1 %v640_v1 }
 0x4c9   :  { %806 = vmax.xlane.f32.xlu0 %v805_v62  ;;  %v802_v59 = vsel %vm374_vm6, %v6045_v2, -inf  ;;  %v637_v25 = vsel %vm374_vm6, %v6052_v15, -inf  ;;  %v796_v26 = vmul.f32 0.35355338, %v785_v10  ;;  %v6067_v35 = vadd.f32 %v632_v21, %v341_v4 }
 0x4ca   :  { %v6059_v22 = vadd.f32 %v797_v6, %v341_v4  ;;  %v6063_v9 = vadd.f32 %v631_v8, %v340_v17 }
 0x4cb   :  { %v646_v44 = vsel %vm374_vm6, %v6067_v35, -inf  ;;  %v6073_v45 = vadd.f32 %v796_v26, %v340_v17 }
 0x4cc   :  { %803 = vmax.xlane.f32.xlu1 %v802_v59  ;;  %v811_v27 = vsel %vm374_vm6, %v6059_v22, -inf  ;;  %v643_v39 = vsel %vm374_vm6, %v6063_v9, -inf }
 0x4cd   :  { %638 = vmax.xlane.f32.xlu0 %v637_v25  ;;  %v808_v55 = vsel %vm374_vm6, %v6073_v45, -inf }
 0x4d0   :  { %812 = vmax.xlane.f32.xlu1 %v811_v27 }
 0x4d1   :  { %644 = vmax.xlane.f32.xlu0 %v643_v39 }
 0x4d3   :  { %v4850_v41 = vpop.f32.mrb[12].mxu0 }
 0x4d4   :  { %v1186_v47 = vmul.f32 0.35355338, %v4850_v41  ;;  %v1166_v48 = vpop.f32.mrb[13].mxu0  ;;  %647 = vmax.xlane.f32.xlu1 %v646_v44 }
 0x4d5   :  { %v1185_v51 = vmul.f32 0.35355338, %v1166_v48 }
 0x4d6   :  { %v6080_v63 = vadd.f32 %v1186_v47, %v6032_v42 }
 0x4d7   :  { %v4853_v52 = vpop.f32.mrb[14].mxu0  ;;  %v6077_v60 = vadd.f32 %v1185_v51, %v338_v54 }
 0x4d8   :  { %v1188_v0 = vmul.f32 0.35355338, %v4853_v52  ;;  %v1176_v1 = vpop.f32.mrb[15].mxu0  ;;  %809 = vmax.xlane.f32.xlu1 %v808_v55  ;;  %v1196_v10 = vsel %vm374_vm6, %v6080_v63, -inf }
 0x4d9   :  { %v1187_v6 = vmul.f32 0.35355338, %v1176_v1  ;;  %v1193_v8 = vsel %vm374_vm6, %v6077_v60, -inf }
 0x4da   :  { %1194 = vmax.xlane.f32.xlu0 %v1193_v8  ;;  %v6088_v21 = vadd.f32 %v1188_v0, %v341_v4 }
 0x4db   :  { %v6086_v62 = vadd.f32 %v1187_v6, %v340_v17 }
 0x4dc   :  { %1197 = vmax.xlane.f32.xlu1 %v1196_v10  ;;  %v1202_v25 = vsel %vm374_vm6, %v6088_v21, -inf  ;;  %v1241_v10 = vmul.f32 %v6022_v11, %v5929_v28 }
 0x4dd   :  { %v1199_v59 = vsel %vm374_vm6, %v6086_v62, -inf }
 0x4de   :  { %1200 = vmax.xlane.f32.xlu0 %v1199_v59  ;;  %v1242_v59 = vmul.f32 %v6022_v11, %v5935_v36 }
 0x4e0   :  { %1203 = vmax.xlane.f32.xlu1 %v1202_v25  ;;  %v5445_v25 = vpack.i.bf16 %v1242_v59, %v1241_v10 }
 0x4e3   :  { %v4878_v26 = vpop.f32.mrb[16].mxu0 }
 0x4e4   :  { %v1468_v27 = vmul.f32 0.35355338, %v4878_v26  ;;  %v1448_v39 = vpop.f32.mrb[17].mxu0 }
 0x4e5   :  { %v1467_v41 = vmul.f32 0.35355338, %v1448_v39 }
 0x4e6   :  { %v6095_v44 = vadd.f32 %v1468_v27, %v6032_v42 }
 0x4e7   :  { %v4881_v47 = vpop.f32.mrb[18].mxu0  ;;  %v6097_v48 = vadd.f32 %v1467_v41, %v338_v54 }
 0x4e8   :  { %v1470_v51 = vmul.f32 0.35355338, %v4881_v47  ;;  %v1458_v52 = vpop.f32.mrb[19].mxu0  ;;  %v1478_v55 = vsel %vm374_vm6, %v6095_v44, -inf }
 0x4e9   :  { %v1469_v0 = vmul.f32 0.35355338, %v1458_v52  ;;  %1479 = vmax.xlane.f32.xlu1 %v1478_v55  ;;  %v1475_v1 = vsel %vm374_vm6, %v6097_v48, -inf }
 0x4ea   :  { %1476 = vmax.xlane.f32.xlu0 %v1475_v1  ;;  %v6103_v6 = vadd.f32 %v1470_v51, %v341_v4  ;;  %v687_v4 = vmul.f32 %v5951_v46, %v5933_v34 }
 0x4eb   :  { %v6105_v8 = vadd.f32 %v1469_v0, %v340_v17  ;;  %v688_v17 = vmul.f32 %v5951_v46, %v5931_v31 }
 0x4ec   :  { %v1484_v42 = vsel %vm374_vm6, %v6103_v6, -inf }
 0x4ed   :  { %1485 = vmax.xlane.f32.xlu1 %v1484_v42  ;;  %v1481_v54 = vsel %vm374_vm6, %v6105_v8, -inf  ;;  %v5440_v26 = vpack.i.bf16 %v688_v17, %v687_v4 }
 0x4ee   :  { %1482 = vmax.xlane.f32.xlu0 %v1481_v54 }
 0x4fe   :  { %5446 = vrot.lane.b32.xlu1 %v5445_v25, %s5740_s5 }
 0x504   :  { %5441 = vrot.lane.b32.xlu0 %v5440_v26, %s5740_s5 }
 0x555   :  { %v642_v27 = vpop.xlane.xlu1 %641 }
 0x556   :  { %v807_v39 = vpop.xlane.xlu0 %806  ;;  %v650_v41 = vsub.f32 %v6038_v58, %v642_v27 }
 0x557   :  { %v815_v47 = vsub.f32 %v6041_v61, %v807_v39 }
 0x558   :  { %v655_v51 = vmul.f32 1.442695, %v650_v41 }
 0x559   :  { %v820_v52 = vmul.f32 1.442695, %v815_v47  ;;  %v804_v55 = vpop.xlane.xlu1 %803 }
 0x55a   :  { %5540 = vpow2.f32 %v655_v51  ;;  %v814_v0 = vsub.f32 %v6045_v2, %v804_v55  ;;  %v639_v1 = vpop.xlane.xlu0 %638 }
 0x55b   :  { %5542 = vpow2.f32 %v820_v52  ;;  %v649_v42 = vsub.f32 %v6052_v15, %v639_v1 }
 0x55c   :  { %v818_v54 = vmul.f32 1.442695, %v814_v0 }
 0x55d   :  { %v653_v10 = vmul.f32 1.442695, %v649_v42  ;;  %v813_v59 = vpop.xlane.xlu1 %812 }
 0x55e   :  { %5544 = vpow2.f32 %v818_v54  ;;  %v817_v25 = vsub.f32 %v6059_v22, %v813_v59  ;;  %v645_v4 = vpop.xlane.xlu0 %644 }
 0x55f   :  { %5546 = vpow2.f32 %v653_v10  ;;  %v651_v58 = vsub.f32 %v6063_v9, %v645_v4 }
 0x560   :  { %v824_v61 = vmul.f32 1.442695, %v817_v25 }
 0x561   :  { %v657_v17 = vmul.f32 1.442695, %v651_v58  ;;  %v648_v26 = vpop.xlane.xlu1 %647 }
 0x562   :  { %5548 = vpow2.f32 %v824_v61  ;;  %v652_v2 = vsub.f32 %v6067_v35, %v648_v26 }
 0x563   :  { %5550 = vpow2.f32 %v657_v17 }
 0x564   :  { %v6128_v27 = vpop.eup %5540  ;;  %v659_v15 = vmul.f32 1.442695, %v652_v2 }
 0x565   :  { %v6130_v39 = vpop.eup %5542  ;;  %v810_v41 = vpop.xlane.xlu1 %809  ;;  %v664_v22 = vsel %vm374_vm6, %v6128_v27, 0.0 }
 0x566   :  { %5552 = vpow2.f32 %v659_v15  ;;  %v816_v47 = vsub.f32 %v6073_v45, %v810_v41  ;;  %v829_v9 = vsel %vm374_vm6, %v6130_v39, 0.0  ;;  %665 = vadd.xlane.f32.xlu0 %v664_v22 }
 0x567   :  { %830 = vadd.xlane.f32.xlu1 %v829_v9  ;;  %v1195_v51 = vpop.xlane.xlu0 %1194 }
 0x568   :  { %v6137_v35 = vpop.eup %5544  ;;  %v822_v52 = vmul.f32 1.442695, %v816_v47  ;;  %v1205_v55 = vsub.f32 %v6077_v60, %v1195_v51 }
 0x569   :  { %v6140_v0 = vpop.eup %5546  ;;  %v1198_v1 = vpop.xlane.xlu1 %1197  ;;  %v826_v42 = vsel %vm374_vm6, %v6137_v35, 0.0 }
 0x56a   :  { %5554 = vpow2.f32 %v822_v52  ;;  %v1209_v54 = vmul.f32 1.442695, %v1205_v55  ;;  %v1206_v45 = vsub.f32 %v6080_v63, %v1198_v1  ;;  %v661_v10 = vsel %vm374_vm6, %v6140_v0, 0.0  ;;  %827 = vadd.xlane.f32.xlu0 %v826_v42 }
 0x56b   :  { %662 = vadd.xlane.f32.xlu1 %v661_v10  ;;  %v1201_v59 = vpop.xlane.xlu0 %1200 }
 0x56c   :  { %v6147_v25 = vpop.eup %5548  ;;  %5556 = vpow2.f32 %v1209_v54  ;;  %v1211_v60 = vmul.f32 1.442695, %v1206_v45  ;;  %v1207_v4 = vsub.f32 %v6086_v62, %v1201_v59 }
 0x56d   :  { %v6150_v58 = vpop.eup %5550  ;;  %v1204_v61 = vpop.xlane.xlu1 %1203  ;;  %v835_v17 = vsel %vm374_vm6, %v6147_v25, 0.0 }
 0x56e   :  { %5558 = vpow2.f32 %v1211_v60  ;;  %v1208_v63 = vsub.f32 %v6088_v21, %v1204_v61  ;;  %836 = vadd.xlane.f32.xlu0 %v835_v17  ;;  %v667_v26 = vsel %vm374_vm6, %v6150_v58, 0.0  ;;  %v1213_v15 = vmul.f32 1.442695, %v1207_v4 }
 0x56f   :  { %668 = vadd.xlane.f32.xlu1 %v667_v26 }
 0x570   :  { %v6157_v2 = vpop.eup %5552  ;;  %v1215_v41 = vmul.f32 1.442695, %v1208_v63 }
 0x571   :  { %v670_v62 = vsel %vm374_vm6, %v6157_v2, 0.0 }
 0x572   :  { %5560 = vpow2.f32 %v1215_v41  ;;  %671 = vadd.xlane.f32.xlu0 %v670_v62 }
 0x573   :  { %5562 = vpow2.f32 %v1213_v15 }
 0x574   :  { %v6161_v22 = vpop.eup %5554 }
 0x575   :  { %v832_v21 = vsel %vm374_vm6, %v6161_v22, 0.0 }
 0x576   :  { %v6165_v47 = vpop.eup %5556  ;;  %v1480_v9 = vpop.xlane.xlu1 %1479  ;;  %833 = vadd.xlane.f32.xlu0 %v832_v21  ;;  %v1523_v21 = vmul.f32 %v6024_v14, %v5929_v28 }
 0x577   :  { %v1488_v51 = vsub.f32 %v6095_v44, %v1480_v9  ;;  %v1477_v52 = vpop.xlane.xlu0 %1476  ;;  %v1217_v55 = vsel %vm374_vm6, %v6165_v47, 0.0  ;;  %v1524_v9 = vmul.f32 %v6024_v14, %v5935_v36 }
 0x578   :  { %v6170_v1 = vpop.eup %5558  ;;  %v1487_v42 = vsub.f32 %v6097_v48, %v1477_v52  ;;  %1218 = vadd.xlane.f32.xlu1 %v1217_v55  ;;  %v1243_v52 = vmul.f32 %v6022_v11, %v5933_v34  ;;  %v1244_v55 = vmul.f32 %v6022_v11, %v5931_v31 }
 0x579   :  { %v1493_v54 = vmul.f32 1.442695, %v1488_v51  ;;  %v1220_v45 = vsel %vm374_vm6, %v6170_v1, 0.0  ;;  %v5455_v51 = vpack.i.bf16 %v1524_v9, %v1523_v21 }
 0x57a   :  { %v1491_v10 = vmul.f32 1.442695, %v1487_v42  ;;  %v1486_v59 = vpop.xlane.xlu1 %1485  ;;  %1221 = vadd.xlane.f32.xlu0 %v1220_v45  ;;  %v5450_v42 = vpack.i.bf16 %v1244_v55, %v1243_v52 }
 0x57b   :  { %5564 = vpow2.f32 %v1493_v54  ;;  %v1490_v60 = vsub.f32 %v6103_v6, %v1486_v59  ;;  %v1483_v54 = vpop.xlane.xlu0 %1482  ;;  %v1525_v59 = vmul.f32 %v6024_v14, %v5933_v34 }
 0x57c   :  { %v6176_v44 = vpop.eup %5560  ;;  %5566 = vpow2.f32 %v1491_v10  ;;  %v1489_v45 = vsub.f32 %v6105_v8, %v1483_v54  ;;  %v5465_v8 = vpack.i.bf16 %v5799_v20, %v5794_v19 }
 0x57d   :  { %v1497_v4 = vmul.f32 1.442695, %v1490_v60  ;;  %v1226_v61 = vsel %vm374_vm6, %v6176_v44, 0.0  ;;  %v6180_v17 = vpop.eup %5562  ;;  %v1526_v60 = vmul.f32 %v6024_v14, %v5931_v31 }
 0x57e   :  { %1227 = vadd.xlane.f32.xlu0 %v1226_v61  ;;  %v1223_v48 = vsel %vm374_vm6, %v6180_v17, 0.0  ;;  %v1495_v10 = vmul.f32 1.442695, %v1489_v45  ;;  %v5470_v61 = vpack.i.bf16 %v5811_v24, %v5806_v23 }
 0x57f   :  { %5568 = vpow2.f32 %v1497_v4  ;;  %v5460_v4 = vpack.i.bf16 %v1526_v60, %v1525_v59 }
 0x580   :  { %5570 = vpow2.f32 %v1495_v10 }
 0x582   :  { %1224 = vadd.xlane.f32.xlu0 %v1223_v48  ;;  %v5442_v48 = vpop.permute.xlu0 %5441 }
 0x583   :  { %v5444_v19 = vunpack.i.h.bf16 %v5442_v48  ;;  %v5443_v20 = vunpack.i.l.bf16 %v5442_v48 }
 0x585   :  { %v6184_v63 = vpop.eup %5564  ;;  %v5186_v10 = vpack.c.bf16 %v5444_v19, %v5443_v20 }
 0x586   :  { %v6186_v26 = vpop.eup %5566  ;;  %v1502_v6 = vsel %vm374_vm6, %v6184_v63, 0.0 }
 0x587   :  { %1503 = vadd.xlane.f32.xlu0 %v1502_v6  ;;  %v1499_v15 = vsel %vm374_vm6, %v6186_v26, 0.0  ;;  %v5447_v6 = vpop.permute.xlu1 %5446 }
 0x588   :  { %1500 = vadd.xlane.f32.xlu1 %v1499_v15  ;;  %v5449_v54 = vunpack.i.h.bf16 %v5447_v6  ;;  %v5448_v45 = vunpack.i.l.bf16 %v5447_v6 }
 0x589   :  { %v6192_v41 = vpop.eup %5568 }
 0x58a   :  { %v1508_v62 = vsel %vm374_vm6, %v6192_v41, 0.0  ;;  %v6207_v28 = vpop.eup %5570  ;;  %v5202_v60 = vpack.c.bf16 %v5449_v54, %v5448_v45 }
 0x58b   :  { %1509 = vadd.xlane.f32.xlu0 %v1508_v62  ;;  %v1505_v36 = vsel %vm374_vm6, %v6207_v28, 0.0 }
 0x599   :  { %5456 = vrot.lane.b32.xlu1 %v5455_v51, %s5740_s5 }
 0x5a1   :  { %5451 = vrot.lane.b32.xlu0 %v5450_v42, %s5740_s5 }
 0x5bd   :  { %1506 = vadd.xlane.f32.xlu1 %v1505_v36 }
 0x5ce   :  { %5461 = vrot.lane.b32.xlu1 %v5460_v4, %s5740_s5 }
 0x5d2   :  { %5466 = vrot.lane.b32.xlu1 %v5465_v8, %s5741_s6 }
 0x5d6   :  { %5471 = vrot.lane.b32.xlu1 %v5470_v61, %s5741_s6 }
 0x5f3   :  { %v666_v15 = vpop.xlane.xlu0 %665 }
 0x5f4   :  { %v831_v34 = vpop.xlane.xlu1 %830 }
 0x5f5   :  { %5572 = vrcp.f32 %v831_v34 }
 0x5f7   :  { %v828_v62 = vpop.xlane.xlu0 %827 }
 0x5f8   :  { %5574 = vrcp.f32 %v828_v62  ;;  %v663_v21 = vpop.xlane.xlu1 %662 }
 0x5f9   :  { %5576 = vrcp.f32 %v663_v21 }
 0x5fb   :  { %v837_v31 = vpop.xlane.xlu0 %836 }
 0x5fc   :  { %5578 = vrcp.f32 %v837_v31  ;;  %v669_v42 = vpop.xlane.xlu1 %668 }
 0x5ff   :  { %v672_v9 = vpop.xlane.xlu0 %671  ;;  %v5573_v51 = vpop.eup %5572 }
 0x600   :  { %v841_v24 = vmul.f32 %v5573_v51, %v6130_v39 }
 0x602   :  { %v5575_v52 = vpop.eup %5574 }
 0x603   :  { %v834_v55 = vpop.xlane.xlu0 %833  ;;  %v839_v23 = vmul.f32 %v5575_v52, %v6137_v35  ;;  %v5577_v35 = vpop.eup %5576 }
 0x604   :  { %5580 = vrcp.f32 %v834_v55 }
 0x605   :  { %4820 = vmatprep.mubr.msk.f32.mxu1 %vm374_vm6, %v839_v23  ;;  %5582 = vrcp.f32 %v666_v15  ;;  %v1219_v59 = vpop.xlane.xlu1 %1218 }
 0x606   :  { %4821 = vmatmul.mubr.msk.f32.vlgmr.msra.gmra.mrb[8].mxu1 %vm374_vm6, %v841_v24  ;;  %5584 = vrcp.f32 %v669_v42  ;;  %v5579_v4 = vpop.eup %5578 }
 0x607   :  { %5185 = vmatpush3.bf16.msra.mxu1 %v6026_v5  ;;  %v1222_v36 = vpop.xlane.xlu0 %1221  ;;  %5586 = vrcp.f32 %v672_v9  ;;  %v845_v6 = vmul.f32 %v5579_v4, %v6147_v25  ;;  %v674_v5 = vmul.f32 %v5577_v35, %v6140_v0 }
 0x608   :  { %5187 = vmatprep.subr.bf16.mxu1 %v5186_v10  ;;  %5588 = vrcp.f32 %v1219_v59 }
 0x609   :  { %5590 = vrcp.f32 %v1222_v36 }
 0x60b   :  { %5189 = vmatpush3.bf16.msra.mxu1 %v5186_v10  ;;  %v1228_v39 = vpop.xlane.xlu0 %1227 }
 0x60c   :  { %5203 = vmatprep.subr.bf16.mxu1 %v5202_v60 }
 0x60e   :  { %v5581_v8 = vpop.eup %5580 }
 0x60f   :  { %v1225_v61 = vpop.xlane.xlu0 %1224  ;;  %v843_v48 = vmul.f32 %v5581_v8, %v6161_v22  ;;  %v5583_v15 = vpop.eup %5582 }
 0x610   :  { %v5585_v34 = vpop.eup %5584  ;;  %v676_v62 = vmul.f32 %v5583_v15, %v6128_v27  ;;  %5592 = vrcp.f32 %v1225_v61 }
 0x611   :  { %4823 = vmatprep.mubr.msk.f32.mxu1 %vm374_vm6, %v843_v48  ;;  %v5587_v21 = vpop.eup %5586  ;;  %v678_v51 = vmul.f32 %v5585_v34, %v6150_v58  ;;  %5594 = vrcp.f32 %v1228_v39 }
 0x612   :  { %4824 = vmatmul.mubr.msk.f32.gmra.mrb[10].mxu1 %vm374_vm6, %v845_v6  ;;  %v5589_v22 = vpop.eup %5588  ;;  %v680_v25 = vmul.f32 %v5587_v21, %v6157_v2 }
 0x613   :  { %4834 = vmatprep.mubr.msk.f32.mxu1 %vm374_vm6, %v674_v5  ;;  %v1230_v52 = vmul.f32 %v5589_v22, %v6165_v47  ;;  %v5591_v42 = vpop.eup %5590 }
 0x614   :  { %v1504_v31 = vpop.xlane.xlu0 %1503  ;;  %v1232_v2 = vmul.f32 %v5591_v42, %v6170_v1 }
 0x615   :  { %v1501_v9 = vpop.xlane.xlu1 %1500 }
 0x616   :  { %4835 = vmatmul.mubr.msk.f32.vlgmr.msra.gmra.mrb[8].mxu1 %vm374_vm6, %v676_v62  ;;  %5596 = vrcp.f32 %v1501_v9 }
 0x617   :  { %5205 = vmatpush3.bf16.msra.mxu1 %v5202_v60  ;;  %4837 = vmatprep.mubr.msk.f32.mxu1 %vm374_vm6, %v678_v51  ;;  %5598 = vrcp.f32 %v1504_v31 }
 0x618   :  { %v1510_v0 = vpop.xlane.xlu0 %1509 }
 0x619   :  { %v5457_v27 = vpop.permute.xlu1 %5456 }
 0x61a   :  { %4838 = vmatmul.mubr.msk.f32.gmra.mrb[10].mxu1 %vm374_vm6, %v680_v25  ;;  %v5459_v19 = vunpack.i.h.bf16 %v5457_v27  ;;  %v5458_v20 = vunpack.i.l.bf16 %v5457_v27  ;;  %v5593_v54 = vpop.eup %5592 }
 0x61b   :  { %4862 = vmatprep.mubr.msk.f32.mxu1 %vm374_vm6, %v1230_v52  ;;  %v5595_v47 = vpop.eup %5594  ;;  %v1234_v10 = vmul.f32 %v5593_v54, %v6180_v17 }
 0x61c   :  { %v5452_v58 = vpop.permute.xlu0 %5451  ;;  %v5222_v45 = vpack.c.bf16 %v5459_v19, %v5458_v20  ;;  %v1236_v59 = vmul.f32 %v5595_v47, %v6176_v44 }
 0x61d   :  { %v5454_v55 = vunpack.i.h.bf16 %v5452_v58  ;;  %v5453_v23 = vunpack.i.l.bf16 %v5452_v58 }
 0x61f   :  { %v5206_v24 = vpack.c.bf16 %v5454_v55, %v5453_v23 }
 0x620   :  { %v5597_v36 = vpop.eup %5596 }
 0x621   :  { %5207 = vmatprep.subr.bf16.mxu1 %v5206_v24  ;;  %v1512_v60 = vmul.f32 %v5597_v36, %v6186_v26  ;;  %v5599_v8 = vpop.eup %5598 }
 0x622   :  { %5209 = vmatpush3.bf16.msra.mxu1 %v5206_v24  ;;  %v1514_v26 = vmul.f32 %v5599_v8, %v6184_v63 }
 0x623   :  { %5223 = vmatprep.subr.bf16.mxu1 %v5222_v45 }
 0x625   :  { %4863 = vmatmul.mubr.msk.f32.vlgmr.msra.gmra.mrb[8].mxu1 %vm374_vm6, %v1232_v2 }
 0x626   :  { %4865 = vmatprep.mubr.msk.f32.mxu1 %vm374_vm6, %v1234_v10  ;;  %5225 = vmatpush3.bf16.msra.mxu1 %v5222_v45 }
 0x629   :  { %4866 = vmatmul.mubr.msk.f32.gmra.mrb[10].mxu1 %vm374_vm6, %v1236_v59 }
 0x62a   :  { %4890 = vmatprep.mubr.msk.f32.mxu1 %vm374_vm6, %v1512_v60 }
 0x64a   :  { %v1507_v1 = vpop.xlane.xlu1 %1506 }
 0x64b   :  { %5600 = vrcp.f32 %v1507_v1 }
 0x64c   :  { %5602 = vrcp.f32 %v1510_v0 }
 0x64e   :  { %v5462_v39 = vpop.permute.xlu1 %5461 }
 0x64f   :  { %v5464_v17 = vunpack.i.h.bf16 %v5462_v39  ;;  %v5463_v35 = vunpack.i.l.bf16 %v5462_v39 }
 0x651   :  { %v5226_v4 = vpack.c.bf16 %v5464_v17, %v5463_v35 }
 0x652   :  { %v5467_v61 = vpop.permute.xlu1 %5466 }
 0x653   :  { %5227 = vmatprep.subr.bf16.mxu1 %v5226_v4  ;;  %v5469_v48 = vunpack.i.h.bf16 %v5467_v61  ;;  %v5468_v6 = vunpack.i.l.bf16 %v5467_v61 }
 0x654   :  { %5229 = vmatpush3.bf16.msra.mxu1 %v5226_v4 }
 0x655   :  { %v5601_v44 = vpop.eup %5600  ;;  %v5230_v15 = vpack.c.bf16 %v5469_v48, %v5468_v6 }
 0x656   :  { %v5603_v5 = vpop.eup %5602  ;;  %v1516_v34 = vmul.f32 %v5601_v44, %v6207_v28  ;;  %v5472_v62 = vpop.permute.xlu1 %5471 }
 0x657   :  { %4891 = vmatmul.mubr.msk.f32.vlgmr.msra.gmra.mrb[8].mxu1 %vm374_vm6, %v1514_v26  ;;  %v5474_v31 = vunpack.i.h.bf16 %v5472_v62  ;;  %v5473_v21 = vunpack.i.l.bf16 %v5472_v62  ;;  %5231 = vmatprep.subr.bf16.mxu1 %v5230_v15  ;;  %v1518_v9 = vmul.f32 %v5603_v5, %v6192_v41  ;;  %v1647_v41 = vrot.slane %v5826_v30, %v5906_v12  ;;  %v361_v62 = vld [vmem:[%s7003_s1 + $0x48] sm:$0xff] }
 0x658   :  { %4893 = vmatprep.mubr.msk.f32.mxu1 %vm374_vm6, %v1516_v34  ;;  %5233 = vmatpush3.bf16.msra.mxu1 %v5230_v15  ;;  %v360_v34 = vld [vmem:[%s7003_s1 + $0x40] sm:$0xff] }
 0x659   :  { %v5234_v51 = vpack.c.bf16 %v5474_v31, %v5473_v21  ;;  %v5238_v31 = vpack.c.bf16 %v361_v62, %v360_v34  ;;  %v362_v21 = vld [vmem:[%s7003_s1 + $0x50] sm:$0xff] }
 0x65a   :  { %v370_v62 = vld [vmem:[%s7003_s1 + $0xb0] sm:$0xff] }
 0x65b   :  { %4894 = vmatmul.mubr.msk.f32.gmra.mrb[10].mxu1 %vm374_vm6, %v1518_v9  ;;  %5235 = vmatprep.subr.bf16.mxu1 %v5234_v51  ;;  %v363_v9 = vld [vmem:[%s7003_s1 + $0x58] sm:$0xff] }
 0x65c   :  { %5237 = vmatpush3.bf16.msra.mxu1 %v5234_v51  ;;  %5239 = vmatprep.subr.bf16.mxu0 %v5238_v31  ;;  %v5242_v51 = vpack.c.bf16 %v363_v9, %v362_v21  ;;  %v7007_v9 = vsub.s32 6, %v5821_v29 }
 0x65d   :  { %5241 = vmatpush3.bf16.msra.mxu0 %v5238_v31  ;;  %v371_v31 = vld [vmem:[%s7003_s1 + $0xb8] sm:$0xff] }
 0x65e   :  { %5243 = vmatprep.subr.bf16.mxu0 %v5242_v51  ;;  %v5258_v21 = vpack.c.bf16 %v371_v31, %v370_v62 }
 0x661   :  { %5245 = vmatpush3.bf16.msra.mxu0 %v5242_v51 }
 0x72a   :  { %v4892_v63 = vpop.f32.mrb[8].mxu1 }
 0x72b   :  { %v1621_v22 = vpop.f32.mrb[9].mxu1 }
 0x72c   :  { %4904 = vmatprep.mubr.msk.f32.mxu1 %vm374_vm6, %v1621_v22 }
 0x72d   :  { %4905 = vmatmul.mubr.msk.f32.vlgmr.msra.gmra.mrb[12].mxu1 %vm374_vm6, %v4892_v63 }
 0x72e   :  { %v4895_v28 = vpop.f32.mrb[10].mxu1 }
 0x72f   :  { %v1631_v0 = vpop.f32.mrb[11].mxu1 }
 0x730   :  { %4907 = vmatprep.mubr.msk.f32.mxu1 %vm374_vm6, %v1631_v0 }
 0x731   :  { %4908 = vmatmul.mubr.msk.f32.gmra.mrb[14].mxu1 %vm374_vm6, %v4895_v28 }
 0x800   :  { %v4906_v25 = vpop.f32.mrb[12].mxu1 }
 0x801   :  { %v1748_v52 = vadd.f32 %v4906_v25, %v1647_v41  ;;  %v1742_v27 = vpop.f32.mrb[13].mxu1 }
 0x802   :  { %v1743_v58 = vadd.f32 %v1742_v27, %v1647_v41 }
 0x803   :  { %v1762_v19 = vadd.f32 %v1748_v52, %v5858_v43 }
 0x804   :  { %v4909_v20 = vpop.f32.mrb[14].mxu1  ;;  %v1761_v55 = vadd.f32 %v1743_v58, %v5842_v37 }
 0x805   :  { %v1752_v23 = vpop.f32.mrb[15].mxu1  ;;  %v1768_v24 = vsel %vm374_vm6, %v1762_v19, 0.0  ;;  %v1758_v42 = vadd.f32 %v4909_v20, %v1647_v41  ;;  %v7009_v20 = vsub.s32 4, %v5821_v29 }
 0x806   :  { %v1753_v54 = vadd.f32 %v1752_v23, %v1647_v41  ;;  %1769 = vadd.xlane.f32.xlu1 %v1768_v24  ;;  %v1765_v45 = vsel %vm374_vm6, %v1761_v55, 0.0  ;;  %v7008_v24 = vsub.s32 5, %v5821_v29 }
 0x807   :  { %1766 = vadd.xlane.f32.xlu0 %v1765_v45  ;;  %v1764_v47 = vadd.f32 %v1758_v42, %v5870_v50  ;;  %v6290_v42 = vld [vmem:[%s7004_s2 + $0x80] sm:$0xff] }
 0x808   :  { %v1763_v30 = vadd.f32 %v1753_v54, %v5868_v49  ;;  %v1821_v54 = vrot.slane %v6290_v42, %v7009_v20  ;;  %v1837_v51 = vrot.slane %v6290_v42, %v7007_v9 }
 0x809   :  { %v1774_v43 = vsel %vm374_vm6, %v1764_v47, 0.0 }
 0x80a   :  { %v1771_v2 = vsel %vm374_vm6, %v1763_v30, 0.0 }
 0x80b   :  { %1772 = vadd.xlane.f32.xlu0 %v1771_v2 }
 0x80f   :  { %1775 = vadd.xlane.f32.xlu0 %v1774_v43  ;;  %v1829_v43 = vrot.slane %v6290_v42, %v7008_v24 }
 0x893   :  { %v1770_v37 = vpop.xlane.xlu1 %1769 }
 0x894   :  { %v1779_v10 = vmul.f32 0.03125, %v1770_v37  ;;  %v1767_v36 = vpop.xlane.xlu0 %1766 }
 0x895   :  { %v1778_v59 = vmul.f32 0.03125, %v1767_v36 }
 0x896   :  { %v1783_v60 = vsub.f32 %v1762_v19, %v1779_v10 }
 0x897   :  { %v1782_v1 = vsub.f32 %v1761_v55, %v1778_v59 }
 0x898   :  { %v1773_v39 = vpop.xlane.xlu0 %1772  ;;  %v1787_v17 = vmul.f32 %v1783_v60, %v1783_v60 }
 0x899   :  { %v1780_v35 = vmul.f32 0.03125, %v1773_v39  ;;  %v1786_v4 = vmul.f32 %v1782_v1, %v1782_v1 }
 0x89a   :  { %v1793_v49 = vsel %vm374_vm6, %v1787_v17, 0.0 }
 0x89b   :  { %v1784_v8 = vsub.f32 %v1763_v30, %v1780_v35  ;;  %1794 = vadd.xlane.f32.xlu0 %v1793_v49  ;;  %v1790_v50 = vsel %vm374_vm6, %v1786_v4, 0.0 }
 0x89c   :  { %1791 = vadd.xlane.f32.xlu1 %v1790_v50  ;;  %v1776_v61 = vpop.xlane.xlu0 %1775 }
 0x89d   :  { %v1781_v48 = vmul.f32 0.03125, %v1776_v61  ;;  %v1788_v6 = vmul.f32 %v1784_v8, %v1784_v8  ;;  %v365_v61 = vld [vmem:[%s7003_s1 + $0x88] sm:$0xff] }
 0x89f   :  { %v1785_v44 = vsub.f32 %v1764_v47, %v1781_v48  ;;  %v1796_v26 = vsel %vm374_vm6, %v1788_v6, 0.0  ;;  %v366_v6 = vld [vmem:[%s7003_s1 + $0x90] sm:$0xff] }
 0x8a0   :  { %1797 = vadd.xlane.f32.xlu1 %v1796_v26 }
 0x8a1   :  { %v1789_v15 = vmul.f32 %v1785_v44, %v1785_v44 }
 0x8a3   :  { %v1799_v5 = vsel %vm374_vm6, %v1789_v15, 0.0  ;;  %v368_v15 = vld [vmem:[%s7003_s1 + $0xa0] sm:$0xff] }
 0x8a4   :  { %1800 = vadd.xlane.f32.xlu0 %v1799_v5  ;;  %v369_v5 = vld [vmem:[%s7003_s1 + $0xa8] sm:$0xff] }
 0x8a5   :  { %v5254_v34 = vpack.c.bf16 %v369_v5, %v368_v15 }
 0x928   :  { %v1795_v63 = vpop.xlane.xlu0 %1794 }
 0x929   :  { %v1803_v22 = vmul.f32 0.03125, %v1795_v63  ;;  %v1792_v28 = vpop.xlane.xlu1 %1791 }
 0x92a   :  { %v1802_v0 = vmul.f32 0.03125, %v1792_v28 }
 0x92b   :  { %v1807_v41 = vadd.f32 1e-05, %v1803_v22 }
 0x92c   :  { %v1806_v25 = vadd.f32 1e-05, %v1802_v0 }
 0x92d   :  { %5604 = vrsqrt.f32 %v1807_v41  ;;  %v1798_v52 = vpop.xlane.xlu1 %1797 }
 0x92e   :  { %5606 = vrsqrt.f32 %v1806_v25  ;;  %v1804_v27 = vmul.f32 0.03125, %v1798_v52 }
 0x930   :  { %v1808_v58 = vadd.f32 1e-05, %v1804_v27 }
 0x931   :  { %v1801_v19 = vpop.xlane.xlu0 %1800 }
 0x932   :  { %5608 = vrsqrt.f32 %v1808_v58  ;;  %v1805_v55 = vmul.f32 0.03125, %v1801_v19 }
 0x934   :  { %v1809_v23 = vadd.f32 1e-05, %v1805_v55 }
 0x936   :  { %5610 = vrsqrt.f32 %v1809_v23 }
 0x937   :  { %v5605_v45 = vpop.eup %5604 }
 0x938   :  { %v5607_v30 = vpop.eup %5606  ;;  %v1815_v2 = vmul.f32 %v5605_v45, %v1783_v60 }
 0x939   :  { %v1814_v47 = vmul.f32 %v5607_v30, %v1782_v1 }
 0x93a   :  { %v1823_v37 = vmul.f32 %v1821_v54, %v1815_v2 }
 0x93b   :  { %v1822_v10 = vmul.f32 %v1821_v54, %v1814_v47 }
 0x93c   :  { %v5609_v36 = vpop.eup %5608  ;;  %v6300_v17 = vadd.f32 %v1829_v43, %v1823_v37 }
 0x93d   :  { %v6298_v59 = vadd.f32 %v1829_v43, %v1822_v10  ;;  %v1816_v39 = vmul.f32 %v5609_v36, %v1784_v8  ;;  %v364_v8 = vld [vmem:[%s7003_s1 + $0x80] sm:$0xff] }
 0x93e   :  { %v5246_v48 = vpack.c.bf16 %v365_v61, %v364_v8 }
 0x93f   :  { %4918 = vmatprep.mubr.msk.f32.mxu0 %vm374_vm6, %v6298_v59  ;;  %v1824_v35 = vmul.f32 %v1821_v54, %v1816_v39 }
 0x940   :  { %v5611_v4 = vpop.eup %5610  ;;  %4919 = vmatmul.mubr.msk.f32.vlgmr.msra.gmra.mrb[20].mxu0 %vm374_vm6, %v6300_v17  ;;  %5247 = vmatprep.subr.bf16.mxu1 %v5246_v48 }
 0x941   :  { %v6306_v60 = vadd.f32 %v1829_v43, %v1824_v35  ;;  %v1817_v1 = vmul.f32 %v5611_v4, %v1785_v44  ;;  %5249 = vmatpush3.bf16.msra.mxu1 %v5246_v48  ;;  %v367_v44 = vld [vmem:[%s7003_s1 + $0x98] sm:$0xff] }
 0x942   :  { %v5250_v26 = vpack.c.bf16 %v367_v44, %v366_v6 }
 0x943   :  { %4921 = vmatprep.mubr.msk.f32.mxu0 %vm374_vm6, %v6306_v60  ;;  %v1825_v49 = vmul.f32 %v1821_v54, %v1817_v1 }
 0x944   :  { %5251 = vmatprep.subr.bf16.mxu1 %v5250_v26 }
 0x945   :  { %v6310_v50 = vadd.f32 %v1829_v43, %v1825_v49  ;;  %5253 = vmatpush3.bf16.msra.mxu1 %v5250_v26 }
 0x946   :  { %5255 = vmatprep.subr.bf16.mxu1 %v5254_v34 }
 0x947   :  { %4922 = vmatmul.mubr.msk.f32.gmra.mrb[22].mxu0 %vm374_vm6, %v6310_v50 }
 0x949   :  { %5257 = vmatpush3.bf16.msra.mxu1 %v5254_v34 }
 0x94a   :  { %5259 = vmatprep.subr.bf16.mxu1 %v5258_v21 }
 0x94d   :  { %5261 = vmatpush3.bf16.msra.mxu1 %v5258_v21 }
 0xa13   :  { %v4920_v63 = vpop.f32.mrb[20].mxu0 }
 0xa14   :  { %v1922_v22 = vadd.f32 %v4920_v63, %v1837_v51  ;;  %v1916_v28 = vpop.f32.mrb[21].mxu0 }
 0xa15   :  { %v1917_v0 = vadd.f32 %v1916_v28, %v1837_v51 }
 0xa16   :  { %v1936_v41 = vmul.f32 %v1922_v22, %v1922_v22 }
 0xa17   :  { %v1935_v25 = vmul.f32 %v1917_v0, %v1917_v0 }
 0xa18   :  { %v1940_v52 = vmul.f32 %v1936_v41, %v1922_v22 }
 0xa19   :  { %v1939_v27 = vmul.f32 %v1935_v25, %v1917_v0 }
 0xa1a   :  { %v1944_v58 = vmul.f32 0.044715, %v1940_v52  ;;  %v4923_v19 = vpop.f32.mrb[22].mxu0 }
 0xa1b   :  { %v1943_v55 = vmul.f32 0.044715, %v1939_v27  ;;  %v1932_v23 = vadd.f32 %v4923_v19, %v1837_v51  ;;  %v1926_v54 = vpop.f32.mrb[23].mxu0  ;;  %v7006_v27 = vsub.s32 7, %v5821_v29 }
 0xa1c   :  { %v1948_v45 = vadd.f32 %v1944_v58, %v1922_v22  ;;  %v1927_v30 = vadd.f32 %v1926_v54, %v1837_v51 }
 0xa1d   :  { %v1947_v2 = vadd.f32 %v1943_v55, %v1917_v0  ;;  %v1938_v47 = vmul.f32 %v1932_v23, %v1932_v23 }
 0xa1e   :  { %v1952_v43 = vmul.f32 0.7978846, %v1948_v45  ;;  %v1937_v37 = vmul.f32 %v1927_v30, %v1927_v30 }
 0xa1f   :  { %v1951_v10 = vmul.f32 0.7978846, %v1947_v2  ;;  %v1942_v36 = vmul.f32 %v1938_v47, %v1932_v23 }
 0xa20   :  { %5612 = vtanh.f32 %v1952_v43  ;;  %v1941_v39 = vmul.f32 %v1937_v37, %v1927_v30 }
 0xa21   :  { %5614 = vtanh.f32 %v1951_v10  ;;  %v1946_v35 = vmul.f32 0.044715, %v1942_v36 }
 0xa22   :  { %v1945_v4 = vmul.f32 0.044715, %v1941_v39 }
 0xa23   :  { %v1950_v1 = vadd.f32 %v1946_v35, %v1932_v23 }
 0xa24   :  { %v1949_v49 = vadd.f32 %v1945_v4, %v1927_v30 }
 0xa25   :  { %v1954_v8 = vmul.f32 0.7978846, %v1950_v1 }
 0xa26   :  { %v1953_v61 = vmul.f32 0.7978846, %v1949_v49 }
 0xa27   :  { %5616 = vtanh.f32 %v1954_v8 }
 0xa28   :  { %5618 = vtanh.f32 %v1953_v61 }
 0xa2a   :  { %v5613_v48 = vpop.eup %5612 }
 0xa2b   :  { %v5615_v6 = vpop.eup %5614  ;;  %v1960_v44 = vadd.f32 1.0, %v5613_v48 }
 0xa2c   :  { %v1959_v26 = vadd.f32 1.0, %v5615_v6 }
 0xa2d   :  { %v1964_v15 = vmul.f32 0.5, %v1960_v44 }
 0xa2e   :  { %v1963_v5 = vmul.f32 0.5, %v1959_v26 }
 0xa2f   :  { %v1968_v31 = vmul.f32 %v1964_v15, %v1922_v22  ;;  %v1974_v22 = vrot.slane %v6290_v42, %v7006_v27 }
 0xa30   :  { %v1967_v34 = vmul.f32 %v1963_v5, %v1917_v0 }
 0xa31   :  { %v5617_v62 = vpop.eup %5616 }
 0xa32   :  { %v5619_v21 = vpop.eup %5618  ;;  %4940 = vmatprep.mubr.msk.f32.mxu1 %vm1975_vm8, %v1967_v34  ;;  %v1962_v51 = vadd.f32 1.0, %v5617_v62 }
 0xa33   :  { %4941 = vmatmul.mubr.msk.f32.vlgmr.msra.gmra.mrb[16].mxu1 %vm1975_vm8, %v1968_v31  ;;  %v1961_v63 = vadd.f32 1.0, %v5619_v21 }
 0xa34   :  { %v1966_v28 = vmul.f32 0.5, %v1962_v51 }
 0xa35   :  { %v1965_v41 = vmul.f32 0.5, %v1961_v63 }
 0xa36   :  { %v1970_v52 = vmul.f32 %v1966_v28, %v1932_v23 }
 0xa37   :  { %v1969_v25 = vmul.f32 %v1965_v41, %v1927_v30 }
 0xa39   :  { %4943 = vmatprep.mubr.msk.f32.mxu1 %vm1975_vm8, %v1969_v25 }
 0xa3a   :  { %4944 = vmatmul.mubr.msk.f32.gmra.mrb[18].mxu1 %vm1975_vm8, %v1970_v52 }
 0xb06   :  { %v4942_v0 = vpop.f32.mrb[16].mxu1 }
 0xb07   :  { %v2060_v58 = vadd.f32 %v4942_v0, %v1974_v22  ;;  %v2054_v19 = vpop.f32.mrb[17].mxu1 }
 0xb08   :  { %v2055_v55 = vadd.f32 %v2054_v19, %v1974_v22 }
 0xb09   :  { %v2074_v54 = vadd.f32 %v2060_v58, %v6300_v17 }
 0xb0a   :  { %v2073_v45 = vadd.f32 %v2055_v55, %v6298_v59 }
 0xb0b   :  { %v2080_v23 = vsel %vm374_vm6, %v2074_v54, 0.0 }
 0xb0c   :  { %2081 = vadd.xlane.f32.xlu0 %v2080_v23  ;;  %v2077_v30 = vsel %vm374_vm6, %v2073_v45, 0.0 }
 0xb0d   :  { %2078 = vadd.xlane.f32.xlu1 %v2077_v30  ;;  %v4945_v2 = vpop.f32.mrb[18].mxu1 }
 0xb0e   :  { %v2070_v47 = vadd.f32 %v4945_v2, %v1974_v22  ;;  %v2064_v43 = vpop.f32.mrb[19].mxu1 }
 0xb0f   :  { %v2065_v37 = vadd.f32 %v2064_v43, %v1974_v22 }
 0xb10   :  { %v2076_v42 = vadd.f32 %v2070_v47, %v6310_v50 }
 0xb11   :  { %v2075_v10 = vadd.f32 %v2065_v37, %v6306_v60 }
 0xb12   :  { %v2086_v36 = vsel %vm374_vm6, %v2076_v42, 0.0 }
 0xb13   :  { %2087 = vadd.xlane.f32.xlu0 %v2086_v36  ;;  %v2083_v17 = vsel %vm374_vm6, %v2075_v10, 0.0 }
 0xb14   :  { %2084 = vadd.xlane.f32.xlu1 %v2083_v17 }
 0xb99   :  { %v2082_v59 = vpop.xlane.xlu0 %2081 }
 0xb9a   :  { %v2090_v39 = vmul.f32 0.03125, %v2082_v59  ;;  %v2079_v35 = vpop.xlane.xlu1 %2078 }
 0xb9b   :  { %v2089_v4 = vmul.f32 0.03125, %v2079_v35 }
 0xb9c   :  { %v2094_v1 = vsub.f32 %v2074_v54, %v2090_v39 }
 0xb9d   :  { %v2093_v49 = vsub.f32 %v2073_v45, %v2089_v4  ;;  %v373_v45 = vld [vmem:[%s7004_s2 + $0x88] sm:$0x3] }
 0xb9e   :  { %v2098_v8 = vmul.f32 %v2094_v1, %v2094_v1  ;;  %v2132_v23 = vrot.slane %v373_v45, %v5877_v53  ;;  %v2140_v43 = vrot.slane %v373_v45, %v5835_v33  ;;  %v6378_v45 = vld [vmem:[%s7003_s1 + $0x20] sm:$0xff] }
 0xb9f   :  { %v2097_v61 = vmul.f32 %v2093_v49, %v2093_v49 }
 0xba0   :  { %v2088_v48 = vpop.xlane.xlu0 %2087  ;;  %v2104_v6 = vsel %vm374_vm6, %v2098_v8, 0.0 }
 0xba1   :  { %v2092_v50 = vmul.f32 0.03125, %v2088_v48  ;;  %v2085_v44 = vpop.xlane.xlu1 %2084  ;;  %2105 = vadd.xlane.f32.xlu0 %v2104_v6  ;;  %v2101_v60 = vsel %vm374_vm6, %v2097_v61, 0.0 }
 0xba2   :  { %v2091_v26 = vmul.f32 0.03125, %v2085_v44  ;;  %2102 = vadd.xlane.f32.xlu1 %v2101_v60 }
 0xba3   :  { %v2096_v15 = vsub.f32 %v2076_v42, %v2092_v50 }
 0xba4   :  { %v2095_v5 = vsub.f32 %v2075_v10, %v2091_v26 }
 0xba5   :  { %v2100_v34 = vmul.f32 %v2096_v15, %v2096_v15 }
 0xba6   :  { %v2099_v62 = vmul.f32 %v2095_v5, %v2095_v5 }
 0xba7   :  { %v2110_v31 = vsel %vm374_vm6, %v2100_v34, 0.0 }
 0xba8   :  { %2111 = vadd.xlane.f32.xlu0 %v2110_v31  ;;  %v2107_v21 = vsel %vm374_vm6, %v2099_v62, 0.0 }
 0xba9   :  { %2108 = vadd.xlane.f32.xlu1 %v2107_v21 }
 0xc2e   :  { %v2106_v51 = vpop.xlane.xlu0 %2105 }
 0xc2f   :  { %v2114_v63 = vmul.f32 0.03125, %v2106_v51  ;;  %v2103_v28 = vpop.xlane.xlu1 %2102 }
 0xc30   :  { %v2113_v41 = vmul.f32 0.03125, %v2103_v28 }
 0xc31   :  { %v2118_v25 = vadd.f32 1e-05, %v2114_v63 }
 0xc32   :  { %v2117_v52 = vadd.f32 1e-05, %v2113_v41 }
 0xc33   :  { %5620 = vrsqrt.f32 %v2118_v25 }
 0xc34   :  { %5622 = vrsqrt.f32 %v2117_v52 }
 0xc35   :  { %v2112_v22 = vpop.xlane.xlu0 %2111 }
 0xc36   :  { %v2116_v0 = vmul.f32 0.03125, %v2112_v22  ;;  %v2109_v58 = vpop.xlane.xlu1 %2108 }
 0xc37   :  { %v2115_v19 = vmul.f32 0.03125, %v2109_v58 }
 0xc38   :  { %v2120_v55 = vadd.f32 1e-05, %v2116_v0 }
 0xc39   :  { %v2119_v54 = vadd.f32 1e-05, %v2115_v19 }
 0xc3a   :  { %5624 = vrsqrt.f32 %v2120_v55 }
 0xc3b   :  { %5626 = vrsqrt.f32 %v2119_v54 }
 0xc3d   :  { %v5621_v30 = vpop.eup %5620 }
 0xc3e   :  { %v5623_v2 = vpop.eup %5622  ;;  %v2126_v47 = vmul.f32 %v5621_v30, %v2094_v1 }
 0xc3f   :  { %v2125_v37 = vmul.f32 %v5623_v2, %v2093_v49  ;;  %v6390_v2 = vld [vmem:[%s7003_s1 + $0x30] sm:$0xff] }
 0xc40   :  { %v2134_v42 = vmul.f32 %v2132_v23, %v2126_v47  ;;  %v6395_v47 = vld [vmem:[%s7003_s1 + $0x38] sm:$0xff] }
 0xc41   :  { %v2133_v10 = vmul.f32 %v2132_v23, %v2125_v37 }
 0xc42   :  { %v2142_v36 = vadd.f32 %v2140_v43, %v2134_v42 }
 0xc43   :  { %v2141_v17 = vadd.f32 %v2140_v43, %v2133_v10  ;;  %v6406_v10 = vld [vmem:[%s7004_s2 + $0x90] sm:$0xff] }
 0xc44   :  { %v5625_v59 = vpop.eup %5624  ;;  %v2148_v39 = vsel %vm374_vm6, %v2142_v36, 0.0 }
 0xc45   :  { %v5627_v35 = vpop.eup %5626  ;;  %2149 = vadd.xlane.f32.xlu0 %v2148_v39  ;;  %v2145_v4 = vsel %vm374_vm6, %v2141_v17, 0.0  ;;  %v2128_v8 = vmul.f32 %v5625_v59, %v2096_v15 }
 0xc46   :  { %2146 = vadd.xlane.f32.xlu1 %v2145_v4  ;;  %v2127_v61 = vmul.f32 %v5627_v35, %v2095_v5 }
 0xc47   :  { %v2136_v48 = vmul.f32 %v2132_v23, %v2128_v8 }
 0xc48   :  { %v2135_v6 = vmul.f32 %v2132_v23, %v2127_v61  ;;  %v6383_v23 = vld [vmem:[%s7003_s1 + $0x28] sm:$0xff] }
 0xc49   :  { %v2144_v1 = vadd.f32 %v2140_v43, %v2136_v48  ;;  %v5262_v30 = vpack.c.bf16 %v6383_v23, %v6378_v45 }
 0xc4a   :  { %v2143_v50 = vadd.f32 %v2140_v43, %v2135_v6  ;;  %v5266_v43 = vpack.c.bf16 %v6395_v47, %v6390_v2 }
 0xc4b   :  { %v2154_v49 = vsel %vm374_vm6, %v2144_v1, 0.0  ;;  %5263 = vmatprep.subr.bf16.mxu0 %v5262_v30 }
 0xc4c   :  { %2155 = vadd.xlane.f32.xlu0 %v2154_v49  ;;  %v2151_v44 = vsel %vm374_vm6, %v2143_v50, 0.0  ;;  %5265 = vmatpush3.bf16.msra.mxu0 %v5262_v30  ;;  %v347_v49 = vld [vmem:[%s7004_s2 + $0xa0] sm:$0xf] }
 0xc4d   :  { %2152 = vadd.xlane.f32.xlu1 %v2151_v44  ;;  %5267 = vmatprep.subr.bf16.mxu0 %v5266_v43 }
 0xc50   :  { %5269 = vmatpush3.bf16.msra.mxu0 %v5266_v43 }
 0xcd2   :  { %v2150_v60 = vpop.xlane.xlu0 %2149 }
 0xcd3   :  { %v2158_v26 = vmul.f32 0.03125, %v2150_v60  ;;  %v2147_v34 = vpop.xlane.xlu1 %2146  ;;  %v2200_v60 = vrot.slane %v347_v49, %v5877_v53 }
 0xcd4   :  { %v2157_v62 = vmul.f32 0.03125, %v2147_v34 }
 0xcd5   :  { %v2162_v31 = vsub.f32 %v2142_v36, %v2158_v26  ;;  %v2347_v36 = vrot.slane %v6406_v10, %v5835_v33 }
 0xcd6   :  { %v2161_v21 = vsub.f32 %v2141_v17, %v2157_v62  ;;  %v2208_v62 = vrot.slane %v347_v49, %v5835_v33 }
 0xcd7   :  { %v2166_v51 = vmul.f32 %v2162_v31, %v2162_v31 }
 0xcd8   :  { %v2165_v15 = vmul.f32 %v2161_v21, %v2161_v21 }
 0xcd9   :  { %v2156_v63 = vpop.xlane.xlu0 %2155  ;;  %v2172_v5 = vsel %vm374_vm6, %v2166_v51, 0.0 }
 0xcda   :  { %v2160_v28 = vmul.f32 0.03125, %v2156_v63  ;;  %v2153_v41 = vpop.xlane.xlu1 %2152  ;;  %2173 = vadd.xlane.f32.xlu0 %v2172_v5  ;;  %v2169_v25 = vsel %vm374_vm6, %v2165_v15, 0.0 }
 0xcdb   :  { %v2159_v52 = vmul.f32 0.03125, %v2153_v41  ;;  %2170 = vadd.xlane.f32.xlu1 %v2169_v25  ;;  %v2213_v41 = vld [vmem:[%s7004_s2 + $0x20] sm:$0xff] }
 0xcdc   :  { %v2164_v22 = vsub.f32 %v2144_v1, %v2160_v28 }
 0xcdd   :  { %v2163_v0 = vsub.f32 %v2143_v50, %v2159_v52  ;;  %v2214_v52 = vld [vmem:[%s7004_s2 + $0x28] sm:$0xff] }
 0xcde   :  { %v2168_v58 = vmul.f32 %v2164_v22, %v2164_v22 }
 0xcdf   :  { %v2167_v19 = vmul.f32 %v2163_v0, %v2163_v0 }
 0xce0   :  { %v2178_v55 = vsel %vm374_vm6, %v2168_v58, 0.0 }
 0xce1   :  { %2179 = vadd.xlane.f32.xlu0 %v2178_v55  ;;  %v2175_v54 = vsel %vm374_vm6, %v2167_v19, 0.0 }
 0xce2   :  { %2176 = vadd.xlane.f32.xlu1 %v2175_v54 }
 0xcf3   :  { %2349 = vrot.lane.b32.xlu1 %v2347_v36, %s5741_s6  ;;  %v2215_v36 = vld [vmem:[%s7004_s2 + $0x30] sm:$0xff] }
 0xd67   :  { %v2174_v17 = vpop.xlane.xlu0 %2173 }
 0xd68   :  { %v2182_v59 = vmul.f32 0.03125, %v2174_v17  ;;  %v2171_v39 = vpop.xlane.xlu1 %2170 }
 0xd69   :  { %v2181_v35 = vmul.f32 0.03125, %v2171_v39 }
 0xd6a   :  { %v2186_v4 = vadd.f32 1e-05, %v2182_v59 }
 0xd6b   :  { %v2185_v8 = vadd.f32 1e-05, %v2181_v35  ;;  %v2339_v35 = vrot.slane %v6406_v10, %v5877_v53 }
 0xd6c   :  { %5628 = vrsqrt.f32 %v2186_v4 }
 0xd6d   :  { %5630 = vrsqrt.f32 %v2185_v8 }
 0xd6e   :  { %v2180_v61 = vpop.xlane.xlu0 %2179 }
 0xd6f   :  { %v2184_v48 = vmul.f32 0.03125, %v2180_v61  ;;  %v2177_v6 = vpop.xlane.xlu1 %2176 }
 0xd70   :  { %v2183_v1 = vmul.f32 0.03125, %v2177_v6 }
 0xd71   :  { %v2188_v50 = vadd.f32 1e-05, %v2184_v48 }
 0xd72   :  { %v2187_v44 = vadd.f32 1e-05, %v2183_v1 }
 0xd73   :  { %5632 = vrsqrt.f32 %v2188_v50  ;;  %v2350_v4 = vpop.permute.xlu1 %2349 }
 0xd74   :  { %5634 = vrsqrt.f32 %v2187_v44 }
 0xd76   :  { %v5629_v26 = vpop.eup %5628 }
 0xd77   :  { %v5631_v34 = vpop.eup %5630  ;;  %v2194_v51 = vmul.f32 %v5629_v26, %v2162_v31  ;;  %v2359_v26 = vrot.slane %v6406_v10, %v5832_v32 }
 0xd78   :  { %v2193_v15 = vmul.f32 %v5631_v34, %v2161_v21 }
 0xd79   :  { %v2202_v63 = vmul.f32 %v2200_v60, %v2194_v51 }
 0xd7a   :  { %v2201_v5 = vmul.f32 %v2200_v60, %v2193_v15 }
 0xd7b   :  { %v2210_v28 = vadd.f32 %v2208_v62, %v2202_v63 }
 0xd7c   :  { %v2209_v25 = vadd.f32 %v2208_v62, %v2201_v5 }
 0xd7d   :  { %v5633_v58 = vpop.eup %5632  ;;  %v6424_v31 = vadd.f32 %v2214_v52, %v2210_v28 }
 0xd7e   :  { %v5635_v19 = vpop.eup %5634  ;;  %v2196_v55 = vmul.f32 %v5633_v58, %v2164_v22  ;;  %v6422_v54 = vadd.f32 %v2213_v41, %v2209_v25  ;;  %v2216_v22 = vld [vmem:[%s7004_s2 + $0x38] sm:$0xff] }
 0xd7f   :  { %v2195_v30 = vmul.f32 %v5635_v19, %v2163_v0 }
 0xd80   :  { %4954 = vmatprep.mubr.msk.f32.mxu0 %vm374_vm6, %v6422_v54  ;;  %v2204_v21 = vmul.f32 %v2200_v60, %v2196_v55 }
 0xd81   :  { %4955 = vmatmul.mubr.msk.f32.vlgmr.msra.gmra.mrb[24].mxu0 %vm374_vm6, %v6424_v31  ;;  %v2203_v43 = vmul.f32 %v2200_v60, %v2195_v30 }
 0xd82   :  { %v2212_v17 = vadd.f32 %v2208_v62, %v2204_v21 }
 0xd83   :  { %v2211_v59 = vadd.f32 %v2208_v62, %v2203_v43 }
 0xd84   :  { %v6438_v39 = vadd.f32 %v2216_v22, %v2212_v17 }
 0xd85   :  { %v6436_v0 = vadd.f32 %v2215_v36, %v2211_v59 }
 0xd87   :  { %4957 = vmatprep.mubr.msk.f32.mxu0 %vm374_vm6, %v6436_v0 }
 0xd88   :  { %4958 = vmatmul.mubr.msk.f32.gmra.mrb[26].mxu0 %vm374_vm6, %v6438_v39 }
 0xe54   :  { %v4956_v8 = vpop.f32.mrb[24].mxu0 }
 0xe55   :  { %v6446_v61 = vadd.f32 %v4956_v8, %v2339_v35  ;;  %v2353_v48 = vadd.f32 %v4956_v8, %v2350_v4  ;;  %v2317_v6 = vpop.f32.mrb[25].mxu0 }
 0xe56   :  { %v6448_v1 = vadd.f32 %v2339_v35, %v2317_v6  ;;  %v2352_v50 = vadd.f32 %v2350_v4, %v2317_v6 }
 0xe58   :  { %v5475_v49 = vpack.i.bf16 %v2353_v48, %v2352_v50  ;;  %v2368_v44 = vmul.f32 %v6448_v1, %v5882_v56  ;;  %v2545_v60 = vmul.f32 %v6448_v1, %v5885_v57 }
 0xe5a   :  { %5476 = vrot.lane.b32.xlu0 %v5475_v49, %s5742_s13  ;;  %4968 = vmatprep.mubr.msk.f32.mxu0 %vm374_vm6, %v2368_v44 }
 0xe5b   :  { %4982 = vmatprep.mubr.msk.f32.mxu1 %vm374_vm6, %v2545_v60  ;;  %v4959_v34 = vpop.f32.mrb[26].mxu0 }
 0xe5c   :  { %v6459_v62 = vadd.f32 %v4959_v34, %v2339_v35  ;;  %v2355_v51 = vadd.f32 %v4959_v34, %v2350_v4  ;;  %v2327_v15 = vpop.f32.mrb[27].mxu0 }
 0xe5d   :  { %v6461_v63 = vadd.f32 %v2339_v35, %v2327_v15  ;;  %v2354_v5 = vadd.f32 %v2350_v4, %v2327_v15 }
 0xe5e   :  { %2361 = vrot.lane.b32.xlu0 %v2359_v26, %s5740_s5 }
 0xe5f   :  { %v5480_v28 = vpack.i.bf16 %v2355_v51, %v2354_v5 }
 0xe61   :  { %5481 = vrot.lane.b32.xlu1 %v5480_v28, %s5742_s13 }
 0xecc   :  { %v5477_v41 = vpop.permute.xlu0 %5476 }
 0xecd   :  { %v5479_v25 = vunpack.i.h.bf16 %v5477_v41  ;;  %v5478_v52 = vunpack.i.l.bf16 %v5477_v41 }
 0xecf   :  { %v6465_v58 = vpack.c.bf16 %v5479_v25, %v5478_v52 }
 0xed0   :  { %v2362_v19 = vpop.permute.xlu0 %2361 }
 0xed1   :  { %v2364_v55 = vadd.f32 %v2362_v19, %v2317_v6  ;;  %v2365_v30 = vadd.f32 %v4956_v8, %v2362_v19  ;;  %v2366_v21 = vadd.f32 %v2362_v19, %v2327_v15  ;;  %v2367_v43 = vadd.f32 %v4959_v34, %v2362_v19  ;;  %5272 = vmatprep.subr.msk.bf16.mxu0 %vm5917_vm7, %v6465_v58 }
 0xed2   :  { %5284 = vmatprep.subr.msk.bf16.mxu1 %vm5917_vm7, %v6465_v58  ;;  %5275 = vmatpush3.bf16.xpose.msk.msra.mxu0 %vm5917_vm7, %v6465_v58 }
 0xed3   :  { %5287 = vmatpush3.bf16.xpose.msk.msra.mxu1 %vm5917_vm7, %v6465_v58  ;;  %v5482_v36 = vpop.permute.xlu1 %5481  ;;  %v2698_v17 = vmul.f32 %v2364_v55, %v5937_v38  ;;  %v2699_v59 = vmul.f32 %v2365_v30, %v5937_v38  ;;  %v6482_v22 = vmul.f32 %v2364_v55, %v5951_v46  ;;  %v6485_v35 = vmul.f32 %v2365_v30, %v5951_v46 }
 0xed4   :  { %v5484_v4 = vunpack.i.h.bf16 %v5482_v36  ;;  %v5483_v8 = vunpack.i.l.bf16 %v5482_v36  ;;  %v6488_v48 = vmul.f32 %v2366_v21, %v5937_v38  ;;  %v6491_v6 = vmul.f32 %v2367_v43, %v5937_v38 }
 0xed5   :  { %v5485_v50 = vpack.i.bf16 %v2699_v59, %v2698_v17  ;;  %v5495_v49 = vpack.i.bf16 %v6485_v35, %v6482_v22  ;;  %v6496_v44 = vmul.f32 %v2364_v55, %v6022_v11  ;;  %v6499_v60 = vmul.f32 %v2365_v30, %v6022_v11 }
 0xed6   :  { %v5276_v26 = vpack.c.bf16 %v5484_v4, %v5483_v8  ;;  %v5490_v34 = vpack.i.bf16 %v6491_v6, %v6488_v48  ;;  %v6504_v51 = vmul.f32 %v2366_v21, %v5951_v46  ;;  %v6507_v38 = vmul.f32 %v2367_v43, %v5951_v46 }
 0xed7   :  { %5486 = vrot.lane.b32.xlu1 %v5485_v50, %s5740_s5  ;;  %v5505_v15 = vpack.i.bf16 %v6499_v60, %v6496_v44  ;;  %v6513_v5 = vmul.f32 %v2364_v55, %v6024_v14  ;;  %v6516_v28 = vmul.f32 %v2365_v30, %v6024_v14  ;;  %v6519_v41 = vmul.f32 %v2366_v21, %v6022_v11 }
 0xed8   :  { %5278 = vmatprep.subr.msk.bf16.mxu0 %vm5917_vm7, %v5276_v26  ;;  %5290 = vmatprep.subr.msk.bf16.mxu1 %vm5917_vm7, %v5276_v26  ;;  %v5500_v46 = vpack.i.bf16 %v6507_v38, %v6504_v51  ;;  %v6528_v25 = vmul.f32 %v2367_v43, %v6022_v11  ;;  %v6531_v52 = vmul.f32 %v2366_v21, %v6024_v14 }
 0xed9   :  { %v5515_v19 = vpack.i.bf16 %v6516_v28, %v6513_v5  ;;  %v6536_v55 = vmul.f32 %v2367_v43, %v6024_v14  ;;  %v2369_v14 = vmul.f32 %v6446_v61, %v5882_v56  ;;  %v2546_v21 = vmul.f32 %v6446_v61, %v5885_v57 }
 0xeda   :  { %5281 = vmatpush3.bf16.xpose.msk.msra.mxu0 %vm5917_vm7, %v5276_v26  ;;  %v2370_v43 = vmul.f32 %v6461_v63, %v5882_v56  ;;  %v2547_v36 = vmul.f32 %v6461_v63, %v5885_v57  ;;  %v2371_v17 = vmul.f32 %v6459_v62, %v5882_v56  ;;  %v2548_v59 = vmul.f32 %v6459_v62, %v5885_v57 }
 0xedb   :  { %5293 = vmatpush3.bf16.xpose.msk.msra.mxu1 %vm5917_vm7, %v5276_v26  ;;  %v2928_v4 = vmul.f32 %v6448_v1, %v5847_v40  ;;  %v2929_v56 = vmul.f32 %v6446_v61, %v5847_v40  ;;  %v2930_v57 = vmul.f32 %v6461_v63, %v5847_v40  ;;  %v2931_v8 = vmul.f32 %v6459_v62, %v5847_v40 }
 0xedc   :  { %5312 = vmatprep.subr.msk.bf16.mxu1 %vm5917_vm7, %v6465_v58  ;;  %v3202_v50 = vmul.f32 %v6448_v1, %v5911_v13  ;;  %v3205_v40 = vmul.f32 %v6459_v62, %v5911_v13  ;;  %v342_v62 = vld [vmem:[%s7004_s2 + $0x60] sm:$0xff]  ;;  %v7014_v28 = vpack.i.bf16 %v6528_v25, %v6519_v41 }
 0xee1   :  { %4969 = vmatmul.mubr.msk.f32.vlgmr.msra.gmra.mrb[28].mxu0 %vm374_vm6, %v2369_v14  ;;  %v3203_v14 = vmul.f32 %v6446_v61, %v5911_v13  ;;  %v6611_v61 = vld [vmem:[%s7004_s2 + $0x68] sm:$0xff] }
 0xee2   :  { %4983 = vmatmul.mubr.msk.f32.vlgmr.msra.gmra.mrb[20].mxu1 %vm374_vm6, %v2546_v21  ;;  %4971 = vmatprep.mubr.msk.f32.mxu0 %vm374_vm6, %v2370_v43 }
 0xee3   :  { %4985 = vmatprep.mubr.msk.f32.mxu1 %vm374_vm6, %v2547_v36  ;;  %5315 = vmatpush3.bf16.xpose.msk.msra.mxu1 %vm5917_vm7, %v6465_v58 }
 0xee4   :  { %5318 = vmatprep.subr.msk.bf16.mxu1 %vm5917_vm7, %v5276_v26 }
 0xee5   :  { %4972 = vmatmul.mubr.msk.f32.gmra.mrb[30].mxu0 %vm374_vm6, %v2371_v17 }
 0xee6   :  { %4986 = vmatmul.mubr.msk.f32.gmra.mrb[22].mxu1 %vm374_vm6, %v2548_v59 }
 0xee7   :  { %5024 = vmatprep.mubr.msk.f32.mxu1 %vm374_vm6, %v2928_v4 }
 0xeeb   :  { %5321 = vmatpush3.bf16.xpose.msk.msra.mxu1 %vm5917_vm7, %v5276_v26 }
 0xeec   :  { %5332 = vmatprep.subr.msk.bf16.mxu1 %vm5917_vm7, %v6465_v58 }
 0xef2   :  { %5025 = vmatmul.mubr.msk.f32.vlgmr.msra.gmra.mrb[24].mxu1 %vm374_vm6, %v2929_v56 }
 0xef3   :  { %5027 = vmatprep.mubr.msk.f32.mxu1 %vm374_vm6, %v2930_v57  ;;  %5335 = vmatpush3.bf16.xpose.msk.msra.mxu1 %vm5917_vm7, %v6465_v58  ;;  %v3204_v58 = vmul.f32 %v6461_v63, %v5911_v13 }
 0xef4   :  { %5338 = vmatprep.subr.msk.bf16.mxu1 %vm5917_vm7, %v5276_v26 }
 0xef6   :  { %5028 = vmatmul.mubr.msk.f32.gmra.mrb[26].mxu1 %vm374_vm6, %v2931_v8 }
 0xef7   :  { %5052 = vmatprep.mubr.msk.f32.mxu1 %vm374_vm6, %v3202_v50 }
 0xefb   :  { %5341 = vmatpush3.bf16.xpose.msk.msra.mxu1 %vm5917_vm7, %v5276_v26 }
 0xf02   :  { %5053 = vmatmul.mubr.msk.f32.vlgmr.msra.gmra.mrb[28].mxu1 %vm374_vm6, %v3203_v14 }
 0xf03   :  { %5055 = vmatprep.mubr.msk.f32.mxu1 %vm374_vm6, %v3204_v58 }
 0xf06   :  { %5056 = vmatmul.mubr.msk.f32.gmra.mrb[30].mxu1 %vm374_vm6, %v3205_v40 }
 0xf49   :  { %v5487_v1 = vpop.permute.xlu1 %5486 }
 0xf4a   :  { %v5489_v21 = vunpack.i.h.bf16 %v5487_v1  ;;  %v5488_v43 = vunpack.i.l.bf16 %v5487_v1 }
 0xf4c   :  { %v5294_v18 = vpack.c.bf16 %v5489_v21, %v5488_v43 }
 0xf4e   :  { %5295 = vmatprep.subr.bf16.mxu0 %v5294_v18 }
 0xf4f   :  { %5297 = vmatpush3.bf16.msra.mxu0 %v5294_v18 }
 0xfb4   :  { %v4970_v26 = vpop.f32.mrb[28].mxu0 }
 0xfb5   :  { %v2490_v63 = vmul.f32 0.35355338, %v4970_v26  ;;  %v4984_v36 = vpop.f32.mrb[20].mxu1  ;;  %v2470_v17 = vpop.f32.mrb[29].mxu0 }
 0xfb6   :  { %v2647_v59 = vmul.f32 0.35355338, %v4984_v36  ;;  %v2489_v4 = vmul.f32 0.35355338, %v2470_v17  ;;  %v2627_v13 = vpop.f32.mrb[21].mxu1  ;;  %v344_v17 = vld [vmem:[%s7004_s2 + $0x70] sm:$0xff] }
 0xfb7   :  { %v2646_v56 = vmul.f32 0.35355338, %v2627_v13  ;;  %v6617_v57 = vadd.f32 %v2490_v63, %v6611_v61  ;;  %v345_v63 = vld [vmem:[%s7004_s2 + $0x78] sm:$0xff] }
 0xfb8   :  { %v4973_v8 = vpop.f32.mrb[30].mxu0  ;;  %v6620_v50 = vadd.f32 %v2647_v59, %v6611_v61  ;;  %v6628_v26 = vadd.f32 %v2489_v4, %v342_v62 }
 0xfb9   :  { %v4987_v14 = vpop.f32.mrb[22].mxu1  ;;  %v2480_v58 = vpop.f32.mrb[31].mxu0  ;;  %v2500_v40 = vsel %vm374_vm6, %v6617_v57, -inf  ;;  %v6624_v1 = vadd.f32 %v2646_v56, %v342_v62  ;;  %v2492_v59 = vmul.f32 0.35355338, %v4973_v8 }
 0xfba   :  { %v2649_v21 = vmul.f32 0.35355338, %v4987_v14  ;;  %v2637_v43 = vpop.f32.mrb[23].mxu1  ;;  %v2657_v18 = vsel %vm374_vm6, %v6620_v50, -inf  ;;  %2501 = vmax.xlane.f32.xlu1 %v2500_v40  ;;  %v2491_v14 = vmul.f32 0.35355338, %v2480_v58 }
 0xfbb   :  { %v2648_v36 = vmul.f32 0.35355338, %v2637_v43  ;;  %2658 = vmax.xlane.f32.xlu0 %v2657_v18  ;;  %v2654_v13 = vsel %vm374_vm6, %v6624_v1, -inf  ;;  %v2497_v4 = vsel %vm374_vm6, %v6628_v26, -inf  ;;  %v6646_v18 = vadd.f32 %v2492_v59, %v345_v63 }
 0xfbc   :  { %v6638_v56 = vadd.f32 %v2649_v21, %v345_v63  ;;  %v6650_v27 = vadd.f32 %v2491_v14, %v344_v17 }
 0xfbd   :  { %v6642_v40 = vadd.f32 %v2648_v36, %v344_v17  ;;  %v2506_v21 = vsel %vm374_vm6, %v6646_v18, -inf }
 0xfbe   :  { %2655 = vmax.xlane.f32.xlu1 %v2654_v13  ;;  %v2663_v43 = vsel %vm374_vm6, %v6638_v56, -inf }
 0xfbf   :  { %2498 = vmax.xlane.f32.xlu0 %v2497_v4  ;;  %v2660_v8 = vsel %vm374_vm6, %v6642_v40, -inf  ;;  %v2503_v4 = vsel %vm374_vm6, %v6650_v27, -inf }
 0xfc2   :  { %2664 = vmax.xlane.f32.xlu1 %v2663_v43 }
 0xfc3   :  { %2661 = vmax.xlane.f32.xlu0 %v2660_v8 }
 0xfc5   :  { %v5026_v58 = vpop.f32.mrb[24].mxu1 }
 0xfc6   :  { %v3030_v13 = vmul.f32 0.35355338, %v5026_v58  ;;  %v3010_v36 = vpop.f32.mrb[25].mxu1  ;;  %2507 = vmax.xlane.f32.xlu1 %v2506_v21 }
 0xfc7   :  { %v3029_v9 = vmul.f32 0.35355338, %v3010_v36  ;;  %2504 = vmax.xlane.f32.xlu0 %v2503_v4 }
 0xfc8   :  { %v6657_v59 = vadd.f32 %v3030_v13, %v6611_v61 }
 0xfc9   :  { %v5029_v43 = vpop.f32.mrb[26].mxu1  ;;  %v6659_v24 = vadd.f32 %v3029_v9, %v342_v62 }
 0xfca   :  { %v3032_v14 = vmul.f32 0.35355338, %v5029_v43  ;;  %v3020_v8 = vpop.f32.mrb[27].mxu1  ;;  %v3040_v20 = vsel %vm374_vm6, %v6657_v59, -inf }
 0xfcb   :  { %v3031_v7 = vmul.f32 0.35355338, %v3020_v8  ;;  %3041 = vmax.xlane.f32.xlu1 %v3040_v20  ;;  %v3037_v58 = vsel %vm374_vm6, %v6659_v24, -inf }
 0xfcc   :  { %v6665_v21 = vadd.f32 %v3032_v14, %v345_v63  ;;  %3038 = vmax.xlane.f32.xlu0 %v3037_v58 }
 0xfcd   :  { %v6667_v36 = vadd.f32 %v3031_v7, %v344_v17 }
 0xfce   :  { %v3046_v13 = vsel %vm374_vm6, %v6665_v21, -inf }
 0xfcf   :  { %3047 = vmax.xlane.f32.xlu1 %v3046_v13  ;;  %v3043_v9 = vsel %vm374_vm6, %v6667_v36, -inf }
 0xfd0   :  { %3044 = vmax.xlane.f32.xlu0 %v3043_v9 }
 0xfd5   :  { %v5054_v4 = vpop.f32.mrb[28].mxu1 }
 0xfd6   :  { %v3304_v43 = vmul.f32 0.35355338, %v5054_v4  ;;  %v3284_v8 = vpop.f32.mrb[29].mxu1 }
 0xfd7   :  { %v3303_v20 = vmul.f32 0.35355338, %v3284_v8 }
 0xfd8   :  { %v6674_v42 = vadd.f32 %v3304_v43, %v6611_v61 }
 0xfd9   :  { %v5057_v14 = vpop.f32.mrb[30].mxu1  ;;  %v6676_v37 = vadd.f32 %v3303_v20, %v342_v62 }
 0xfda   :  { %v3306_v7 = vmul.f32 0.35355338, %v5057_v14  ;;  %v3294_v58 = vpop.f32.mrb[31].mxu1  ;;  %v3314_v11 = vsel %vm374_vm6, %v6674_v42, -inf }
 0xfdb   :  { %v3305_v13 = vmul.f32 0.35355338, %v3294_v58  ;;  %3315 = vmax.xlane.f32.xlu1 %v3314_v11  ;;  %v3311_v9 = vsel %vm374_vm6, %v6676_v37, -inf }
 0xfdc   :  { %v6682_v30 = vadd.f32 %v3306_v7, %v345_v63  ;;  %3312 = vmax.xlane.f32.xlu0 %v3311_v9 }
 0xfdd   :  { %v6684_v4 = vadd.f32 %v3305_v13, %v344_v17 }
 0xfde   :  { %v3320_v11 = vsel %vm374_vm6, %v6682_v30, -inf }
 0xfdf   :  { %v3317_v61 = vsel %vm374_vm6, %v6684_v4, -inf }
 0xfec   :  { %5496 = vrot.lane.b32.xlu1 %v5495_v49, %s5740_s5 }
 0xff2   :  { %5491 = vrot.lane.b32.xlu0 %v5490_v34, %s5740_s5 }
0x1010   :  { %3321 = vmax.xlane.f32.xlu1 %v3320_v11 }
0x1011   :  { %3318 = vmax.xlane.f32.xlu0 %v3317_v61 }
0x1021   :  { %5506 = vrot.lane.b32.xlu1 %v5505_v15, %s5740_s5 }
0x1027   :  { %5501 = vrot.lane.b32.xlu0 %v5500_v46, %s5740_s5 }
0x1047   :  { %v2502_v22 = vpop.xlane.xlu1 %2501 }
0x1048   :  { %v2659_v35 = vpop.xlane.xlu0 %2658  ;;  %v2510_v48 = vsub.f32 %v6617_v57, %v2502_v22 }
0x1049   :  { %v2667_v6 = vsub.f32 %v6620_v50, %v2659_v35 }
0x104a   :  { %v2515_v49 = vmul.f32 1.442695, %v2510_v48 }
0x104b   :  { %v2672_v34 = vmul.f32 1.442695, %v2667_v6  ;;  %v2656_v62 = vpop.xlane.xlu1 %2655 }
0x104c   :  { %5636 = vpow2.f32 %v2515_v49  ;;  %v2666_v63 = vsub.f32 %v6624_v1, %v2656_v62  ;;  %v2499_v17 = vpop.xlane.xlu0 %2498 }
0x104d   :  { %5638 = vpow2.f32 %v2672_v34  ;;  %v2509_v44 = vsub.f32 %v6628_v26, %v2499_v17 }
0x104e   :  { %v2670_v60 = vmul.f32 1.442695, %v2666_v63 }
0x104f   :  { %v2513_v15 = vmul.f32 1.442695, %v2509_v44  ;;  %v2665_v51 = vpop.xlane.xlu1 %2664 }
0x1050   :  { %5640 = vpow2.f32 %v2670_v60  ;;  %v2669_v38 = vsub.f32 %v6638_v56, %v2665_v51  ;;  %v2662_v46 = vpop.xlane.xlu0 %2661 }
0x1051   :  { %5642 = vpow2.f32 %v2513_v15  ;;  %v2668_v26 = vsub.f32 %v6642_v40, %v2662_v46 }
0x1052   :  { %v2676_v57 = vmul.f32 1.442695, %v2669_v38 }
0x1053   :  { %v2508_v50 = vpop.xlane.xlu1 %2507 }
0x1054   :  { %v2512_v43 = vsub.f32 %v6646_v18, %v2508_v50  ;;  %v2505_v8 = vpop.xlane.xlu0 %2504  ;;  %5644 = vpow2.f32 %v2676_v57  ;;  %v2674_v18 = vmul.f32 1.442695, %v2668_v26 }
0x1055   :  { %v2511_v9 = vsub.f32 %v6650_v27, %v2505_v8 }
0x1056   :  { %v6712_v20 = vpop.eup %5636  ;;  %v2519_v14 = vmul.f32 1.442695, %v2512_v43 }
0x1057   :  { %v6714_v1 = vpop.eup %5638  ;;  %v2524_v7 = vsel %vm374_vm6, %v6712_v20, 0.0  ;;  %v2517_v48 = vmul.f32 1.442695, %v2511_v9 }
0x1058   :  { %v2681_v56 = vsel %vm374_vm6, %v6714_v1, 0.0  ;;  %2525 = vadd.xlane.f32.xlu0 %v2524_v7  ;;  %5646 = vpow2.f32 %v2519_v14  ;;  %v3042_v40 = vpop.xlane.xlu1 %3041 }
0x1059   :  { %2682 = vadd.xlane.f32.xlu1 %v2681_v56  ;;  %v3039_v58 = vpop.xlane.xlu0 %3038  ;;  %5648 = vpow2.f32 %v2674_v18  ;;  %v3050_v6 = vsub.f32 %v6657_v59, %v3042_v40 }
0x105a   :  { %v6721_v13 = vpop.eup %5640  ;;  %v3049_v63 = vsub.f32 %v6659_v24, %v3039_v58 }
0x105b   :  { %v2678_v11 = vsel %vm374_vm6, %v6721_v13, 0.0  ;;  %v6726_v61 = vpop.eup %5642  ;;  %v3055_v27 = vmul.f32 1.442695, %v3050_v6 }
0x105c   :  { %v2521_v34 = vsel %vm374_vm6, %v6726_v61, 0.0  ;;  %v3048_v17 = vpop.xlane.xlu1 %3047  ;;  %v3053_v59 = vmul.f32 1.442695, %v3049_v63 }
0x105d   :  { %2679 = vadd.xlane.f32.xlu1 %v2678_v11  ;;  %v3045_v22 = vpop.xlane.xlu0 %3044  ;;  %v3052_v60 = vsub.f32 %v6665_v21, %v3048_v17 }
0x105e   :  { %v3051_v35 = vsub.f32 %v6667_v36, %v3045_v22  ;;  %v6732_v62 = vpop.eup %5644 }
0x105f   :  { %v2687_v36 = vsel %vm374_vm6, %v6732_v62, 0.0  ;;  %v3059_v57 = vmul.f32 1.442695, %v3052_v60 }
0x1060   :  { %v3057_v49 = vmul.f32 1.442695, %v3051_v35 }
0x1061   :  { %2522 = vadd.xlane.f32.xlu1 %v2521_v34 }
0x1062   :  { %5650 = vpow2.f32 %v3057_v49  ;;  %v6737_v44 = vpop.eup %5646 }
0x1063   :  { %5652 = vpow2.f32 %v2517_v48  ;;  %v2530_v51 = vsel %vm374_vm6, %v6737_v44, 0.0  ;;  %v6742_v38 = vpop.eup %5648 }
0x1064   :  { %5654 = vpow2.f32 %v3055_v27  ;;  %v2684_v21 = vsel %vm374_vm6, %v6742_v38, 0.0 }
0x1065   :  { %2688 = vadd.xlane.f32.xlu1 %v2687_v36  ;;  %5656 = vpow2.f32 %v3053_v59 }
0x1068   :  { %v3316_v15 = vpop.xlane.xlu1 %3315 }
0x1069   :  { %2531 = vadd.xlane.f32.xlu1 %v2530_v51  ;;  %v3313_v46 = vpop.xlane.xlu0 %3312  ;;  %v3324_v50 = vsub.f32 %v6674_v42, %v3316_v15 }
0x106a   :  { %v3323_v24 = vsub.f32 %v6676_v37, %v3313_v46 }
0x106b   :  { %v3329_v42 = vmul.f32 1.442695, %v3324_v50 }
0x106c   :  { %v6746_v43 = vpop.eup %5650  ;;  %v3327_v8 = vmul.f32 1.442695, %v3323_v24  ;;  %v5497_v26 = vpop.permute.xlu1 %5496 }
0x106d   :  { %v6750_v14 = vpop.eup %5652  ;;  %v5499_v7 = vunpack.i.h.bf16 %v5497_v26  ;;  %2685 = vadd.xlane.f32.xlu1 %v2684_v21  ;;  %v5492_v56 = vpop.permute.xlu0 %5491  ;;  %v3067_v58 = vsel %vm374_vm6, %v6746_v43, 0.0  ;;  %v5498_v37 = vunpack.i.l.bf16 %v5497_v26 }
0x106e   :  { %5658 = vpow2.f32 %v3327_v8  ;;  %v5494_v18 = vunpack.i.h.bf16 %v5492_v56  ;;  %v5493_v9 = vunpack.i.l.bf16 %v5492_v56  ;;  %3068 = vadd.xlane.f32.xlu0 %v3067_v58  ;;  %v2527_v40 = vsel %vm374_vm6, %v6750_v14, 0.0  ;;  %v6756_v22 = vpop.eup %5654 }
0x106f   :  { %5660 = vpow2.f32 %v3059_v57  ;;  %v5302_v35 = vpack.c.bf16 %v5499_v7, %v5498_v37  ;;  %v3064_v48 = vsel %vm374_vm6, %v6756_v22, 0.0  ;;  %v6760_v6 = vpop.eup %5656 }
0x1070   :  { %v5298_v11 = vpack.c.bf16 %v5494_v18, %v5493_v9  ;;  %5662 = vpow2.f32 %v3329_v42  ;;  %v3061_v34 = vsel %vm374_vm6, %v6760_v6, 0.0 }
0x1071   :  { %2528 = vadd.xlane.f32.xlu1 %v2527_v40 }
0x1072   :  { %5299 = vmatprep.subr.bf16.mxu0 %v5298_v11 }
0x1073   :  { %5301 = vmatpush3.bf16.msra.mxu0 %v5298_v11 }
0x1074   :  { %5303 = vmatprep.subr.bf16.mxu0 %v5302_v35 }
0x1075   :  { %3065 = vadd.xlane.f32.xlu1 %v3064_v48 }
0x1078   :  { %v6762_v49 = vpop.eup %5658 }
0x1079   :  { %v6766_v27 = vpop.eup %5660  ;;  %3062 = vadd.xlane.f32.xlu1 %v3061_v34  ;;  %v3335_v63 = vsel %vm374_vm6, %v6762_v49, 0.0 }
0x107a   :  { %3336 = vadd.xlane.f32.xlu0 %v3335_v63  ;;  %v3070_v17 = vsel %vm374_vm6, %v6766_v27, 0.0  ;;  %v6772_v36 = vpop.eup %5662 }
0x107b   :  { %v3338_v59 = vsel %vm374_vm6, %v6772_v36, 0.0 }
0x107d   :  { %3071 = vadd.xlane.f32.xlu1 %v3070_v17 }
0x1081   :  { %3339 = vadd.xlane.f32.xlu1 %v3338_v59 }
0x1092   :  { %5516 = vrot.lane.b32.xlu1 %v5515_v19, %s5740_s5  ;;  %v7015_v19 = vpack.i.bf16 %v6536_v55, %v6531_v52 }
0x109d   :  { %v3322_v60 = vpop.xlane.xlu1 %3321 }
0x109e   :  { %v3326_v15 = vsub.f32 %v6682_v30, %v3322_v60  ;;  %v3319_v51 = vpop.xlane.xlu0 %3318  ;;  %v7016_v30 = vpack.i.bf16 %v6383_v23, %v6378_v45 }
0x109f   :  { %v3325_v24 = vsub.f32 %v6684_v4, %v3319_v51  ;;  %v7017_v4 = vpack.i.bf16 %v6395_v47, %v6390_v2 }
0x10a0   :  { %v3333_v46 = vmul.f32 1.442695, %v3326_v15 }
0x10a1   :  { %v3331_v57 = vmul.f32 1.442695, %v3325_v24  ;;  %v5507_v21 = vpop.permute.xlu1 %5506 }
0x10a2   :  { %5664 = vpow2.f32 %v3333_v46  ;;  %v5502_v56 = vpop.permute.xlu0 %5501  ;;  %v5509_v2 = vunpack.i.h.bf16 %v5507_v21  ;;  %v5508_v47 = vunpack.i.l.bf16 %v5507_v21 }
0x10a3   :  { %5666 = vpow2.f32 %v3331_v57  ;;  %v5504_v37 = vunpack.i.h.bf16 %v5502_v56  ;;  %v5503_v18 = vunpack.i.l.bf16 %v5502_v56 }
0x10a4   :  { %v5322_v48 = vpack.c.bf16 %v5509_v2, %v5508_v47 }
0x10a5   :  { %v5306_v42 = vpack.c.bf16 %v5504_v37, %v5503_v18 }
0x10ac   :  { %v6782_v50 = vpop.eup %5664 }
0x10ad   :  { %v3344_v8 = vsel %vm374_vm6, %v6782_v50, 0.0  ;;  %v6786_v26 = vpop.eup %5666 }
0x10ae   :  { %3345 = vadd.xlane.f32.xlu0 %v3344_v8  ;;  %v3341_v5 = vsel %vm374_vm6, %v6786_v26, 0.0 }
0x10b6   :  { %3342 = vadd.xlane.f32.xlu1 %v3341_v5 }
0x10c4   :  { %5511 = vrot.lane.b32.xlu0 %v7014_v28, %s5740_s5 }
0x10c7   :  { %5521 = vrot.lane.b32.xlu1 %v7015_v19, %s5740_s5 }
0x10cb   :  { %5526 = vrot.lane.b32.xlu1 %v7016_v30, %s5741_s6 }
0x10cf   :  { %5531 = vrot.lane.b32.xlu1 %v7017_v4, %s5741_s6 }
0x10e5   :  { %v2526_v40 = vpop.xlane.xlu0 %2525 }
0x10e6   :  { %v2683_v7 = vpop.xlane.xlu1 %2682 }
0x10e7   :  { %5668 = vrcp.f32 %v2683_v7 }
0x10ea   :  { %v2680_v41 = vpop.xlane.xlu1 %2679 }
0x10eb   :  { %5670 = vrcp.f32 %v2680_v41 }
0x10ee   :  { %v2523_v25 = vpop.xlane.xlu1 %2522 }
0x10ef   :  { %5672 = vrcp.f32 %v2523_v25 }
0x10f1   :  { %v5669_v52 = vpop.eup %5668 }
0x10f2   :  { %v2689_v58 = vpop.xlane.xlu1 %2688  ;;  %v2693_v23 = vmul.f32 %v5669_v52, %v6714_v1 }
0x10f3   :  { %5674 = vrcp.f32 %v2689_v58 }
0x10f5   :  { %v5671_v55 = vpop.eup %5670 }
0x10f6   :  { %v2532_v9 = vpop.xlane.xlu1 %2531  ;;  %v2691_v45 = vmul.f32 %v5671_v55, %v6721_v13 }
0x10f8   :  { %4996 = vmatprep.mubr.msk.f32.mxu0 %vm374_vm6, %v2691_v45 }
0x10f9   :  { %4997 = vmatmul.mubr.msk.f32.vlgmr.msra.gmra.mrb[32].mxu0 %vm374_vm6, %v2693_v23  ;;  %v5673_v34 = vpop.eup %5672 }
0x10fa   :  { %5305 = vmatpush3.bf16.msra.mxu0 %v5302_v35  ;;  %v2686_v11 = vpop.xlane.xlu1 %2685  ;;  %v2534_v51 = vmul.f32 %v5673_v34, %v6726_v61 }
0x10fb   :  { %5676 = vrcp.f32 %v2686_v11  ;;  %5307 = vmatprep.subr.bf16.mxu0 %v5306_v42  ;;  %v3069_v28 = vpop.xlane.xlu0 %3068 }
0x10fc   :  { %5678 = vrcp.f32 %v2526_v40 }
0x10fd   :  { %v5675_v63 = vpop.eup %5674 }
0x10fe   :  { %5309 = vmatpush3.bf16.msra.mxu0 %v5306_v42  ;;  %v2529_v13 = vpop.xlane.xlu1 %2528  ;;  %v2697_v35 = vmul.f32 %v5675_v63, %v6732_v62 }
0x10ff   :  { %5680 = vrcp.f32 %v2529_v13  ;;  %5323 = vmatprep.subr.bf16.mxu0 %v5322_v48 }
0x1100   :  { %5682 = vrcp.f32 %v2532_v9 }
0x1102   :  { %v3066_v1 = vpop.xlane.xlu1 %3065 }
0x1105   :  { %v5677_v17 = vpop.eup %5676 }
0x1106   :  { %v3063_v59 = vpop.xlane.xlu1 %3062  ;;  %v2695_v60 = vmul.f32 %v5677_v17, %v6742_v38  ;;  %v5679_v15 = vpop.eup %5678 }
0x1107   :  { %5684 = vrcp.f32 %v3063_v59  ;;  %v2536_v24 = vmul.f32 %v5679_v15, %v6712_v20  ;;  %v3337_v20 = vpop.xlane.xlu0 %3336 }
0x1108   :  { %4999 = vmatprep.mubr.msk.f32.mxu0 %vm374_vm6, %v2695_v60  ;;  %5686 = vrcp.f32 %v3066_v1 }
0x1109   :  { %v5681_v46 = vpop.eup %5680  ;;  %5000 = vmatmul.mubr.msk.f32.gmra.mrb[34].mxu0 %vm374_vm6, %v2697_v35  ;;  %5688 = vrcp.f32 %v3069_v28 }
0x110a   :  { %5010 = vmatprep.mubr.msk.f32.mxu0 %vm374_vm6, %v2534_v51  ;;  %v5683_v57 = vpop.eup %5682  ;;  %v2538_v8 = vmul.f32 %v5681_v46, %v6750_v14  ;;  %v3072_v5 = vpop.xlane.xlu1 %3071 }
0x110b   :  { %v2540_v62 = vmul.f32 %v5683_v57, %v6737_v44  ;;  %5690 = vrcp.f32 %v3072_v5 }
0x110c   :  { %5692 = vrcp.f32 %v3337_v20 }
0x110d   :  { %5011 = vmatmul.mubr.msk.f32.vlgmr.msra.gmra.mrb[32].mxu0 %vm374_vm6, %v2536_v24 }
0x110e   :  { %5325 = vmatpush3.bf16.msra.mxu0 %v5322_v48  ;;  %5013 = vmatprep.mubr.msk.f32.mxu0 %vm374_vm6, %v2538_v8  ;;  %v3340_v19 = vpop.xlane.xlu1 %3339 }
0x110f   :  { %5694 = vrcp.f32 %v3340_v19 }
0x1111   :  { %v5685_v38 = vpop.eup %5684  ;;  %5014 = vmatmul.mubr.msk.f32.gmra.mrb[34].mxu0 %vm374_vm6, %v2540_v62 }
0x1112   :  { %v3074_v61 = vmul.f32 %v5685_v38, %v6760_v6  ;;  %v5517_v30 = vpop.permute.xlu1 %5516  ;;  %v5687_v6 = vpop.eup %5686 }
0x1113   :  { %v5519_v21 = vunpack.i.h.bf16 %v5517_v30  ;;  %v5518_v44 = vunpack.i.l.bf16 %v5517_v30  ;;  %v5689_v58 = vpop.eup %5688  ;;  %v3076_v55 = vmul.f32 %v5687_v6, %v6756_v22 }
0x1114   :  { %5038 = vmatprep.mubr.msk.f32.mxu0 %vm374_vm6, %v3074_v61  ;;  %v3078_v9 = vmul.f32 %v5689_v58, %v6746_v43 }
0x1115   :  { %v5342_v52 = vpack.c.bf16 %v5519_v21, %v5518_v44  ;;  %v5691_v37 = vpop.eup %5690 }
0x1116   :  { %v5693_v45 = vpop.eup %5692  ;;  %v3080_v42 = vmul.f32 %v5691_v37, %v6766_v27 }
0x1117   :  { %v3348_v40 = vmul.f32 %v5693_v45, %v6762_v49 }
0x1119   :  { %v5695_v11 = vpop.eup %5694 }
0x111a   :  { %v3350_v1 = vmul.f32 %v5695_v11, %v6772_v36  ;;  %v2226_v11 = vld [vmem:[%s7003_s1 + $0x68] sm:$0xff] }
0x113b   :  { %v3346_v14 = vpop.xlane.xlu0 %3345 }
0x113f   :  { %v5512_v4 = vpop.permute.xlu0 %5511 }
0x1140   :  { %v5514_v7 = vunpack.i.h.bf16 %v5512_v4  ;;  %v5513_v41 = vunpack.i.l.bf16 %v5512_v4 }
0x1142   :  { %v5326_v25 = vpack.c.bf16 %v5514_v7, %v5513_v41 }
0x1143   :  { %v3343_v56 = vpop.xlane.xlu1 %3342 }
0x1144   :  { %5696 = vrcp.f32 %v3343_v56  ;;  %5327 = vmatprep.subr.bf16.mxu0 %v5326_v25 }
0x1145   :  { %5698 = vrcp.f32 %v3346_v14  ;;  %5329 = vmatpush3.bf16.msra.mxu0 %v5326_v25 }
0x1146   :  { %5343 = vmatprep.subr.bf16.mxu0 %v5342_v52 }
0x1147   :  { %v5522_v18 = vpop.permute.xlu1 %5521 }
0x1148   :  { %v5524_v23 = vunpack.i.h.bf16 %v5522_v18  ;;  %v5523_v2 = vunpack.i.l.bf16 %v5522_v18  ;;  %5039 = vmatmul.mubr.msk.f32.vlgmr.msra.gmra.mrb[32].mxu0 %vm374_vm6, %v3076_v55 }
0x1149   :  { %5041 = vmatprep.mubr.msk.f32.mxu0 %vm374_vm6, %v3078_v9  ;;  %5345 = vmatpush3.bf16.msra.mxu0 %v5342_v52 }
0x114a   :  { %v5346_v47 = vpack.c.bf16 %v5524_v23, %v5523_v2 }
0x114b   :  { %v5527_v22 = vpop.permute.xlu1 %5526 }
0x114c   :  { %5042 = vmatmul.mubr.msk.f32.gmra.mrb[34].mxu0 %vm374_vm6, %v3080_v42  ;;  %5347 = vmatprep.subr.bf16.mxu0 %v5346_v47  ;;  %v5529_v48 = vunpack.i.h.bf16 %v5527_v22  ;;  %v5528_v43 = vunpack.i.l.bf16 %v5527_v22  ;;  %v2225_v42 = vld [vmem:[%s7003_s1 + $0x60] sm:$0xff] }
0x114d   :  { %5349 = vmatpush3.bf16.msra.mxu0 %v5346_v47  ;;  %5066 = vmatprep.mubr.msk.f32.mxu0 %vm374_vm6, %v3348_v40  ;;  %v2227_v40 = vld [vmem:[%s7003_s1 + $0x70] sm:$0xff]  ;;  %v5358_v22 = vpack.c.bf16 %v2226_v11, %v2225_v42 }
0x114e   :  { %v5697_v13 = vpop.eup %5696  ;;  %v5350_v34 = vpack.c.bf16 %v5529_v48, %v5528_v43  ;;  %v2228_v48 = vld [vmem:[%s7003_s1 + $0x78] sm:$0xff] }
0x114f   :  { %v5699_v63 = vpop.eup %5698  ;;  %v3352_v17 = vmul.f32 %v5697_v13, %v6786_v26  ;;  %v5532_v27 = vpop.permute.xlu1 %5531  ;;  %v5362_v43 = vpack.c.bf16 %v2228_v48, %v2227_v40  ;;  %5359 = vmatprep.subr.bf16.mxu1 %v5358_v22  ;;  %v7018_v13 = vmov 0.0  }
0x1150   :  { %5067 = vmatmul.mubr.msk.f32.vlgmr.msra.gmra.mrb[32].mxu0 %vm374_vm6, %v3350_v1  ;;  %v5534_v49 = vunpack.i.h.bf16 %v5532_v27  ;;  %v5533_v59 = vunpack.i.l.bf16 %v5532_v27  ;;  %5351 = vmatprep.subr.bf16.mxu0 %v5350_v34  ;;  %v3354_v60 = vmul.f32 %v5699_v63, %v6782_v50  ;;  %v3479_v50 = vrot.slane %v6406_v10, %v5906_v12 }
0x1151   :  { %5069 = vmatprep.mubr.msk.f32.mxu0 %vm374_vm6, %v3352_v17  ;;  %5353 = vmatpush3.bf16.msra.mxu0 %v5350_v34 }
0x1152   :  { %v5354_v35 = vpack.c.bf16 %v5534_v49, %v5533_v59  ;;  %5361 = vmatpush3.bf16.msra.mxu1 %v5358_v22 }
0x1153   :  { %5363 = vmatprep.subr.bf16.mxu1 %v5362_v43 }
0x1154   :  { %5070 = vmatmul.mubr.msk.f32.gmra.mrb[34].mxu0 %vm374_vm6, %v3354_v60  ;;  %5355 = vmatprep.subr.bf16.mxu0 %v5354_v35 }
0x1155   :  { %5357 = vmatpush3.bf16.msra.mxu0 %v5354_v35 }
0x1156   :  { %5365 = vmatpush3.bf16.msra.mxu1 %v5362_v43 }
0x1157   :  { %5122 = vmatprep.subr.mxu1 %v7018_v13 }
0x1223   :  { %v5068_v36 = vpop.f32.mrb[32].mxu0 }
0x1224   :  { %v3453_v15 = vpop.f32.mrb[33].mxu0 }
0x1225   :  { %5080 = vmatprep.mubr.msk.f32.mxu0 %vm374_vm6, %v3453_v15 }
0x1226   :  { %5081 = vmatmul.mubr.msk.f32.vlgmr.msra.gmra.mrb[36].mxu0 %vm374_vm6, %v5068_v36 }
0x1227   :  { %v5071_v26 = vpop.f32.mrb[34].mxu0 }
0x1228   :  { %v3463_v51 = vpop.f32.mrb[35].mxu0 }
0x1229   :  { %5083 = vmatprep.mubr.msk.f32.mxu0 %vm374_vm6, %v3463_v51  ;;  %v6872_v51 = vld [vmem:[%s7004_s2 + $0x90] sm:$0xff] }
0x122a   :  { %5084 = vmatmul.mubr.msk.f32.gmra.mrb[38].mxu0 %vm374_vm6, %v5071_v26 }
0x12f9   :  { %v5082_v46 = vpop.f32.mrb[36].mxu0 }
0x12fa   :  { %v3580_v24 = vadd.f32 %v5082_v46, %v3479_v50  ;;  %v3574_v57 = vpop.f32.mrb[37].mxu0 }
0x12fb   :  { %v3575_v8 = vadd.f32 %v3574_v57, %v3479_v50 }
0x12fc   :  { %v3594_v62 = vadd.f32 %v3580_v24, %v6424_v31 }
0x12fd   :  { %v3593_v38 = vadd.f32 %v3575_v8, %v6422_v54  ;;  %v5085_v61 = vpop.f32.mrb[38].mxu0 }
0x12fe   :  { %v3590_v5 = vadd.f32 %v5085_v61, %v3479_v50  ;;  %v3584_v28 = vpop.f32.mrb[39].mxu0  ;;  %v3600_v20 = vsel %vm374_vm6, %v3594_v62, 0.0 }
0x12ff   :  { %v3585_v19 = vadd.f32 %v3584_v28, %v3479_v50  ;;  %3601 = vadd.xlane.f32.xlu0 %v3600_v20  ;;  %v3597_v14 = vsel %vm374_vm6, %v3593_v38, 0.0  ;;  %v7019_v50 = vsub.s32 4, %v5821_v29 }
0x1300   :  { %v3596_v30 = vadd.f32 %v3590_v5, %v6438_v39  ;;  %3598 = vadd.xlane.f32.xlu1 %v3597_v14 }
0x1301   :  { %v3595_v10 = vadd.f32 %v3585_v19, %v6436_v0  ;;  %v3652_v46 = vrot.slane %v6872_v51, %v7019_v50 }
0x1302   :  { %v3606_v4 = vsel %vm374_vm6, %v3596_v30, 0.0 }
0x1303   :  { %v3603_v31 = vsel %vm374_vm6, %v3595_v10, 0.0 }
0x1304   :  { %3604 = vadd.xlane.f32.xlu0 %v3603_v31  ;;  %3607 = vadd.xlane.f32.xlu1 %v3606_v4 }
0x138c   :  { %v3602_v54 = vpop.xlane.xlu0 %3601 }
0x138d   :  { %v3610_v21 = vmul.f32 0.03125, %v3602_v54  ;;  %v3599_v44 = vpop.xlane.xlu1 %3598 }
0x138e   :  { %v3609_v7 = vmul.f32 0.03125, %v3599_v44 }
0x138f   :  { %v3614_v41 = vsub.f32 %v3594_v62, %v3610_v21 }
0x1390   :  { %v3613_v25 = vsub.f32 %v3593_v38, %v3609_v7  ;;  %v7020_v38 = vsub.s32 5, %v5821_v29  ;;  %v2229_v7 = vld [vmem:[%s7003_s1 + $0xc0] sm:$0xff] }
0x1391   :  { %v3605_v6 = vpop.xlane.xlu0 %3604  ;;  %v3608_v56 = vpop.xlane.xlu1 %3607  ;;  %v3618_v58 = vmul.f32 %v3614_v41, %v3614_v41 }
0x1392   :  { %v3611_v52 = vmul.f32 0.03125, %v3605_v6  ;;  %v3612_v39 = vmul.f32 0.03125, %v3608_v56  ;;  %v3617_v55 = vmul.f32 %v3613_v25, %v3613_v25  ;;  %v3660_v61 = vrot.slane %v6872_v51, %v7020_v38  ;;  %v2231_v6 = vld [vmem:[%s7003_s1 + $0xd0] sm:$0xff]  ;;  %v2232_v56 = vld [vmem:[%s7003_s1 + $0xd8] sm:$0xff] }
0x1393   :  { %v3624_v0 = vsel %vm374_vm6, %v3618_v58, 0.0  ;;  %v5370_v58 = vpack.c.bf16 %v2232_v56, %v2231_v6 }
0x1394   :  { %v3615_v37 = vsub.f32 %v3595_v10, %v3611_v52  ;;  %v3616_v18 = vsub.f32 %v3596_v30, %v3612_v39  ;;  %3625 = vadd.xlane.f32.xlu1 %v3624_v0  ;;  %v3621_v9 = vsel %vm374_vm6, %v3617_v55, 0.0  ;;  %v2233_v52 = vld [vmem:[%s7003_s1 + $0xe0] sm:$0xff]  ;;  %v2234_v39 = vld [vmem:[%s7003_s1 + $0xe8] sm:$0xff]  ;;  %v2235_v0 = vld [vmem:[%s7003_s1 + $0xf0] sm:$0xff] }
0x1395   :  { %3622 = vadd.xlane.f32.xlu0 %v3621_v9  ;;  %v5374_v55 = vpack.c.bf16 %v2234_v39, %v2233_v52  ;;  %v7021_v9 = vsub.s32 6, %v5821_v29  ;;  %v7022_v39 = vsub.s32 7, %v5821_v29 }
0x1396   :  { %v3619_v45 = vmul.f32 %v3615_v37, %v3615_v37  ;;  %v3620_v23 = vmul.f32 %v3616_v18, %v3616_v18 }
0x1398   :  { %v3627_v2 = vsel %vm374_vm6, %v3619_v45, 0.0  ;;  %v3630_v47 = vsel %vm374_vm6, %v3620_v23, 0.0  ;;  %v3668_v45 = vrot.slane %v6872_v51, %v7021_v9 }
0x1399   :  { %3628 = vadd.xlane.f32.xlu0 %v3627_v2  ;;  %3631 = vadd.xlane.f32.xlu1 %v3630_v47 }
0x1421   :  { %v3626_v1 = vpop.xlane.xlu1 %3625 }
0x1422   :  { %v3634_v34 = vmul.f32 0.03125, %v3626_v1  ;;  %v3623_v63 = vpop.xlane.xlu0 %3622 }
0x1423   :  { %v3633_v17 = vmul.f32 0.03125, %v3623_v63 }
0x1424   :  { %v3638_v27 = vadd.f32 1e-05, %v3634_v34 }
0x1425   :  { %v3637_v49 = vadd.f32 1e-05, %v3633_v17 }
0x1426   :  { %5700 = vrsqrt.f32 %v3638_v27  ;;  %v3629_v59 = vpop.xlane.xlu0 %3628  ;;  %v3632_v60 = vpop.xlane.xlu1 %3631 }
0x1427   :  { %5702 = vrsqrt.f32 %v3637_v49  ;;  %v3635_v35 = vmul.f32 0.03125, %v3629_v59  ;;  %v3636_v36 = vmul.f32 0.03125, %v3632_v60 }
0x1429   :  { %v3639_v15 = vadd.f32 1e-05, %v3635_v35  ;;  %v3640_v26 = vadd.f32 1e-05, %v3636_v36 }
0x142b   :  { %5704 = vrsqrt.f32 %v3639_v15 }
0x142c   :  { %5706 = vrsqrt.f32 %v3640_v26 }
0x1430   :  { %v5701_v24 = vpop.eup %5700 }
0x1431   :  { %v5703_v57 = vpop.eup %5702  ;;  %v3646_v8 = vmul.f32 %v5701_v24, %v3614_v41  ;;  %v2230_v41 = vld [vmem:[%s7003_s1 + $0xc8] sm:$0xff] }
0x1432   :  { %v3645_v62 = vmul.f32 %v5703_v57, %v3613_v25  ;;  %v5366_v25 = vpack.c.bf16 %v2230_v41, %v2229_v7 }
0x1433   :  { %v3654_v5 = vmul.f32 %v3652_v46, %v3646_v8 }
0x1434   :  { %v3653_v28 = vmul.f32 %v3652_v46, %v3645_v62  ;;  %5367 = vmatprep.subr.bf16.mxu0 %v5366_v25 }
0x1435   :  { %v5705_v20 = vpop.eup %5704  ;;  %v6882_v10 = vadd.f32 %v3660_v61, %v3654_v5  ;;  %5369 = vmatpush3.bf16.msra.mxu0 %v5366_v25 }
0x1436   :  { %v5707_v19 = vpop.eup %5706  ;;  %v6880_v14 = vadd.f32 %v3660_v61, %v3653_v28  ;;  %v3647_v30 = vmul.f32 %v5705_v20, %v3615_v37  ;;  %5371 = vmatprep.subr.bf16.mxu0 %v5370_v58  ;;  %v2236_v37 = vld [vmem:[%s7003_s1 + $0xf8] sm:$0xff] }
0x1437   :  { %v3648_v4 = vmul.f32 %v5707_v19, %v3616_v18  ;;  %v5378_v18 = vpack.c.bf16 %v2236_v37, %v2235_v0 }
0x1438   :  { %5094 = vmatprep.mubr.msk.f32.mxu1 %vm374_vm6, %v6880_v14  ;;  %v3655_v31 = vmul.f32 %v3652_v46, %v3647_v30 }
0x1439   :  { %5095 = vmatmul.mubr.msk.f32.vlgmr.msra.gmra.mrb[32].mxu1 %vm374_vm6, %v6882_v10  ;;  %v3656_v54 = vmul.f32 %v3652_v46, %v3648_v4  ;;  %5373 = vmatpush3.bf16.msra.mxu0 %v5370_v58 }
0x143a   :  { %v6888_v21 = vadd.f32 %v3660_v61, %v3655_v31  ;;  %5375 = vmatprep.subr.bf16.mxu0 %v5374_v55 }
0x143b   :  { %v6890_v44 = vadd.f32 %v3660_v61, %v3656_v54 }
0x143c   :  { %5097 = vmatprep.mubr.msk.f32.mxu1 %vm374_vm6, %v6888_v21 }
0x143d   :  { %5098 = vmatmul.mubr.msk.f32.gmra.mrb[34].mxu1 %vm374_vm6, %v6890_v44  ;;  %5377 = vmatpush3.bf16.msra.mxu0 %v5374_v55  ;;  %v3805_v55 = vrot.slane %v6872_v51, %v7022_v39 }
0x143e   :  { %5124 = vmatprep.mubr.msk.f32.mxu1 %vm5736_vm2, %v7018_v13  ;;  %5379 = vmatprep.subr.bf16.mxu0 %v5378_v18 }
0x1441   :  { %5381 = vmatpush3.bf16.msra.mxu0 %v5378_v18 }
0x150c   :  { %v5096_v23 = vpop.f32.mrb[32].mxu1 }
0x150d   :  { %v3753_v2 = vadd.f32 %v5096_v23, %v3668_v45  ;;  %v3747_v47 = vpop.f32.mrb[33].mxu1 }
0x150e   :  { %v3748_v42 = vadd.f32 %v3747_v47, %v3668_v45 }
0x150f   :  { %v3767_v11 = vmul.f32 %v3753_v2, %v3753_v2 }
0x1510   :  { %v3766_v40 = vmul.f32 %v3748_v42, %v3748_v42  ;;  %v5099_v22 = vpop.f32.mrb[34].mxu1 }
0x1511   :  { %v3771_v48 = vmul.f32 %v3767_v11, %v3753_v2  ;;  %v3763_v43 = vadd.f32 %v5099_v22, %v3668_v45  ;;  %v3757_v1 = vpop.f32.mrb[35].mxu1 }
0x1512   :  { %v3770_v34 = vmul.f32 %v3766_v40, %v3748_v42  ;;  %v3758_v63 = vadd.f32 %v3757_v1, %v3668_v45 }
0x1513   :  { %v3775_v17 = vmul.f32 0.044715, %v3771_v48  ;;  %v3769_v27 = vmul.f32 %v3763_v43, %v3763_v43 }
0x1514   :  { %v3774_v49 = vmul.f32 0.044715, %v3770_v34  ;;  %v3768_v59 = vmul.f32 %v3758_v63, %v3758_v63 }
0x1515   :  { %v3779_v60 = vadd.f32 %v3775_v17, %v3753_v2  ;;  %v3773_v35 = vmul.f32 %v3769_v27, %v3763_v43 }
0x1516   :  { %v3778_v36 = vadd.f32 %v3774_v49, %v3748_v42  ;;  %v3772_v15 = vmul.f32 %v3768_v59, %v3758_v63 }
0x1517   :  { %v3783_v26 = vmul.f32 0.7978846, %v3779_v60  ;;  %v3777_v50 = vmul.f32 0.044715, %v3773_v35 }
0x1518   :  { %v3782_v46 = vmul.f32 0.7978846, %v3778_v36  ;;  %v3776_v24 = vmul.f32 0.044715, %v3772_v15 }
0x1519   :  { %5708 = vtanh.f32 %v3783_v26  ;;  %v3781_v57 = vadd.f32 %v3777_v50, %v3763_v43 }
0x151a   :  { %5710 = vtanh.f32 %v3782_v46  ;;  %v3780_v8 = vadd.f32 %v3776_v24, %v3758_v63 }
0x151b   :  { %v3785_v62 = vmul.f32 0.7978846, %v3781_v57 }
0x151c   :  { %v3784_v38 = vmul.f32 0.7978846, %v3780_v8 }
0x151d   :  { %5712 = vtanh.f32 %v3785_v62 }
0x151e   :  { %5714 = vtanh.f32 %v3784_v38 }
0x1523   :  { %v5709_v61 = vpop.eup %5708 }
0x1524   :  { %v5711_v5 = vpop.eup %5710  ;;  %v3791_v28 = vadd.f32 1.0, %v5709_v61 }
0x1525   :  { %v3790_v20 = vadd.f32 1.0, %v5711_v5 }
0x1526   :  { %v3795_v19 = vmul.f32 0.5, %v3791_v28 }
0x1527   :  { %v5713_v30 = vpop.eup %5712  ;;  %v3794_v4 = vmul.f32 0.5, %v3790_v20 }
0x1528   :  { %v5715_v31 = vpop.eup %5714  ;;  %v3793_v54 = vadd.f32 1.0, %v5713_v30  ;;  %v3799_v25 = vmul.f32 %v3795_v19, %v3753_v2 }
0x1529   :  { %v3798_v7 = vmul.f32 %v3794_v4, %v3748_v42  ;;  %v3792_v41 = vadd.f32 1.0, %v5715_v31 }
0x152a   :  { %v3797_v6 = vmul.f32 0.5, %v3793_v54 }
0x152b   :  { %5116 = vmatprep.mubr.msk.f32.mxu0 %vm1975_vm8, %v3798_v7  ;;  %v3796_v56 = vmul.f32 0.5, %v3792_v41  ;;  %v2238_v7 = vld [vmem:[%s7004_s2 + $0x98] sm:$0x3] }
0x152c   :  { %5117 = vmatmul.mubr.msk.f32.vlgmr.msra.gmra.mrb[40].mxu0 %vm1975_vm8, %v3799_v25  ;;  %v3801_v52 = vmul.f32 %v3797_v6, %v3763_v43  ;;  %v3962_v41 = vrot.slane %v2238_v7, %v5877_v53 }
0x152d   :  { %v3800_v58 = vmul.f32 %v3796_v56, %v3758_v63 }
0x152f   :  { %5119 = vmatprep.mubr.msk.f32.mxu0 %vm1975_vm8, %v3800_v58  ;;  %v3970_v58 = vrot.slane %v2238_v7, %v5835_v33 }
0x1530   :  { %5120 = vmatmul.mubr.msk.f32.gmra.mrb[42].mxu0 %vm1975_vm8, %v3801_v52 }
0x15ff   :  { %v5118_v0 = vpop.f32.mrb[40].mxu0 }
0x1600   :  { %v3890_v37 = vadd.f32 %v5118_v0, %v3805_v55  ;;  %v3884_v18 = vpop.f32.mrb[41].mxu0 }
0x1601   :  { %v3885_v9 = vadd.f32 %v3884_v18, %v3805_v55 }
0x1602   :  { %v3904_v45 = vadd.f32 %v3890_v37, %v6882_v10 }
0x1603   :  { %v3903_v23 = vadd.f32 %v3885_v9, %v6880_v14  ;;  %v5121_v2 = vpop.f32.mrb[42].mxu0 }
0x1604   :  { %v3900_v47 = vadd.f32 %v5121_v2, %v3805_v55  ;;  %v3894_v42 = vpop.f32.mrb[43].mxu0  ;;  %v3910_v11 = vsel %vm374_vm6, %v3904_v45, 0.0 }
0x1605   :  { %v3895_v40 = vadd.f32 %v3894_v42, %v3805_v55  ;;  %3911 = vadd.xlane.f32.xlu0 %v3910_v11  ;;  %v3907_v22 = vsel %vm374_vm6, %v3903_v23, 0.0 }
0x1606   :  { %v3906_v29 = vadd.f32 %v3900_v47, %v6890_v44  ;;  %3908 = vadd.xlane.f32.xlu1 %v3907_v22 }
0x1607   :  { %v3905_v51 = vadd.f32 %v3895_v40, %v6888_v21 }
0x1608   :  { %v3916_v48 = vsel %vm374_vm6, %v3906_v29, 0.0 }
0x1609   :  { %v3913_v10 = vsel %vm374_vm6, %v3905_v51, 0.0 }
0x160a   :  { %3917 = vadd.xlane.f32.xlu1 %v3916_v48  ;;  %3914 = vadd.xlane.f32.xlu0 %v3913_v10 }
0x1692   :  { %v3912_v14 = vpop.xlane.xlu0 %3911 }
0x1693   :  { %v3920_v43 = vmul.f32 0.03125, %v3912_v14  ;;  %v3909_v1 = vpop.xlane.xlu1 %3908 }
0x1694   :  { %v3919_v34 = vmul.f32 0.03125, %v3909_v1 }
0x1695   :  { %v3924_v63 = vsub.f32 %v3904_v45, %v3920_v43 }
0x1696   :  { %v3923_v17 = vsub.f32 %v3903_v23, %v3919_v34 }
0x1697   :  { %v3915_v27 = vpop.xlane.xlu0 %3914  ;;  %v3918_v49 = vpop.xlane.xlu1 %3917  ;;  %v3928_v59 = vmul.f32 %v3924_v63, %v3924_v63 }
0x1698   :  { %v3921_v60 = vmul.f32 0.03125, %v3915_v27  ;;  %v3922_v44 = vmul.f32 0.03125, %v3918_v49  ;;  %v3927_v35 = vmul.f32 %v3923_v17, %v3923_v17 }
0x1699   :  { %v3934_v21 = vsel %vm374_vm6, %v3928_v59, 0.0 }
0x169a   :  { %v3925_v36 = vsub.f32 %v3905_v51, %v3921_v60  ;;  %v3926_v15 = vsub.f32 %v3906_v29, %v3922_v44  ;;  %3935 = vadd.xlane.f32.xlu0 %v3934_v21  ;;  %v3931_v26 = vsel %vm374_vm6, %v3927_v35, 0.0 }
0x169b   :  { %3932 = vadd.xlane.f32.xlu1 %v3931_v26 }
0x169c   :  { %v3929_v50 = vmul.f32 %v3925_v36, %v3925_v36  ;;  %v3930_v46 = vmul.f32 %v3926_v15, %v3926_v15 }
0x169e   :  { %v3937_v24 = vsel %vm374_vm6, %v3929_v50, 0.0  ;;  %v3940_v57 = vsel %vm374_vm6, %v3930_v46, 0.0  ;;  %v4043_v50 = vld [vmem:[%s7003_s1 + $0x100] sm:$0xff]  ;;  %v4353_v46 = vld [vmem:[%s7004_s2 + $0xb8] sm:$0xff] }
0x169f   :  { %3938 = vadd.xlane.f32.xlu0 %v3937_v24  ;;  %3941 = vadd.xlane.f32.xlu1 %v3940_v57  ;;  %v5743_v24 = vmov 0  }
0x16a0   :  { %5535 = vset.pattern.permute.xlu0 %v5743_v24 }
0x1727   :  { %v3936_v8 = vpop.xlane.xlu0 %3935 }
0x1728   :  { %v3944_v62 = vmul.f32 0.03125, %v3936_v8  ;;  %v3933_v38 = vpop.xlane.xlu1 %3932 }
0x1729   :  { %v3943_v61 = vmul.f32 0.03125, %v3933_v38 }
0x172a   :  { %v3948_v5 = vadd.f32 1e-05, %v3944_v62 }
0x172b   :  { %v3947_v28 = vadd.f32 1e-05, %v3943_v61 }
0x172c   :  { %5716 = vrsqrt.f32 %v3948_v5  ;;  %v3939_v20 = vpop.xlane.xlu0 %3938  ;;  %v3942_v19 = vpop.xlane.xlu1 %3941 }
0x172d   :  { %5718 = vrsqrt.f32 %v3947_v28  ;;  %v3945_v30 = vmul.f32 0.03125, %v3939_v20  ;;  %v3946_v4 = vmul.f32 0.03125, %v3942_v19 }
0x172f   :  { %v3949_v31 = vadd.f32 1e-05, %v3945_v30  ;;  %v3950_v54 = vadd.f32 1e-05, %v3946_v4 }
0x1731   :  { %5720 = vrsqrt.f32 %v3949_v31 }
0x1732   :  { %5722 = vrsqrt.f32 %v3950_v54  ;;  %v5734_v54 = vld [vmem:[%s7004_s2 + $0xa0] sm:$0xf] }
0x1733   :  { %v4030_v7 = vrot.slane %v5734_v54, %v5832_v32 }
0x1736   :  { %v5717_v25 = vpop.eup %5716 }
0x1737   :  { %v5719_v6 = vpop.eup %5718  ;;  %v3956_v56 = vmul.f32 %v5717_v25, %v3924_v63 }
0x1738   :  { %v3955_v52 = vmul.f32 %v5719_v6, %v3923_v17 }
0x1739   :  { %v3964_v39 = vmul.f32 %v3962_v41, %v3956_v56  ;;  %v4038_v56 = vrot.slane %v5734_v54, %v5906_v12 }
0x173a   :  { %v3963_v55 = vmul.f32 %v3962_v41, %v3955_v52 }
0x173b   :  { %v5721_v0 = vpop.eup %5720  ;;  %v3972_v37 = vadd.f32 %v3970_v58, %v3964_v39 }
0x173c   :  { %v5723_v18 = vpop.eup %5722  ;;  %v3971_v9 = vadd.f32 %v3970_v58, %v3963_v55  ;;  %v3957_v45 = vmul.f32 %v5721_v0, %v3925_v36 }
0x173d   :  { %v3978_v23 = vsel %vm374_vm6, %v3972_v37, 0.0  ;;  %v3958_v2 = vmul.f32 %v5723_v18, %v3926_v15 }
0x173e   :  { %3979 = vadd.xlane.f32.xlu0 %v3978_v23  ;;  %v3975_v47 = vsel %vm374_vm6, %v3971_v9, 0.0  ;;  %v3965_v53 = vmul.f32 %v3962_v41, %v3957_v45 }
0x173f   :  { %3976 = vadd.xlane.f32.xlu1 %v3975_v47  ;;  %v3966_v42 = vmul.f32 %v3962_v41, %v3958_v2 }
0x1740   :  { %v3973_v11 = vadd.f32 %v3970_v58, %v3965_v53 }
0x1741   :  { %v3974_v40 = vadd.f32 %v3970_v58, %v3966_v42 }
0x1742   :  { %v3981_v33 = vsel %vm374_vm6, %v3973_v11, 0.0 }
0x1743   :  { %3982 = vadd.xlane.f32.xlu0 %v3981_v33  ;;  %v3984_v22 = vsel %vm374_vm6, %v3974_v40, 0.0 }
0x1744   :  { %3985 = vadd.xlane.f32.xlu1 %v3984_v22 }
0x17cb   :  { %v3980_v29 = vpop.xlane.xlu0 %3979 }
0x17cc   :  { %v3988_v51 = vmul.f32 0.03125, %v3980_v29  ;;  %v3977_v48 = vpop.xlane.xlu1 %3976 }
0x17cd   :  { %v3987_v10 = vmul.f32 0.03125, %v3977_v48 }
0x17ce   :  { %v3992_v14 = vsub.f32 %v3972_v37, %v3988_v51 }
0x17cf   :  { %v3991_v43 = vsub.f32 %v3971_v9, %v3987_v10 }
0x17d0   :  { %v3983_v1 = vpop.xlane.xlu0 %3982  ;;  %v3996_v34 = vmul.f32 %v3992_v14, %v3992_v14 }
0x17d1   :  { %v3989_v63 = vmul.f32 0.03125, %v3983_v1  ;;  %v3986_v17 = vpop.xlane.xlu1 %3985  ;;  %v3995_v27 = vmul.f32 %v3991_v43, %v3991_v43 }
0x17d2   :  { %v3990_v49 = vmul.f32 0.03125, %v3986_v17  ;;  %v4002_v59 = vsel %vm374_vm6, %v3996_v34, 0.0 }
0x17d3   :  { %v3993_v60 = vsub.f32 %v3973_v11, %v3989_v63  ;;  %4003 = vadd.xlane.f32.xlu0 %v4002_v59  ;;  %v3999_v44 = vsel %vm374_vm6, %v3995_v27, 0.0  ;;  %v4360_v11 = vld [vmem:[%s7004_s2 + $0xa8] sm:$0xff] }
0x17d4   :  { %v3994_v35 = vsub.f32 %v3974_v40, %v3990_v49  ;;  %4000 = vadd.xlane.f32.xlu1 %v3999_v44  ;;  %v4361_v40 = vmul.f32 %v4360_v11, %v5783_v16  ;;  %v4370_v33 = vmul.f32 %v4360_v11, %v5767_v3 }
0x17d5   :  { %v3997_v21 = vmul.f32 %v3993_v60, %v3993_v60 }
0x17d6   :  { %v3998_v36 = vmul.f32 %v3994_v35, %v3994_v35  ;;  %v4363_v22 = vsel %vm4362_vm9, %v4361_v40, 0.0  ;;  %v4371_v29 = vsel %vm4362_vm9, %v4370_v33, 0.0 }
0x17d7   :  { %v4005_v15 = vsel %vm374_vm6, %v3997_v21, 0.0  ;;  %v4364_v51 = vrot.slane %v4363_v22, 4  ;;  %v4372_v48 = vrot.slane %v4371_v29, 4 }
0x17d8   :  { %4006 = vadd.xlane.f32.xlu0 %v4005_v15  ;;  %v4008_v26 = vsel %vm374_vm6, %v3998_v36, 0.0 }
0x17d9   :  { %4009 = vadd.xlane.f32.xlu1 %v4008_v26  ;;  %v4365_v10 = vadd.f32 %v4364_v51, %v4363_v22 }
0x17db   :  { %v4366_v1 = vrot.slane %v4365_v10, 2 }
0x17dd   :  { %v4367_v49 = vadd.f32 %v4366_v1, %v4365_v10 }
0x17df   :  { %v4368_v3 = vrot.slane %v4367_v49, 1 }
0x17ea   :  { %4197 = vrot.lane.b32.xlu1 %v4043_v50, %s5740_s5 }
0x17ee   :  { %4045 = vrot.lane.b32.xlu0 %v4043_v50, %s5742_s13  ;;  %4275 = vrot.lane.b32.xlu1 %v4043_v50, %s5741_s6 }
0x17f2   :  { %4356 = vperm.xlu0 %5535, %v4353_v46  }
0x1860   :  { %v4004_v57 = vpop.xlane.xlu0 %4003 }
0x1861   :  { %v4012_v8 = vmul.f32 0.03125, %v4004_v57  ;;  %v4001_v62 = vpop.xlane.xlu1 %4000 }
0x1862   :  { %v4011_v38 = vmul.f32 0.03125, %v4001_v62 }
0x1863   :  { %v4016_v61 = vadd.f32 1e-05, %v4012_v8 }
0x1864   :  { %v4015_v5 = vadd.f32 1e-05, %v4011_v38 }
0x1865   :  { %5724 = vrsqrt.f32 %v4016_v61  ;;  %v4007_v28 = vpop.xlane.xlu0 %4006 }
0x1866   :  { %5726 = vrsqrt.f32 %v4015_v5  ;;  %v4013_v20 = vmul.f32 0.03125, %v4007_v28  ;;  %v4010_v19 = vpop.xlane.xlu1 %4009 }
0x1867   :  { %v4014_v30 = vmul.f32 0.03125, %v4010_v19 }
0x1868   :  { %v4017_v4 = vadd.f32 1e-05, %v4013_v20 }
0x1869   :  { %v4018_v31 = vadd.f32 1e-05, %v4014_v30  ;;  %v4046_v9 = vpop.permute.xlu0 %4045 }
0x186a   :  { %5728 = vrsqrt.f32 %v4017_v4  ;;  %v4198_v2 = vpop.permute.xlu1 %4197 }
0x186b   :  { %5730 = vrsqrt.f32 %v4018_v31 }
0x186e   :  { %v4276_v42 = vpop.permute.xlu1 %4275 }
0x186f   :  { %v5725_v41 = vpop.eup %5724 }
0x1870   :  { %v5727_v25 = vpop.eup %5726  ;;  %v4024_v6 = vmul.f32 %v5725_v41, %v3992_v14 }
0x1871   :  { %v4023_v58 = vmul.f32 %v5727_v25, %v3991_v43  ;;  %v4373_v43 = vadd.f32 %v4372_v48, %v4371_v29  ;;  %v4357_v21 = vpop.permute.xlu0 %4356 }
0x1872   :  { %v4032_v52 = vmul.f32 %v4030_v7, %v4024_v6 }
0x1873   :  { %v4031_v0 = vmul.f32 %v4030_v7, %v4023_v58  ;;  %v4374_v63 = vrot.slane %v4373_v43, 2 }
0x1874   :  { %v5729_v39 = vpop.eup %5728  ;;  %v4040_v55 = vadd.f32 %v4038_v56, %v4032_v52 }
0x1875   :  { %v5731_v37 = vpop.eup %5730  ;;  %v4025_v18 = vmul.f32 %v5729_v39, %v3993_v60  ;;  %v4039_v23 = vadd.f32 %v4038_v56, %v4031_v0  ;;  %v4375_v44 = vadd.f32 %v4374_v63, %v4373_v43 }
0x1876   :  { %5123 = vmatpush3.xpose.msk.msra.mxu1 %vm374_vm6, %v4040_v55  ;;  %v4026_v45 = vmul.f32 %v5731_v37, %v3994_v35 }
0x1877   :  { %5127 = vmatprep.subr.mxu1 %v7018_v13  ;;  %v4033_v32 = vmul.f32 %v4030_v7, %v4025_v18  ;;  %v4376_v15 = vrot.slane %v4375_v44, 1 }
0x1878   :  { %v4034_v47 = vmul.f32 %v4030_v7, %v4026_v45 }
0x1879   :  { %5125 = vmatmul.mubr.msk.f32.vlgmr.msra.gmra.mrb[36].mxu1 %vm374_vm6, %v4046_v9  ;;  %v4041_v12 = vadd.f32 %v4038_v56, %v4033_v32  ;;  %v4377_v24 = vadd.f32 %v4376_v15, %v4375_v44 }
0x187a   :  { %5128 = vmatpush3.xpose.msk.msra.mxu1 %vm374_vm6, %v4039_v23  ;;  %5129 = vmatprep.mubr.msk.f32.mxu1 %vm5736_vm2, %v7018_v13  ;;  %v4042_v53 = vadd.f32 %v4038_v56, %v4034_v47 }
0x187b   :  { %5132 = vmatprep.subr.mxu1 %v7018_v13 }
0x187d   :  { %5130 = vmatmul.mubr.msk.f32.vlgmr.msra.gmra.mrb[38].mxu1 %vm374_vm6, %v4043_v50  ;;  %v4369_v50 = vadd.f32 %v4368_v3, %v4367_v49 }
0x187e   :  { %5133 = vmatpush3.xpose.msk.msra.mxu1 %vm374_vm6, %v4041_v12  ;;  %5134 = vmatprep.mubr.msk.f32.mxu1 %vm5736_vm2, %v7018_v13 }
0x187f   :  { %5137 = vmatprep.subr.mxu1 %v7018_v13 }
0x1881   :  { %5135 = vmatmul.mubr.msk.f32.vlgmr.msra.gmra.mrb[40].mxu1 %vm374_vm6, %v4198_v2 }
0x1882   :  { %5138 = vmatpush3.xpose.msk.msra.mxu1 %vm374_vm6, %v4042_v53  ;;  %5139 = vmatprep.mubr.msk.f32.mxu1 %vm5736_vm2, %v7018_v13 }
0x1885   :  { %5140 = vmatmul.mubr.msk.f32.vlgmr.msra.gmra.mrb[42].mxu1 %vm374_vm6, %v4276_v42 }
0x194c   :  { %v4118_v14 = vpop.f32.mrb[36].mxu1 }
0x194d   :  { %v5126_v13 = vpop.f32.mrb[37].mxu1 }
0x1950   :  { %v4193_v34 = vpop.f32.mrb[38].mxu1 }
0x1951   :  { %v4194_v17 = vadd.f32 %v4193_v34, %v4118_v14  ;;  %v5131_v27 = vpop.f32.mrb[39].mxu1 }
0x1954   :  { %v4270_v59 = vpop.f32.mrb[40].mxu1 }
0x1955   :  { %v4274_v60 = vadd.f32 %v4270_v59, %v4194_v17  ;;  %v5136_v16 = vpop.f32.mrb[41].mxu1 }
0x1958   :  { %v4348_v35 = vpop.f32.mrb[42].mxu1 }
0x1959   :  { %v4352_v36 = vadd.f32 %v4348_v35, %v4274_v60  ;;  %v5141_v26 = vpop.f32.mrb[43].mxu1 }
0x195b   :  { %v4359_v46 = vadd.f32 %v4357_v21, %v4352_v36 }
0x195d   :  { %v4378_v57 = vmul.f32 %v4369_v50, %v4359_v46 }
0x195f   :  { %v4379_v8 = vadd.f32 %v4378_v57, %v4377_v24 }
0x1961   :  { %4382 = vrot.lane.b32.xlu1 %v4379_v8, %s5738_s16  ;;  %4380 = vst.msk [vmem:[%s7005_s3] sm:$0xff] %vm38_vm5, %v4379_v8 }
0x19d3   :  { %v4383_v62 = vpop.permute.xlu1 %4382 }
0x19d4   :  { %4385 = vst.msk [vmem:[%s7005_s3 + $0x8] sm:$0xff] %vm38_vm5, %v4383_v62 }

</bundles_post_ra>
